<compile_context>
chip_gen: v7x
topology: tpu7x:2x2x1
jax: 0.10.0
libtpu: 0.0.40
codegen_flags: <defaults>
</compile_context>

<pallas_src>
import functools
import math

import jax
import jax.numpy as jnp
import numpy as np
from jax import lax
from jax.experimental import pallas as pl
from jax.experimental.pallas import tpu as pltpu


def _bayar_conv_kernel(w_ref, x_ref, o_ref, xflat_ref, patch_ref, *, k, pad, ws,
                       mxu_dtype):
    # w_ref     : (Cout_pad, CKK_pad)      VMEM  constrained weight, MXU lhs
    # x_ref     : (1, Cin, H, W)           VMEM  one batch element
    # o_ref     : (1, Cout_pad, Ho*Ws)     VMEM  lane-dense conv output (extended cols)
    # xflat_ref : (Cin, (Hp+1)*Ws)         VMEM  flat zero-padded image, Ws >= W+2*pad
    # patch_ref : (CKK_pad, Ho*Ws)         VMEM  im2col slab (MXU rhs)
    cin = x_ref.shape[1]
    h, w = x_ref.shape[2], x_ref.shape[3]
    lf = xflat_ref.shape[1]
    ckk_pad, npix = patch_ref.shape
    ckk = cin * k * k

    # ---- 1) zero only the loop-invariant halo/tail lanes (review #5).
    # The image lanes are fully rewritten below on every grid step, so this needs no
    # program_id gating and is safe under megacore "parallel" batch sharding.
    first = pad * ws + pad                       # everything before the first image pixel
    xflat_ref[:, pl.ds(0, first)] = jnp.zeros((cin, first), jnp.float32)
    gap = ws - w                                 # right halo of row i + left halo of row i+1
    for i in range(h - 1):
        s = (pad + i) * ws + pad + w
        xflat_ref[:, pl.ds(s, gap)] = jnp.zeros((cin, gap), jnp.float32)
    last = (pad + h - 1) * ws + pad + w          # everything after the last image pixel
    xflat_ref[:, pl.ds(last, lf - last)] = jnp.zeros((cin, lf - last), jnp.float32)

    # ---- 2) drop the image rows into the flat padded layout (in-kernel f32 cast, #12).
    for i in range(h):
        off = (pad + i) * ws + pad
        xflat_ref[:, pl.ds(off, w)] = x_ref[0, :, i, :].astype(jnp.float32)

    # ---- 3) im2col: each tap's patch row is ONE contiguous lane slice of the flat
    # scratch (no reshape/transpose, no in-register band slicing, review #7), shared by
    # every output channel.  Static Python loop: each iteration is a load+store pair
    # with no accumulator live range, so unrolling is vreg-safe (review #11).
    for ci in range(cin):
        for kh in range(k):
            for kw in range(k):
                r = (ci * k + kh) * k + kw
                base = kh * ws + kw
                patch_ref[pl.ds(r, 1), :] = (
                    xflat_ref[pl.ds(ci, 1), pl.ds(base, npix)].astype(mxu_dtype))
    if ckk_pad > ckk:  # zero the contraction-padding rows (keep 0*garbage off the MXU)
        patch_ref[pl.ds(ckk, ckk_pad - ckk), :] = jnp.zeros(
            (ckk_pad - ckk, npix), mxu_dtype)

    # ---- 4) all MACs in one MXU matmul; fully lane/sublane-dense output store (#3,#4).
    acc = jnp.dot(w_ref[...], patch_ref[...], preferred_element_type=jnp.float32)
    o_ref[0] = acc.astype(o_ref.dtype)


def bayar_conv2d(x_nchw, weight, padding=2, mxu_dtype=jnp.float32):
    """Forward pass of BayarConv2D.

    x: (N, OC, H, W), weight: (IC, OC, K, K)
    returns (out (N, IC, Ho, Wo), constrained weight (IC, OC, K, K)).
    Use mxu_dtype=jnp.bfloat16 on v6e/v7x for 2x MXU throughput (f32 accumulation kept).
    """
    ic, oc, k, _ = weight.shape
    n, cin, h, w = x_nchw.shape
    assert cin == oc, "x channels must equal `outputchanel` (torch semantics)"
    cout = ic
    pad = padding
    hp, wp = h + 2 * pad, w + 2 * pad
    ho, wo = hp - k + 1, wp - k + 1

    # ---- Bayar constraint hoisted out of the kernel (review #1/#2): tiny tensor op.
    w32 = weight.astype(jnp.float32)
    mask = jnp.zeros((k, k), jnp.float32).at[k // 2, k // 2].set(1.0)
    w_nc = w32 * (1.0 - mask)
    rest = jnp.sum(w_nc, axis=(2, 3), keepdims=True)
    w_c = w_nc / (rest + 1e-7) - mask            # center tap = -1, rest sums to 1

    # ---- pack the weight as the MXU lhs: pad Cout to 8 sublanes, Cin*K*K to 128 lanes.
    ckk = cin * k * k
    ckk_pad = ((ckk + 127) // 128) * 128
    cout_pad = ((cout + 7) // 8) * 8
    w_mat = w_c.reshape(cout, ckk)
    w_mat = jnp.pad(w_mat, ((0, cout_pad - cout), (0, ckk_pad - ckk))).astype(mxu_dtype)

    # ---- flat padded-image geometry: row width Ws >= Wp chosen so Ho*Ws % 128 == 0
    # (lane-dense patch slab and output).  Columns [Wo, Ws) of each output row are
    # throwaway pixels; the wrapper slices them off.
    g = 128 // math.gcd(ho, 128)
    ws = ((wp + g - 1) // g) * g
    npix = ho * ws
    lf = (hp + 1) * ws                            # + one spare zero row for edge windows

    kern = functools.partial(_bayar_conv_kernel, k=k, pad=pad, ws=ws,
                             mxu_dtype=mxu_dtype)
    out_ext = pl.pallas_call(
        kern,
        out_shape=jax.ShapeDtypeStruct((n, cout_pad, npix), x_nchw.dtype),
        grid=(n,),
        in_specs=[
            pl.BlockSpec((cout_pad, ckk_pad), lambda b: (0, 0)),       # constrained weight
            pl.BlockSpec((1, cin, h, w), lambda b: (b, 0, 0, 0)),      # one batch element
        ],
        out_specs=pl.BlockSpec((1, cout_pad, npix), lambda b: (b, 0, 0)),
        scratch_shapes=[
            pltpu.VMEM((cin, lf), jnp.float32),                        # flat padded image
            pltpu.VMEM((ckk_pad, npix), mxu_dtype),                    # im2col slab
        ],
        compiler_params=pltpu.CompilerParams(
            dimension_semantics=("parallel",),
            vmem_limit_bytes=32 * 1024 * 1024),
    )(w_mat, x_nchw)

    out = out_ext.reshape(n, cout_pad, ho, ws)[:, :cout, :, :wo]
    return out, w_c


if __name__ == "__main__":
    # Module config: BayarConv2D(inputchanel=6, outputchanel=4, kernelsize=5)
    inputchanel, outputchanel, kernelsize = 6, 4, 5
    N, H, W = 2, 16, 16

    key = jax.random.PRNGKey(0)
    kw_key, kx_key = jax.random.split(key)

    # xavier_normal_ on a (IC, OC, K, K) tensor: fan_in = OC*K*K, fan_out = IC*K*K
    fan_in = outputchanel * kernelsize * kernelsize
    fan_out = inputchanel * kernelsize * kernelsize
    std = float(np.sqrt(2.0 / (fan_in + fan_out)))
    weight = std * jax.random.normal(
        kw_key, (inputchanel, outputchanel, kernelsize, kernelsize), jnp.float32)

    # x is NCHW like torch; its channel count must equal `outputchanel`.
    x_nchw = jax.random.normal(kx_key, (N, outputchanel, H, W), jnp.float32)

    out, w_bayar = bayar_conv2d(x_nchw, weight, padding=2)
    out = jax.block_until_ready(out)
    assert out.shape == (N, inputchanel, H, W)
    assert w_bayar.shape == (inputchanel, outputchanel, kernelsize, kernelsize)

    # --- reference checks ---
    # 1) weight constraint, in numpy
    w_np = np.asarray(weight)
    m = np.zeros_like(w_np)
    m[:, :, kernelsize // 2, kernelsize // 2] = 1.0
    w_ref = w_np * (1.0 - m)
    rest = w_ref.sum(axis=(2, 3), keepdims=True)
    w_ref = w_ref / (rest + 1e-7) - m
    np.testing.assert_allclose(np.asarray(w_bayar), w_ref, atol=1e-5, rtol=1e-5)

    # 2) conv2d, against XLA's conv with the same constrained weight
    ref = lax.conv_general_dilated(
        x_nchw, jnp.asarray(w_ref), window_strides=(1, 1),
        padding=((2, 2), (2, 2)),
        dimension_numbers=("NCHW", "OIHW", "NCHW"),
        precision=lax.Precision.HIGHEST)
    ref_np = np.asarray(ref)
    out_np = np.asarray(out)
    scale = float(np.abs(ref_np).max())
    np.testing.assert_allclose(out_np, ref_np, rtol=3e-3, atol=3e-3 * scale + 1e-5)

    print("KERNEL_OK")
</pallas_src>

<mosaic_0001>
module attributes {stable_mosaic.version = 11 : i64} {
  func.func @_bayar_conv_kernel(%arg0: i32, %arg1: memref<8x128xf32, #tpu.memory_space<vmem>>, %arg2: memref<1x4x16x16xf32, #tpu.memory_space<vmem>>, %arg3: memref<1x8x384xf32, #tpu.memory_space<vmem>>, %arg4: memref<4x504xf32, #tpu.memory_space<vmem>>, %arg5: memref<128x384xf32, #tpu.memory_space<vmem>>) attributes {dimension_semantics = [#tpu.dimension_semantics<parallel>], iteration_bounds = array<i64: 2>, scalar_prefetch = 0 : i64, scratch_operands = 2 : i64, tpu.core_type = #tpu.core_type<tc>, window_params = [{pipeline_mode = #tpu.pipeline_mode<synchronous>, transform_indices = @transform_0, window_bounds = array<i64: 8, 128>}, {transform_indices = @transform_1, window_bounds = array<i64: 1, 4, 16, 16>}, {transform_indices = @transform_2, window_bounds = array<i64: 1, 8, 384>}]} {
    %cst = arith.constant 0.000000e+00 : f32
    %0 = vector.broadcast %cst : f32 to vector<4x50xf32>
    %c0 = arith.constant 0 : index
    %c0_0 = arith.constant 0 : index
    %1 = vector.load %arg4[%c0, %c0_0] : memref<4x504xf32, #tpu.memory_space<vmem>>, vector<4x50xf32>
    tpu.vector_store %arg4[%c0, %c0_0], %0 {strides = array<i32>} : memref<4x504xf32, #tpu.memory_space<vmem>>, vector<4x50xf32>,
    %cst_1 = arith.constant 0.000000e+00 : f32
    %2 = vector.broadcast %cst_1 : f32 to vector<4x8xf32>
    %c0_2 = arith.constant 0 : index
    %c66 = arith.constant 66 : index
    %3 = vector.load %arg4[%c0_2, %c66] : memref<4x504xf32, #tpu.memory_space<vmem>>, vector<4x8xf32>
    tpu.vector_store %arg4[%c0_2, %c66], %2 {strides = array<i32>} : memref<4x504xf32, #tpu.memory_space<vmem>>, vector<4x8xf32>,
    %cst_3 = arith.constant 0.000000e+00 : f32
    %4 = vector.broadcast %cst_3 : f32 to vector<4x8xf32>
    %c0_4 = arith.constant 0 : index
    %c90 = arith.constant 90 : index
    %5 = vector.load %arg4[%c0_4, %c90] : memref<4x504xf32, #tpu.memory_space<vmem>>, vector<4x8xf32>
    tpu.vector_store %arg4[%c0_4, %c90], %4 {strides = array<i32>} : memref<4x504xf32, #tpu.memory_space<vmem>>, vector<4x8xf32>,
    %cst_5 = arith.constant 0.000000e+00 : f32
    %6 = vector.broadcast %cst_5 : f32 to vector<4x8xf32>
    %c0_6 = arith.constant 0 : index
    %c114 = arith.constant 114 : index
    %7 = vector.load %arg4[%c0_6, %c114] : memref<4x504xf32, #tpu.memory_space<vmem>>, vector<4x8xf32>
    tpu.vector_store %arg4[%c0_6, %c114], %6 {strides = array<i32>} : memref<4x504xf32, #tpu.memory_space<vmem>>, vector<4x8xf32>,
    %cst_7 = arith.constant 0.000000e+00 : f32
    %8 = vector.broadcast %cst_7 : f32 to vector<4x8xf32>
    %c0_8 = arith.constant 0 : index
    %c138 = arith.constant 138 : index
    %9 = vector.load %arg4[%c0_8, %c138] : memref<4x504xf32, #tpu.memory_space<vmem>>, vector<4x8xf32>
    tpu.vector_store %arg4[%c0_8, %c138], %8 {strides = array<i32>} : memref<4x504xf32, #tpu.memory_space<vmem>>, vector<4x8xf32>,
    %cst_9 = arith.constant 0.000000e+00 : f32
    %10 = vector.broadcast %cst_9 : f32 to vector<4x8xf32>
    %c0_10 = arith.constant 0 : index
    %c162 = arith.constant 162 : index
    %11 = vector.load %arg4[%c0_10, %c162] : memref<4x504xf32, #tpu.memory_space<vmem>>, vector<4x8xf32>
    tpu.vector_store %arg4[%c0_10, %c162], %10 {strides = array<i32>} : memref<4x504xf32, #tpu.memory_space<vmem>>, vector<4x8xf32>,
    %cst_11 = arith.constant 0.000000e+00 : f32
    %12 = vector.broadcast %cst_11 : f32 to vector<4x8xf32>
    %c0_12 = arith.constant 0 : index
    %c186 = arith.constant 186 : index
    %13 = vector.load %arg4[%c0_12, %c186] : memref<4x504xf32, #tpu.memory_space<vmem>>, vector<4x8xf32>
    tpu.vector_store %arg4[%c0_12, %c186], %12 {strides = array<i32>} : memref<4x504xf32, #tpu.memory_space<vmem>>, vector<4x8xf32>,
    %cst_13 = arith.constant 0.000000e+00 : f32
    %14 = vector.broadcast %cst_13 : f32 to vector<4x8xf32>
    %c0_14 = arith.constant 0 : index
    %c210 = arith.constant 210 : index
    %15 = vector.load %arg4[%c0_14, %c210] : memref<4x504xf32, #tpu.memory_space<vmem>>, vector<4x8xf32>
    tpu.vector_store %arg4[%c0_14, %c210], %14 {strides = array<i32>} : memref<4x504xf32, #tpu.memory_space<vmem>>, vector<4x8xf32>,
    %cst_15 = arith.constant 0.000000e+00 : f32
    %16 = vector.broadcast %cst_15 : f32 to vector<4x8xf32>
    %c0_16 = arith.constant 0 : index
    %c234 = arith.constant 234 : index
    %17 = vector.load %arg4[%c0_16, %c234] : memref<4x504xf32, #tpu.memory_space<vmem>>, vector<4x8xf32>
    tpu.vector_store %arg4[%c0_16, %c234], %16 {strides = array<i32>} : memref<4x504xf32, #tpu.memory_space<vmem>>, vector<4x8xf32>,
    %cst_17 = arith.constant 0.000000e+00 : f32
    %18 = vector.broadcast %cst_17 : f32 to vector<4x8xf32>
    %c0_18 = arith.constant 0 : index
    %c258 = arith.constant 258 : index
    %19 = vector.load %arg4[%c0_18, %c258] : memref<4x504xf32, #tpu.memory_space<vmem>>, vector<4x8xf32>
    tpu.vector_store %arg4[%c0_18, %c258], %18 {strides = array<i32>} : memref<4x504xf32, #tpu.memory_space<vmem>>, vector<4x8xf32>,
    %cst_19 = arith.constant 0.000000e+00 : f32
    %20 = vector.broadcast %cst_19 : f32 to vector<4x8xf32>
    %c0_20 = arith.constant 0 : index
    %c282 = arith.constant 282 : index
    %21 = vector.load %arg4[%c0_20, %c282] : memref<4x504xf32, #tpu.memory_space<vmem>>, vector<4x8xf32>
    tpu.vector_store %arg4[%c0_20, %c282], %20 {strides = array<i32>} : memref<4x504xf32, #tpu.memory_space<vmem>>, vector<4x8xf32>,
    %cst_21 = arith.constant 0.000000e+00 : f32
    %22 = vector.broadcast %cst_21 : f32 to vector<4x8xf32>
    %c0_22 = arith.constant 0 : index
    %c306 = arith.constant 306 : index
    %23 = vector.load %arg4[%c0_22, %c306] : memref<4x504xf32, #tpu.memory_space<vmem>>, vector<4x8xf32>
    tpu.vector_store %arg4[%c0_22, %c306], %22 {strides = array<i32>} : memref<4x504xf32, #tpu.memory_space<vmem>>, vector<4x8xf32>,
    %cst_23 = arith.constant 0.000000e+00 : f32
    %24 = vector.broadcast %cst_23 : f32 to vector<4x8xf32>
    %c0_24 = arith.constant 0 : index
    %c330 = arith.constant 330 : index
    %25 = vector.load %arg4[%c0_24, %c330] : memref<4x504xf32, #tpu.memory_space<vmem>>, vector<4x8xf32>
    tpu.vector_store %arg4[%c0_24, %c330], %24 {strides = array<i32>} : memref<4x504xf32, #tpu.memory_space<vmem>>, vector<4x8xf32>,
    %cst_25 = arith.constant 0.000000e+00 : f32
    %26 = vector.broadcast %cst_25 : f32 to vector<4x8xf32>
    %c0_26 = arith.constant 0 : index
    %c354 = arith.constant 354 : index
    %27 = vector.load %arg4[%c0_26, %c354] : memref<4x504xf32, #tpu.memory_space<vmem>>, vector<4x8xf32>
    tpu.vector_store %arg4[%c0_26, %c354], %26 {strides = array<i32>} : memref<4x504xf32, #tpu.memory_space<vmem>>, vector<4x8xf32>,
    %cst_27 = arith.constant 0.000000e+00 : f32
    %28 = vector.broadcast %cst_27 : f32 to vector<4x8xf32>
    %c0_28 = arith.constant 0 : index
    %c378 = arith.constant 378 : index
    %29 = vector.load %arg4[%c0_28, %c378] : memref<4x504xf32, #tpu.memory_space<vmem>>, vector<4x8xf32>
    tpu.vector_store %arg4[%c0_28, %c378], %28 {strides = array<i32>} : memref<4x504xf32, #tpu.memory_space<vmem>>, vector<4x8xf32>,
    %cst_29 = arith.constant 0.000000e+00 : f32
    %30 = vector.broadcast %cst_29 : f32 to vector<4x8xf32>
    %c0_30 = arith.constant 0 : index
    %c402 = arith.constant 402 : index
    %31 = vector.load %arg4[%c0_30, %c402] : memref<4x504xf32, #tpu.memory_space<vmem>>, vector<4x8xf32>
    tpu.vector_store %arg4[%c0_30, %c402], %30 {strides = array<i32>} : memref<4x504xf32, #tpu.memory_space<vmem>>, vector<4x8xf32>,
    %cst_31 = arith.constant 0.000000e+00 : f32
    %32 = vector.broadcast %cst_31 : f32 to vector<4x78xf32>
    %c0_32 = arith.constant 0 : index
    %c426 = arith.constant 426 : index
    %33 = vector.load %arg4[%c0_32, %c426] : memref<4x504xf32, #tpu.memory_space<vmem>>, vector<4x78xf32>
    tpu.vector_store %arg4[%c0_32, %c426], %32 {strides = array<i32>} : memref<4x504xf32, #tpu.memory_space<vmem>>, vector<4x78xf32>,
    %c0_33 = arith.constant 0 : index
    %c0_34 = arith.constant 0 : index
    %c0_35 = arith.constant 0 : index
    %c0_36 = arith.constant 0 : index
    %34 = vector.load %arg2[%c0_33, %c0_34, %c0_35, %c0_36] : memref<1x4x16x16xf32, #tpu.memory_space<vmem>>, vector<1x4x1x16xf32>
    %35 = vector.shape_cast %34 : vector<1x4x1x16xf32> to vector<4x16xf32>
    %c0_37 = arith.constant 0 : index
    %c50 = arith.constant 50 : index
    %36 = vector.load %arg4[%c0_37, %c50] : memref<4x504xf32, #tpu.memory_space<vmem>>, vector<4x16xf32>
    tpu.vector_store %arg4[%c0_37, %c50], %35 {strides = array<i32>} : memref<4x504xf32, #tpu.memory_space<vmem>>, vector<4x16xf32>,
    %c0_38 = arith.constant 0 : index
    %c0_39 = arith.constant 0 : index
    %c1 = arith.constant 1 : index
    %c0_40 = arith.constant 0 : index
    %37 = vector.load %arg2[%c0_38, %c0_39, %c1, %c0_40] : memref<1x4x16x16xf32, #tpu.memory_space<vmem>>, vector<1x4x1x16xf32>
    %38 = vector.shape_cast %37 : vector<1x4x1x16xf32> to vector<4x16xf32>
    %c0_41 = arith.constant 0 : index
    %c74 = arith.constant 74 : index
    %39 = vector.load %arg4[%c0_41, %c74] : memref<4x504xf32, #tpu.memory_space<vmem>>, vector<4x16xf32>
    tpu.vector_store %arg4[%c0_41, %c74], %38 {strides = array<i32>} : memref<4x504xf32, #tpu.memory_space<vmem>>, vector<4x16xf32>,
    %c0_42 = arith.constant 0 : index
    %c0_43 = arith.constant 0 : index
    %c2 = arith.constant 2 : index
    %c0_44 = arith.constant 0 : index
    %40 = vector.load %arg2[%c0_42, %c0_43, %c2, %c0_44] : memref<1x4x16x16xf32, #tpu.memory_space<vmem>>, vector<1x4x1x16xf32>
    %41 = vector.shape_cast %40 : vector<1x4x1x16xf32> to vector<4x16xf32>
    %c0_45 = arith.constant 0 : index
    %c98 = arith.constant 98 : index
    %42 = vector.load %arg4[%c0_45, %c98] : memref<4x504xf32, #tpu.memory_space<vmem>>, vector<4x16xf32>
    tpu.vector_store %arg4[%c0_45, %c98], %41 {strides = array<i32>} : memref<4x504xf32, #tpu.memory_space<vmem>>, vector<4x16xf32>,
    %c0_46 = arith.constant 0 : index
    %c0_47 = arith.constant 0 : index
    %c3 = arith.constant 3 : index
    %c0_48 = arith.constant 0 : index
    %43 = vector.load %arg2[%c0_46, %c0_47, %c3, %c0_48] : memref<1x4x16x16xf32, #tpu.memory_space<vmem>>, vector<1x4x1x16xf32>
    %44 = vector.shape_cast %43 : vector<1x4x1x16xf32> to vector<4x16xf32>
    %c0_49 = arith.constant 0 : index
    %c122 = arith.constant 122 : index
    %45 = vector.load %arg4[%c0_49, %c122] : memref<4x504xf32, #tpu.memory_space<vmem>>, vector<4x16xf32>
    tpu.vector_store %arg4[%c0_49, %c122], %44 {strides = array<i32>} : memref<4x504xf32, #tpu.memory_space<vmem>>, vector<4x16xf32>,
    %c0_50 = arith.constant 0 : index
    %c0_51 = arith.constant 0 : index
    %c4 = arith.constant 4 : index
    %c0_52 = arith.constant 0 : index
    %46 = vector.load %arg2[%c0_50, %c0_51, %c4, %c0_52] : memref<1x4x16x16xf32, #tpu.memory_space<vmem>>, vector<1x4x1x16xf32>
    %47 = vector.shape_cast %46 : vector<1x4x1x16xf32> to vector<4x16xf32>
    %c0_53 = arith.constant 0 : index
    %c146 = arith.constant 146 : index
    %48 = vector.load %arg4[%c0_53, %c146] : memref<4x504xf32, #tpu.memory_space<vmem>>, vector<4x16xf32>
    tpu.vector_store %arg4[%c0_53, %c146], %47 {strides = array<i32>} : memref<4x504xf32, #tpu.memory_space<vmem>>, vector<4x16xf32>,
    %c0_54 = arith.constant 0 : index
    %c0_55 = arith.constant 0 : index
    %c5 = arith.constant 5 : index
    %c0_56 = arith.constant 0 : index
    %49 = vector.load %arg2[%c0_54, %c0_55, %c5, %c0_56] : memref<1x4x16x16xf32, #tpu.memory_space<vmem>>, vector<1x4x1x16xf32>
    %50 = vector.shape_cast %49 : vector<1x4x1x16xf32> to vector<4x16xf32>
    %c0_57 = arith.constant 0 : index
    %c170 = arith.constant 170 : index
    %51 = vector.load %arg4[%c0_57, %c170] : memref<4x504xf32, #tpu.memory_space<vmem>>, vector<4x16xf32>
    tpu.vector_store %arg4[%c0_57, %c170], %50 {strides = array<i32>} : memref<4x504xf32, #tpu.memory_space<vmem>>, vector<4x16xf32>,
    %c0_58 = arith.constant 0 : index
    %c0_59 = arith.constant 0 : index
    %c6 = arith.constant 6 : index
    %c0_60 = arith.constant 0 : index
    %52 = vector.load %arg2[%c0_58, %c0_59, %c6, %c0_60] : memref<1x4x16x16xf32, #tpu.memory_space<vmem>>, vector<1x4x1x16xf32>
    %53 = vector.shape_cast %52 : vector<1x4x1x16xf32> to vector<4x16xf32>
    %c0_61 = arith.constant 0 : index
    %c194 = arith.constant 194 : index
    %54 = vector.load %arg4[%c0_61, %c194] : memref<4x504xf32, #tpu.memory_space<vmem>>, vector<4x16xf32>
    tpu.vector_store %arg4[%c0_61, %c194], %53 {strides = array<i32>} : memref<4x504xf32, #tpu.memory_space<vmem>>, vector<4x16xf32>,
    %c0_62 = arith.constant 0 : index
    %c0_63 = arith.constant 0 : index
    %c7 = arith.constant 7 : index
    %c0_64 = arith.constant 0 : index
    %55 = vector.load %arg2[%c0_62, %c0_63, %c7, %c0_64] : memref<1x4x16x16xf32, #tpu.memory_space<vmem>>, vector<1x4x1x16xf32>
    %56 = vector.shape_cast %55 : vector<1x4x1x16xf32> to vector<4x16xf32>
    %c0_65 = arith.constant 0 : index
    %c218 = arith.constant 218 : index
    %57 = vector.load %arg4[%c0_65, %c218] : memref<4x504xf32, #tpu.memory_space<vmem>>, vector<4x16xf32>
    tpu.vector_store %arg4[%c0_65, %c218], %56 {strides = array<i32>} : memref<4x504xf32, #tpu.memory_space<vmem>>, vector<4x16xf32>,
    %c0_66 = arith.constant 0 : index
    %c0_67 = arith.constant 0 : index
    %c8 = arith.constant 8 : index
    %c0_68 = arith.constant 0 : index
    %58 = vector.load %arg2[%c0_66, %c0_67, %c8, %c0_68] : memref<1x4x16x16xf32, #tpu.memory_space<vmem>>, vector<1x4x1x16xf32>
    %59 = vector.shape_cast %58 : vector<1x4x1x16xf32> to vector<4x16xf32>
    %c0_69 = arith.constant 0 : index
    %c242 = arith.constant 242 : index
    %60 = vector.load %arg4[%c0_69, %c242] : memref<4x504xf32, #tpu.memory_space<vmem>>, vector<4x16xf32>
    tpu.vector_store %arg4[%c0_69, %c242], %59 {strides = array<i32>} : memref<4x504xf32, #tpu.memory_space<vmem>>, vector<4x16xf32>,
    %c0_70 = arith.constant 0 : index
    %c0_71 = arith.constant 0 : index
    %c9 = arith.constant 9 : index
    %c0_72 = arith.constant 0 : index
    %61 = vector.load %arg2[%c0_70, %c0_71, %c9, %c0_72] : memref<1x4x16x16xf32, #tpu.memory_space<vmem>>, vector<1x4x1x16xf32>
    %62 = vector.shape_cast %61 : vector<1x4x1x16xf32> to vector<4x16xf32>
    %c0_73 = arith.constant 0 : index
    %c266 = arith.constant 266 : index
    %63 = vector.load %arg4[%c0_73, %c266] : memref<4x504xf32, #tpu.memory_space<vmem>>, vector<4x16xf32>
    tpu.vector_store %arg4[%c0_73, %c266], %62 {strides = array<i32>} : memref<4x504xf32, #tpu.memory_space<vmem>>, vector<4x16xf32>,
    %c0_74 = arith.constant 0 : index
    %c0_75 = arith.constant 0 : index
    %c10 = arith.constant 10 : index
    %c0_76 = arith.constant 0 : index
    %64 = vector.load %arg2[%c0_74, %c0_75, %c10, %c0_76] : memref<1x4x16x16xf32, #tpu.memory_space<vmem>>, vector<1x4x1x16xf32>
    %65 = vector.shape_cast %64 : vector<1x4x1x16xf32> to vector<4x16xf32>
    %c0_77 = arith.constant 0 : index
    %c290 = arith.constant 290 : index
    %66 = vector.load %arg4[%c0_77, %c290] : memref<4x504xf32, #tpu.memory_space<vmem>>, vector<4x16xf32>
    tpu.vector_store %arg4[%c0_77, %c290], %65 {strides = array<i32>} : memref<4x504xf32, #tpu.memory_space<vmem>>, vector<4x16xf32>,
    %c0_78 = arith.constant 0 : index
    %c0_79 = arith.constant 0 : index
    %c11 = arith.constant 11 : index
    %c0_80 = arith.constant 0 : index
    %67 = vector.load %arg2[%c0_78, %c0_79, %c11, %c0_80] : memref<1x4x16x16xf32, #tpu.memory_space<vmem>>, vector<1x4x1x16xf32>
    %68 = vector.shape_cast %67 : vector<1x4x1x16xf32> to vector<4x16xf32>
    %c0_81 = arith.constant 0 : index
    %c314 = arith.constant 314 : index
    %69 = vector.load %arg4[%c0_81, %c314] : memref<4x504xf32, #tpu.memory_space<vmem>>, vector<4x16xf32>
    tpu.vector_store %arg4[%c0_81, %c314], %68 {strides = array<i32>} : memref<4x504xf32, #tpu.memory_space<vmem>>, vector<4x16xf32>,
    %c0_82 = arith.constant 0 : index
    %c0_83 = arith.constant 0 : index
    %c12 = arith.constant 12 : index
    %c0_84 = arith.constant 0 : index
    %70 = vector.load %arg2[%c0_82, %c0_83, %c12, %c0_84] : memref<1x4x16x16xf32, #tpu.memory_space<vmem>>, vector<1x4x1x16xf32>
    %71 = vector.shape_cast %70 : vector<1x4x1x16xf32> to vector<4x16xf32>
    %c0_85 = arith.constant 0 : index
    %c338 = arith.constant 338 : index
    %72 = vector.load %arg4[%c0_85, %c338] : memref<4x504xf32, #tpu.memory_space<vmem>>, vector<4x16xf32>
    tpu.vector_store %arg4[%c0_85, %c338], %71 {strides = array<i32>} : memref<4x504xf32, #tpu.memory_space<vmem>>, vector<4x16xf32>,
    %c0_86 = arith.constant 0 : index
    %c0_87 = arith.constant 0 : index
    %c13 = arith.constant 13 : index
    %c0_88 = arith.constant 0 : index
    %73 = vector.load %arg2[%c0_86, %c0_87, %c13, %c0_88] : memref<1x4x16x16xf32, #tpu.memory_space<vmem>>, vector<1x4x1x16xf32>
    %74 = vector.shape_cast %73 : vector<1x4x1x16xf32> to vector<4x16xf32>
    %c0_89 = arith.constant 0 : index
    %c362 = arith.constant 362 : index
    %75 = vector.load %arg4[%c0_89, %c362] : memref<4x504xf32, #tpu.memory_space<vmem>>, vector<4x16xf32>
    tpu.vector_store %arg4[%c0_89, %c362], %74 {strides = array<i32>} : memref<4x504xf32, #tpu.memory_space<vmem>>, vector<4x16xf32>,
    %c0_90 = arith.constant 0 : index
    %c0_91 = arith.constant 0 : index
    %c14 = arith.constant 14 : index
    %c0_92 = arith.constant 0 : index
    %76 = vector.load %arg2[%c0_90, %c0_91, %c14, %c0_92] : memref<1x4x16x16xf32, #tpu.memory_space<vmem>>, vector<1x4x1x16xf32>
    %77 = vector.shape_cast %76 : vector<1x4x1x16xf32> to vector<4x16xf32>
    %c0_93 = arith.constant 0 : index
    %c386 = arith.constant 386 : index
    %78 = vector.load %arg4[%c0_93, %c386] : memref<4x504xf32, #tpu.memory_space<vmem>>, vector<4x16xf32>
    tpu.vector_store %arg4[%c0_93, %c386], %77 {strides = array<i32>} : memref<4x504xf32, #tpu.memory_space<vmem>>, vector<4x16xf32>,
    %c0_94 = arith.constant 0 : index
    %c0_95 = arith.constant 0 : index
    %c15 = arith.constant 15 : index
    %c0_96 = arith.constant 0 : index
    %79 = vector.load %arg2[%c0_94, %c0_95, %c15, %c0_96] : memref<1x4x16x16xf32, #tpu.memory_space<vmem>>, vector<1x4x1x16xf32>
    %80 = vector.shape_cast %79 : vector<1x4x1x16xf32> to vector<4x16xf32>
    %c0_97 = arith.constant 0 : index
    %c410 = arith.constant 410 : index
    %81 = vector.load %arg4[%c0_97, %c410] : memref<4x504xf32, #tpu.memory_space<vmem>>, vector<4x16xf32>
    tpu.vector_store %arg4[%c0_97, %c410], %80 {strides = array<i32>} : memref<4x504xf32, #tpu.memory_space<vmem>>, vector<4x16xf32>,
    %c0_98 = arith.constant 0 : index
    %c0_99 = arith.constant 0 : index
    %82 = vector.load %arg4[%c0_98, %c0_99] : memref<4x504xf32, #tpu.memory_space<vmem>>, vector<1x384xf32>
    %c0_100 = arith.constant 0 : index
    %c0_101 = arith.constant 0 : index
    %83 = vector.load %arg5[%c0_100, %c0_101] : memref<128x384xf32, #tpu.memory_space<vmem>>, vector<1x384xf32>
    tpu.vector_store %arg5[%c0_100, %c0_101], %82 {strides = array<i32>} : memref<128x384xf32, #tpu.memory_space<vmem>>, vector<1x384xf32>,
    %c0_102 = arith.constant 0 : index
    %c1_103 = arith.constant 1 : index
    %84 = vector.load %arg4[%c0_102, %c1_103] : memref<4x504xf32, #tpu.memory_space<vmem>>, vector<1x384xf32>
    %c1_104 = arith.constant 1 : index
    %c0_105 = arith.constant 0 : index
    %85 = vector.load %arg5[%c1_104, %c0_105] : memref<128x384xf32, #tpu.memory_space<vmem>>, vector<1x384xf32>
    tpu.vector_store %arg5[%c1_104, %c0_105], %84 {strides = array<i32>} : memref<128x384xf32, #tpu.memory_space<vmem>>, vector<1x384xf32>,
    %c0_106 = arith.constant 0 : index
    %c2_107 = arith.constant 2 : index
    %86 = vector.load %arg4[%c0_106, %c2_107] : memref<4x504xf32, #tpu.memory_space<vmem>>, vector<1x384xf32>
    %c2_108 = arith.constant 2 : index
    %c0_109 = arith.constant 0 : index
    %87 = vector.load %arg5[%c2_108, %c0_109] : memref<128x384xf32, #tpu.memory_space<vmem>>, vector<1x384xf32>
    tpu.vector_store %arg5[%c2_108, %c0_109], %86 {strides = array<i32>} : memref<128x384xf32, #tpu.memory_space<vmem>>, vector<1x384xf32>,
    %c0_110 = arith.constant 0 : index
    %c3_111 = arith.constant 3 : index
    %88 = vector.load %arg4[%c0_110, %c3_111] : memref<4x504xf32, #tpu.memory_space<vmem>>, vector<1x384xf32>
    %c3_112 = arith.constant 3 : index
    %c0_113 = arith.constant 0 : index
    %89 = vector.load %arg5[%c3_112, %c0_113] : memref<128x384xf32, #tpu.memory_space<vmem>>, vector<1x384xf32>
    tpu.vector_store %arg5[%c3_112, %c0_113], %88 {strides = array<i32>} : memref<128x384xf32, #tpu.memory_space<vmem>>, vector<1x384xf32>,
    %c0_114 = arith.constant 0 : index
    %c4_115 = arith.constant 4 : index
    %90 = vector.load %arg4[%c0_114, %c4_115] : memref<4x504xf32, #tpu.memory_space<vmem>>, vector<1x384xf32>
    %c4_116 = arith.constant 4 : index
    %c0_117 = arith.constant 0 : index
    %91 = vector.load %arg5[%c4_116, %c0_117] : memref<128x384xf32, #tpu.memory_space<vmem>>, vector<1x384xf32>
    tpu.vector_store %arg5[%c4_116, %c0_117], %90 {strides = array<i32>} : memref<128x384xf32, #tpu.memory_space<vmem>>, vector<1x384xf32>,
    %c0_118 = arith.constant 0 : index
    %c24 = arith.constant 24 : index
    %92 = vector.load %arg4[%c0_118, %c24] : memref<4x504xf32, #tpu.memory_space<vmem>>, vector<1x384xf32>
    %c5_119 = arith.constant 5 : index
    %c0_120 = arith.constant 0 : index
    %93 = vector.load %arg5[%c5_119, %c0_120] : memref<128x384xf32, #tpu.memory_space<vmem>>, vector<1x384xf32>
    tpu.vector_store %arg5[%c5_119, %c0_120], %92 {strides = array<i32>} : memref<128x384xf32, #tpu.memory_space<vmem>>, vector<1x384xf32>,
    %c0_121 = arith.constant 0 : index
    %c25 = arith.constant 25 : index
    %94 = vector.load %arg4[%c0_121, %c25] : memref<4x504xf32, #tpu.memory_space<vmem>>, vector<1x384xf32>
    %c6_122 = arith.constant 6 : index
    %c0_123 = arith.constant 0 : index
    %95 = vector.load %arg5[%c6_122, %c0_123] : memref<128x384xf32, #tpu.memory_space<vmem>>, vector<1x384xf32>
    tpu.vector_store %arg5[%c6_122, %c0_123], %94 {strides = array<i32>} : memref<128x384xf32, #tpu.memory_space<vmem>>, vector<1x384xf32>,
    %c0_124 = arith.constant 0 : index
    %c26 = arith.constant 26 : index
    %96 = vector.load %arg4[%c0_124, %c26] : memref<4x504xf32, #tpu.memory_space<vmem>>, vector<1x384xf32>
    %c7_125 = arith.constant 7 : index
    %c0_126 = arith.constant 0 : index
    %97 = vector.load %arg5[%c7_125, %c0_126] : memref<128x384xf32, #tpu.memory_space<vmem>>, vector<1x384xf32>
    tpu.vector_store %arg5[%c7_125, %c0_126], %96 {strides = array<i32>} : memref<128x384xf32, #tpu.memory_space<vmem>>, vector<1x384xf32>,
    %c0_127 = arith.constant 0 : index
    %c27 = arith.constant 27 : index
    %98 = vector.load %arg4[%c0_127, %c27] : memref<4x504xf32, #tpu.memory_space<vmem>>, vector<1x384xf32>
    %c8_128 = arith.constant 8 : index
    %c0_129 = arith.constant 0 : index
    %99 = vector.load %arg5[%c8_128, %c0_129] : memref<128x384xf32, #tpu.memory_space<vmem>>, vector<1x384xf32>
    tpu.vector_store %arg5[%c8_128, %c0_129], %98 {strides = array<i32>} : memref<128x384xf32, #tpu.memory_space<vmem>>, vector<1x384xf32>,
    %c0_130 = arith.constant 0 : index
    %c28 = arith.constant 28 : index
    %100 = vector.load %arg4[%c0_130, %c28] : memref<4x504xf32, #tpu.memory_space<vmem>>, vector<1x384xf32>
    %c9_131 = arith.constant 9 : index
    %c0_132 = arith.constant 0 : index
    %101 = vector.load %arg5[%c9_131, %c0_132] : memref<128x384xf32, #tpu.memory_space<vmem>>, vector<1x384xf32>
    tpu.vector_store %arg5[%c9_131, %c0_132], %100 {strides = array<i32>} : memref<128x384xf32, #tpu.memory_space<vmem>>, vector<1x384xf32>,
    %c0_133 = arith.constant 0 : index
    %c48 = arith.constant 48 : index
    %102 = vector.load %arg4[%c0_133, %c48] : memref<4x504xf32, #tpu.memory_space<vmem>>, vector<1x384xf32>
    %c10_134 = arith.constant 10 : index
    %c0_135 = arith.constant 0 : index
    %103 = vector.load %arg5[%c10_134, %c0_135] : memref<128x384xf32, #tpu.memory_space<vmem>>, vector<1x384xf32>
    tpu.vector_store %arg5[%c10_134, %c0_135], %102 {strides = array<i32>} : memref<128x384xf32, #tpu.memory_space<vmem>>, vector<1x384xf32>,
    %c0_136 = arith.constant 0 : index
    %c49 = arith.constant 49 : index
    %104 = vector.load %arg4[%c0_136, %c49] : memref<4x504xf32, #tpu.memory_space<vmem>>, vector<1x384xf32>
    %c11_137 = arith.constant 11 : index
    %c0_138 = arith.constant 0 : index
    %105 = vector.load %arg5[%c11_137, %c0_138] : memref<128x384xf32, #tpu.memory_space<vmem>>, vector<1x384xf32>
    tpu.vector_store %arg5[%c11_137, %c0_138], %104 {strides = array<i32>} : memref<128x384xf32, #tpu.memory_space<vmem>>, vector<1x384xf32>,
    %c0_139 = arith.constant 0 : index
    %c50_140 = arith.constant 50 : index
    %106 = vector.load %arg4[%c0_139, %c50_140] : memref<4x504xf32, #tpu.memory_space<vmem>>, vector<1x384xf32>
    %c12_141 = arith.constant 12 : index
    %c0_142 = arith.constant 0 : index
    %107 = vector.load %arg5[%c12_141, %c0_142] : memref<128x384xf32, #tpu.memory_space<vmem>>, vector<1x384xf32>
    tpu.vector_store %arg5[%c12_141, %c0_142], %106 {strides = array<i32>} : memref<128x384xf32, #tpu.memory_space<vmem>>, vector<1x384xf32>,
    %c0_143 = arith.constant 0 : index
    %c51 = arith.constant 51 : index
    %108 = vector.load %arg4[%c0_143, %c51] : memref<4x504xf32, #tpu.memory_space<vmem>>, vector<1x384xf32>
    %c13_144 = arith.constant 13 : index
    %c0_145 = arith.constant 0 : index
    %109 = vector.load %arg5[%c13_144, %c0_145] : memref<128x384xf32, #tpu.memory_space<vmem>>, vector<1x384xf32>
    tpu.vector_store %arg5[%c13_144, %c0_145], %108 {strides = array<i32>} : memref<128x384xf32, #tpu.memory_space<vmem>>, vector<1x384xf32>,
    %c0_146 = arith.constant 0 : index
    %c52 = arith.constant 52 : index
    %110 = vector.load %arg4[%c0_146, %c52] : memref<4x504xf32, #tpu.memory_space<vmem>>, vector<1x384xf32>
    %c14_147 = arith.constant 14 : index
    %c0_148 = arith.constant 0 : index
    %111 = vector.load %arg5[%c14_147, %c0_148] : memref<128x384xf32, #tpu.memory_space<vmem>>, vector<1x384xf32>
    tpu.vector_store %arg5[%c14_147, %c0_148], %110 {strides = array<i32>} : memref<128x384xf32, #tpu.memory_space<vmem>>, vector<1x384xf32>,
    %c0_149 = arith.constant 0 : index
    %c72 = arith.constant 72 : index
    %112 = vector.load %arg4[%c0_149, %c72] : memref<4x504xf32, #tpu.memory_space<vmem>>, vector<1x384xf32>
    %c15_150 = arith.constant 15 : index
    %c0_151 = arith.constant 0 : index
    %113 = vector.load %arg5[%c15_150, %c0_151] : memref<128x384xf32, #tpu.memory_space<vmem>>, vector<1x384xf32>
    tpu.vector_store %arg5[%c15_150, %c0_151], %112 {strides = array<i32>} : memref<128x384xf32, #tpu.memory_space<vmem>>, vector<1x384xf32>,
    %c0_152 = arith.constant 0 : index
    %c73 = arith.constant 73 : index
    %114 = vector.load %arg4[%c0_152, %c73] : memref<4x504xf32, #tpu.memory_space<vmem>>, vector<1x384xf32>
    %c16 = arith.constant 16 : index
    %c0_153 = arith.constant 0 : index
    %115 = vector.load %arg5[%c16, %c0_153] : memref<128x384xf32, #tpu.memory_space<vmem>>, vector<1x384xf32>
    tpu.vector_store %arg5[%c16, %c0_153], %114 {strides = array<i32>} : memref<128x384xf32, #tpu.memory_space<vmem>>, vector<1x384xf32>,
    %c0_154 = arith.constant 0 : index
    %c74_155 = arith.constant 74 : index
    %116 = vector.load %arg4[%c0_154, %c74_155] : memref<4x504xf32, #tpu.memory_space<vmem>>, vector<1x384xf32>
    %c17 = arith.constant 17 : index
    %c0_156 = arith.constant 0 : index
    %117 = vector.load %arg5[%c17, %c0_156] : memref<128x384xf32, #tpu.memory_space<vmem>>, vector<1x384xf32>
    tpu.vector_store %arg5[%c17, %c0_156], %116 {strides = array<i32>} : memref<128x384xf32, #tpu.memory_space<vmem>>, vector<1x384xf32>,
    %c0_157 = arith.constant 0 : index
    %c75 = arith.constant 75 : index
    %118 = vector.load %arg4[%c0_157, %c75] : memref<4x504xf32, #tpu.memory_space<vmem>>, vector<1x384xf32>
    %c18 = arith.constant 18 : index
    %c0_158 = arith.constant 0 : index
    %119 = vector.load %arg5[%c18, %c0_158] : memref<128x384xf32, #tpu.memory_space<vmem>>, vector<1x384xf32>
    tpu.vector_store %arg5[%c18, %c0_158], %118 {strides = array<i32>} : memref<128x384xf32, #tpu.memory_space<vmem>>, vector<1x384xf32>,
    %c0_159 = arith.constant 0 : index
    %c76 = arith.constant 76 : index
    %120 = vector.load %arg4[%c0_159, %c76] : memref<4x504xf32, #tpu.memory_space<vmem>>, vector<1x384xf32>
    %c19 = arith.constant 19 : index
    %c0_160 = arith.constant 0 : index
    %121 = vector.load %arg5[%c19, %c0_160] : memref<128x384xf32, #tpu.memory_space<vmem>>, vector<1x384xf32>
    tpu.vector_store %arg5[%c19, %c0_160], %120 {strides = array<i32>} : memref<128x384xf32, #tpu.memory_space<vmem>>, vector<1x384xf32>,
    %c0_161 = arith.constant 0 : index
    %c96 = arith.constant 96 : index
    %122 = vector.load %arg4[%c0_161, %c96] : memref<4x504xf32, #tpu.memory_space<vmem>>, vector<1x384xf32>
    %c20 = arith.constant 20 : index
    %c0_162 = arith.constant 0 : index
    %123 = vector.load %arg5[%c20, %c0_162] : memref<128x384xf32, #tpu.memory_space<vmem>>, vector<1x384xf32>
    tpu.vector_store %arg5[%c20, %c0_162], %122 {strides = array<i32>} : memref<128x384xf32, #tpu.memory_space<vmem>>, vector<1x384xf32>,
    %c0_163 = arith.constant 0 : index
    %c97 = arith.constant 97 : index
    %124 = vector.load %arg4[%c0_163, %c97] : memref<4x504xf32, #tpu.memory_space<vmem>>, vector<1x384xf32>
    %c21 = arith.constant 21 : index
    %c0_164 = arith.constant 0 : index
    %125 = vector.load %arg5[%c21, %c0_164] : memref<128x384xf32, #tpu.memory_space<vmem>>, vector<1x384xf32>
    tpu.vector_store %arg5[%c21, %c0_164], %124 {strides = array<i32>} : memref<128x384xf32, #tpu.memory_space<vmem>>, vector<1x384xf32>,
    %c0_165 = arith.constant 0 : index
    %c98_166 = arith.constant 98 : index
    %126 = vector.load %arg4[%c0_165, %c98_166] : memref<4x504xf32, #tpu.memory_space<vmem>>, vector<1x384xf32>
    %c22 = arith.constant 22 : index
    %c0_167 = arith.constant 0 : index
    %127 = vector.load %arg5[%c22, %c0_167] : memref<128x384xf32, #tpu.memory_space<vmem>>, vector<1x384xf32>
    tpu.vector_store %arg5[%c22, %c0_167], %126 {strides = array<i32>} : memref<128x384xf32, #tpu.memory_space<vmem>>, vector<1x384xf32>,
    %c0_168 = arith.constant 0 : index
    %c99 = arith.constant 99 : index
    %128 = vector.load %arg4[%c0_168, %c99] : memref<4x504xf32, #tpu.memory_space<vmem>>, vector<1x384xf32>
    %c23 = arith.constant 23 : index
    %c0_169 = arith.constant 0 : index
    %129 = vector.load %arg5[%c23, %c0_169] : memref<128x384xf32, #tpu.memory_space<vmem>>, vector<1x384xf32>
    tpu.vector_store %arg5[%c23, %c0_169], %128 {strides = array<i32>} : memref<128x384xf32, #tpu.memory_space<vmem>>, vector<1x384xf32>,
    %c0_170 = arith.constant 0 : index
    %c100 = arith.constant 100 : index
    %130 = vector.load %arg4[%c0_170, %c100] : memref<4x504xf32, #tpu.memory_space<vmem>>, vector<1x384xf32>
    %c24_171 = arith.constant 24 : index
    %c0_172 = arith.constant 0 : index
    %131 = vector.load %arg5[%c24_171, %c0_172] : memref<128x384xf32, #tpu.memory_space<vmem>>, vector<1x384xf32>
    tpu.vector_store %arg5[%c24_171, %c0_172], %130 {strides = array<i32>} : memref<128x384xf32, #tpu.memory_space<vmem>>, vector<1x384xf32>,
    %c1_173 = arith.constant 1 : index
    %c0_174 = arith.constant 0 : index
    %132 = vector.load %arg4[%c1_173, %c0_174] : memref<4x504xf32, #tpu.memory_space<vmem>>, vector<1x384xf32>
    %c25_175 = arith.constant 25 : index
    %c0_176 = arith.constant 0 : index
    %133 = vector.load %arg5[%c25_175, %c0_176] : memref<128x384xf32, #tpu.memory_space<vmem>>, vector<1x384xf32>
    tpu.vector_store %arg5[%c25_175, %c0_176], %132 {strides = array<i32>} : memref<128x384xf32, #tpu.memory_space<vmem>>, vector<1x384xf32>,
    %c1_177 = arith.constant 1 : index
    %c1_178 = arith.constant 1 : index
    %134 = vector.load %arg4[%c1_177, %c1_178] : memref<4x504xf32, #tpu.memory_space<vmem>>, vector<1x384xf32>
    %c26_179 = arith.constant 26 : index
    %c0_180 = arith.constant 0 : index
    %135 = vector.load %arg5[%c26_179, %c0_180] : memref<128x384xf32, #tpu.memory_space<vmem>>, vector<1x384xf32>
    tpu.vector_store %arg5[%c26_179, %c0_180], %134 {strides = array<i32>} : memref<128x384xf32, #tpu.memory_space<vmem>>, vector<1x384xf32>,
    %c1_181 = arith.constant 1 : index
    %c2_182 = arith.constant 2 : index
    %136 = vector.load %arg4[%c1_181, %c2_182] : memref<4x504xf32, #tpu.memory_space<vmem>>, vector<1x384xf32>
    %c27_183 = arith.constant 27 : index
    %c0_184 = arith.constant 0 : index
    %137 = vector.load %arg5[%c27_183, %c0_184] : memref<128x384xf32, #tpu.memory_space<vmem>>, vector<1x384xf32>
    tpu.vector_store %arg5[%c27_183, %c0_184], %136 {strides = array<i32>} : memref<128x384xf32, #tpu.memory_space<vmem>>, vector<1x384xf32>,
    %c1_185 = arith.constant 1 : index
    %c3_186 = arith.constant 3 : index
    %138 = vector.load %arg4[%c1_185, %c3_186] : memref<4x504xf32, #tpu.memory_space<vmem>>, vector<1x384xf32>
    %c28_187 = arith.constant 28 : index
    %c0_188 = arith.constant 0 : index
    %139 = vector.load %arg5[%c28_187, %c0_188] : memref<128x384xf32, #tpu.memory_space<vmem>>, vector<1x384xf32>
    tpu.vector_store %arg5[%c28_187, %c0_188], %138 {strides = array<i32>} : memref<128x384xf32, #tpu.memory_space<vmem>>, vector<1x384xf32>,
    %c1_189 = arith.constant 1 : index
    %c4_190 = arith.constant 4 : index
    %140 = vector.load %arg4[%c1_189, %c4_190] : memref<4x504xf32, #tpu.memory_space<vmem>>, vector<1x384xf32>
    %c29 = arith.constant 29 : index
    %c0_191 = arith.constant 0 : index
    %141 = vector.load %arg5[%c29, %c0_191] : memref<128x384xf32, #tpu.memory_space<vmem>>, vector<1x384xf32>
    tpu.vector_store %arg5[%c29, %c0_191], %140 {strides = array<i32>} : memref<128x384xf32, #tpu.memory_space<vmem>>, vector<1x384xf32>,
    %c1_192 = arith.constant 1 : index
    %c24_193 = arith.constant 24 : index
    %142 = vector.load %arg4[%c1_192, %c24_193] : memref<4x504xf32, #tpu.memory_space<vmem>>, vector<1x384xf32>
    %c30 = arith.constant 30 : index
    %c0_194 = arith.constant 0 : index
    %143 = vector.load %arg5[%c30, %c0_194] : memref<128x384xf32, #tpu.memory_space<vmem>>, vector<1x384xf32>
    tpu.vector_store %arg5[%c30, %c0_194], %142 {strides = array<i32>} : memref<128x384xf32, #tpu.memory_space<vmem>>, vector<1x384xf32>,
    %c1_195 = arith.constant 1 : index
    %c25_196 = arith.constant 25 : index
    %144 = vector.load %arg4[%c1_195, %c25_196] : memref<4x504xf32, #tpu.memory_space<vmem>>, vector<1x384xf32>
    %c31 = arith.constant 31 : index
    %c0_197 = arith.constant 0 : index
    %145 = vector.load %arg5[%c31, %c0_197] : memref<128x384xf32, #tpu.memory_space<vmem>>, vector<1x384xf32>
    tpu.vector_store %arg5[%c31, %c0_197], %144 {strides = array<i32>} : memref<128x384xf32, #tpu.memory_space<vmem>>, vector<1x384xf32>,
    %c1_198 = arith.constant 1 : index
    %c26_199 = arith.constant 26 : index
    %146 = vector.load %arg4[%c1_198, %c26_199] : memref<4x504xf32, #tpu.memory_space<vmem>>, vector<1x384xf32>
    %c32 = arith.constant 32 : index
    %c0_200 = arith.constant 0 : index
    %147 = vector.load %arg5[%c32, %c0_200] : memref<128x384xf32, #tpu.memory_space<vmem>>, vector<1x384xf32>
    tpu.vector_store %arg5[%c32, %c0_200], %146 {strides = array<i32>} : memref<128x384xf32, #tpu.memory_space<vmem>>, vector<1x384xf32>,
    %c1_201 = arith.constant 1 : index
    %c27_202 = arith.constant 27 : index
    %148 = vector.load %arg4[%c1_201, %c27_202] : memref<4x504xf32, #tpu.memory_space<vmem>>, vector<1x384xf32>
    %c33 = arith.constant 33 : index
    %c0_203 = arith.constant 0 : index
    %149 = vector.load %arg5[%c33, %c0_203] : memref<128x384xf32, #tpu.memory_space<vmem>>, vector<1x384xf32>
    tpu.vector_store %arg5[%c33, %c0_203], %148 {strides = array<i32>} : memref<128x384xf32, #tpu.memory_space<vmem>>, vector<1x384xf32>,
    %c1_204 = arith.constant 1 : index
    %c28_205 = arith.constant 28 : index
    %150 = vector.load %arg4[%c1_204, %c28_205] : memref<4x504xf32, #tpu.memory_space<vmem>>, vector<1x384xf32>
    %c34 = arith.constant 34 : index
    %c0_206 = arith.constant 0 : index
    %151 = vector.load %arg5[%c34, %c0_206] : memref<128x384xf32, #tpu.memory_space<vmem>>, vector<1x384xf32>
    tpu.vector_store %arg5[%c34, %c0_206], %150 {strides = array<i32>} : memref<128x384xf32, #tpu.memory_space<vmem>>, vector<1x384xf32>,
    %c1_207 = arith.constant 1 : index
    %c48_208 = arith.constant 48 : index
    %152 = vector.load %arg4[%c1_207, %c48_208] : memref<4x504xf32, #tpu.memory_space<vmem>>, vector<1x384xf32>
    %c35 = arith.constant 35 : index
    %c0_209 = arith.constant 0 : index
    %153 = vector.load %arg5[%c35, %c0_209] : memref<128x384xf32, #tpu.memory_space<vmem>>, vector<1x384xf32>
    tpu.vector_store %arg5[%c35, %c0_209], %152 {strides = array<i32>} : memref<128x384xf32, #tpu.memory_space<vmem>>, vector<1x384xf32>,
    %c1_210 = arith.constant 1 : index
    %c49_211 = arith.constant 49 : index
    %154 = vector.load %arg4[%c1_210, %c49_211] : memref<4x504xf32, #tpu.memory_space<vmem>>, vector<1x384xf32>
    %c36 = arith.constant 36 : index
    %c0_212 = arith.constant 0 : index
    %155 = vector.load %arg5[%c36, %c0_212] : memref<128x384xf32, #tpu.memory_space<vmem>>, vector<1x384xf32>
    tpu.vector_store %arg5[%c36, %c0_212], %154 {strides = array<i32>} : memref<128x384xf32, #tpu.memory_space<vmem>>, vector<1x384xf32>,
    %c1_213 = arith.constant 1 : index
    %c50_214 = arith.constant 50 : index
    %156 = vector.load %arg4[%c1_213, %c50_214] : memref<4x504xf32, #tpu.memory_space<vmem>>, vector<1x384xf32>
    %c37 = arith.constant 37 : index
    %c0_215 = arith.constant 0 : index
    %157 = vector.load %arg5[%c37, %c0_215] : memref<128x384xf32, #tpu.memory_space<vmem>>, vector<1x384xf32>
    tpu.vector_store %arg5[%c37, %c0_215], %156 {strides = array<i32>} : memref<128x384xf32, #tpu.memory_space<vmem>>, vector<1x384xf32>,
    %c1_216 = arith.constant 1 : index
    %c51_217 = arith.constant 51 : index
    %158 = vector.load %arg4[%c1_216, %c51_217] : memref<4x504xf32, #tpu.memory_space<vmem>>, vector<1x384xf32>
    %c38 = arith.constant 38 : index
    %c0_218 = arith.constant 0 : index
    %159 = vector.load %arg5[%c38, %c0_218] : memref<128x384xf32, #tpu.memory_space<vmem>>, vector<1x384xf32>
    tpu.vector_store %arg5[%c38, %c0_218], %158 {strides = array<i32>} : memref<128x384xf32, #tpu.memory_space<vmem>>, vector<1x384xf32>,
    %c1_219 = arith.constant 1 : index
    %c52_220 = arith.constant 52 : index
    %160 = vector.load %arg4[%c1_219, %c52_220] : memref<4x504xf32, #tpu.memory_space<vmem>>, vector<1x384xf32>
    %c39 = arith.constant 39 : index
    %c0_221 = arith.constant 0 : index
    %161 = vector.load %arg5[%c39, %c0_221] : memref<128x384xf32, #tpu.memory_space<vmem>>, vector<1x384xf32>
    tpu.vector_store %arg5[%c39, %c0_221], %160 {strides = array<i32>} : memref<128x384xf32, #tpu.memory_space<vmem>>, vector<1x384xf32>,
    %c1_222 = arith.constant 1 : index
    %c72_223 = arith.constant 72 : index
    %162 = vector.load %arg4[%c1_222, %c72_223] : memref<4x504xf32, #tpu.memory_space<vmem>>, vector<1x384xf32>
    %c40 = arith.constant 40 : index
    %c0_224 = arith.constant 0 : index
    %163 = vector.load %arg5[%c40, %c0_224] : memref<128x384xf32, #tpu.memory_space<vmem>>, vector<1x384xf32>
    tpu.vector_store %arg5[%c40, %c0_224], %162 {strides = array<i32>} : memref<128x384xf32, #tpu.memory_space<vmem>>, vector<1x384xf32>,
    %c1_225 = arith.constant 1 : index
    %c73_226 = arith.constant 73 : index
    %164 = vector.load %arg4[%c1_225, %c73_226] : memref<4x504xf32, #tpu.memory_space<vmem>>, vector<1x384xf32>
    %c41 = arith.constant 41 : index
    %c0_227 = arith.constant 0 : index
    %165 = vector.load %arg5[%c41, %c0_227] : memref<128x384xf32, #tpu.memory_space<vmem>>, vector<1x384xf32>
    tpu.vector_store %arg5[%c41, %c0_227], %164 {strides = array<i32>} : memref<128x384xf32, #tpu.memory_space<vmem>>, vector<1x384xf32>,
    %c1_228 = arith.constant 1 : index
    %c74_229 = arith.constant 74 : index
    %166 = vector.load %arg4[%c1_228, %c74_229] : memref<4x504xf32, #tpu.memory_space<vmem>>, vector<1x384xf32>
    %c42 = arith.constant 42 : index
    %c0_230 = arith.constant 0 : index
    %167 = vector.load %arg5[%c42, %c0_230] : memref<128x384xf32, #tpu.memory_space<vmem>>, vector<1x384xf32>
    tpu.vector_store %arg5[%c42, %c0_230], %166 {strides = array<i32>} : memref<128x384xf32, #tpu.memory_space<vmem>>, vector<1x384xf32>,
    %c1_231 = arith.constant 1 : index
    %c75_232 = arith.constant 75 : index
    %168 = vector.load %arg4[%c1_231, %c75_232] : memref<4x504xf32, #tpu.memory_space<vmem>>, vector<1x384xf32>
    %c43 = arith.constant 43 : index
    %c0_233 = arith.constant 0 : index
    %169 = vector.load %arg5[%c43, %c0_233] : memref<128x384xf32, #tpu.memory_space<vmem>>, vector<1x384xf32>
    tpu.vector_store %arg5[%c43, %c0_233], %168 {strides = array<i32>} : memref<128x384xf32, #tpu.memory_space<vmem>>, vector<1x384xf32>,
    %c1_234 = arith.constant 1 : index
    %c76_235 = arith.constant 76 : index
    %170 = vector.load %arg4[%c1_234, %c76_235] : memref<4x504xf32, #tpu.memory_space<vmem>>, vector<1x384xf32>
    %c44 = arith.constant 44 : index
    %c0_236 = arith.constant 0 : index
    %171 = vector.load %arg5[%c44, %c0_236] : memref<128x384xf32, #tpu.memory_space<vmem>>, vector<1x384xf32>
    tpu.vector_store %arg5[%c44, %c0_236], %170 {strides = array<i32>} : memref<128x384xf32, #tpu.memory_space<vmem>>, vector<1x384xf32>,
    %c1_237 = arith.constant 1 : index
    %c96_238 = arith.constant 96 : index
    %172 = vector.load %arg4[%c1_237, %c96_238] : memref<4x504xf32, #tpu.memory_space<vmem>>, vector<1x384xf32>
    %c45 = arith.constant 45 : index
    %c0_239 = arith.constant 0 : index
    %173 = vector.load %arg5[%c45, %c0_239] : memref<128x384xf32, #tpu.memory_space<vmem>>, vector<1x384xf32>
    tpu.vector_store %arg5[%c45, %c0_239], %172 {strides = array<i32>} : memref<128x384xf32, #tpu.memory_space<vmem>>, vector<1x384xf32>,
    %c1_240 = arith.constant 1 : index
    %c97_241 = arith.constant 97 : index
    %174 = vector.load %arg4[%c1_240, %c97_241] : memref<4x504xf32, #tpu.memory_space<vmem>>, vector<1x384xf32>
    %c46 = arith.constant 46 : index
    %c0_242 = arith.constant 0 : index
    %175 = vector.load %arg5[%c46, %c0_242] : memref<128x384xf32, #tpu.memory_space<vmem>>, vector<1x384xf32>
    tpu.vector_store %arg5[%c46, %c0_242], %174 {strides = array<i32>} : memref<128x384xf32, #tpu.memory_space<vmem>>, vector<1x384xf32>,
    %c1_243 = arith.constant 1 : index
    %c98_244 = arith.constant 98 : index
    %176 = vector.load %arg4[%c1_243, %c98_244] : memref<4x504xf32, #tpu.memory_space<vmem>>, vector<1x384xf32>
    %c47 = arith.constant 47 : index
    %c0_245 = arith.constant 0 : index
    %177 = vector.load %arg5[%c47, %c0_245] : memref<128x384xf32, #tpu.memory_space<vmem>>, vector<1x384xf32>
    tpu.vector_store %arg5[%c47, %c0_245], %176 {strides = array<i32>} : memref<128x384xf32, #tpu.memory_space<vmem>>, vector<1x384xf32>,
    %c1_246 = arith.constant 1 : index
    %c99_247 = arith.constant 99 : index
    %178 = vector.load %arg4[%c1_246, %c99_247] : memref<4x504xf32, #tpu.memory_space<vmem>>, vector<1x384xf32>
    %c48_248 = arith.constant 48 : index
    %c0_249 = arith.constant 0 : index
    %179 = vector.load %arg5[%c48_248, %c0_249] : memref<128x384xf32, #tpu.memory_space<vmem>>, vector<1x384xf32>
    tpu.vector_store %arg5[%c48_248, %c0_249], %178 {strides = array<i32>} : memref<128x384xf32, #tpu.memory_space<vmem>>, vector<1x384xf32>,
    %c1_250 = arith.constant 1 : index
    %c100_251 = arith.constant 100 : index
    %180 = vector.load %arg4[%c1_250, %c100_251] : memref<4x504xf32, #tpu.memory_space<vmem>>, vector<1x384xf32>
    %c49_252 = arith.constant 49 : index
    %c0_253 = arith.constant 0 : index
    %181 = vector.load %arg5[%c49_252, %c0_253] : memref<128x384xf32, #tpu.memory_space<vmem>>, vector<1x384xf32>
    tpu.vector_store %arg5[%c49_252, %c0_253], %180 {strides = array<i32>} : memref<128x384xf32, #tpu.memory_space<vmem>>, vector<1x384xf32>,
    %c2_254 = arith.constant 2 : index
    %c0_255 = arith.constant 0 : index
    %182 = vector.load %arg4[%c2_254, %c0_255] : memref<4x504xf32, #tpu.memory_space<vmem>>, vector<1x384xf32>
    %c50_256 = arith.constant 50 : index
    %c0_257 = arith.constant 0 : index
    %183 = vector.load %arg5[%c50_256, %c0_257] : memref<128x384xf32, #tpu.memory_space<vmem>>, vector<1x384xf32>
    tpu.vector_store %arg5[%c50_256, %c0_257], %182 {strides = array<i32>} : memref<128x384xf32, #tpu.memory_space<vmem>>, vector<1x384xf32>,
    %c2_258 = arith.constant 2 : index
    %c1_259 = arith.constant 1 : index
    %184 = vector.load %arg4[%c2_258, %c1_259] : memref<4x504xf32, #tpu.memory_space<vmem>>, vector<1x384xf32>
    %c51_260 = arith.constant 51 : index
    %c0_261 = arith.constant 0 : index
    %185 = vector.load %arg5[%c51_260, %c0_261] : memref<128x384xf32, #tpu.memory_space<vmem>>, vector<1x384xf32>
    tpu.vector_store %arg5[%c51_260, %c0_261], %184 {strides = array<i32>} : memref<128x384xf32, #tpu.memory_space<vmem>>, vector<1x384xf32>,
    %c2_262 = arith.constant 2 : index
    %c2_263 = arith.constant 2 : index
    %186 = vector.load %arg4[%c2_262, %c2_263] : memref<4x504xf32, #tpu.memory_space<vmem>>, vector<1x384xf32>
    %c52_264 = arith.constant 52 : index
    %c0_265 = arith.constant 0 : index
    %187 = vector.load %arg5[%c52_264, %c0_265] : memref<128x384xf32, #tpu.memory_space<vmem>>, vector<1x384xf32>
    tpu.vector_store %arg5[%c52_264, %c0_265], %186 {strides = array<i32>} : memref<128x384xf32, #tpu.memory_space<vmem>>, vector<1x384xf32>,
    %c2_266 = arith.constant 2 : index
    %c3_267 = arith.constant 3 : index
    %188 = vector.load %arg4[%c2_266, %c3_267] : memref<4x504xf32, #tpu.memory_space<vmem>>, vector<1x384xf32>
    %c53 = arith.constant 53 : index
    %c0_268 = arith.constant 0 : index
    %189 = vector.load %arg5[%c53, %c0_268] : memref<128x384xf32, #tpu.memory_space<vmem>>, vector<1x384xf32>
    tpu.vector_store %arg5[%c53, %c0_268], %188 {strides = array<i32>} : memref<128x384xf32, #tpu.memory_space<vmem>>, vector<1x384xf32>,
    %c2_269 = arith.constant 2 : index
    %c4_270 = arith.constant 4 : index
    %190 = vector.load %arg4[%c2_269, %c4_270] : memref<4x504xf32, #tpu.memory_space<vmem>>, vector<1x384xf32>
    %c54 = arith.constant 54 : index
    %c0_271 = arith.constant 0 : index
    %191 = vector.load %arg5[%c54, %c0_271] : memref<128x384xf32, #tpu.memory_space<vmem>>, vector<1x384xf32>
    tpu.vector_store %arg5[%c54, %c0_271], %190 {strides = array<i32>} : memref<128x384xf32, #tpu.memory_space<vmem>>, vector<1x384xf32>,
    %c2_272 = arith.constant 2 : index
    %c24_273 = arith.constant 24 : index
    %192 = vector.load %arg4[%c2_272, %c24_273] : memref<4x504xf32, #tpu.memory_space<vmem>>, vector<1x384xf32>
    %c55 = arith.constant 55 : index
    %c0_274 = arith.constant 0 : index
    %193 = vector.load %arg5[%c55, %c0_274] : memref<128x384xf32, #tpu.memory_space<vmem>>, vector<1x384xf32>
    tpu.vector_store %arg5[%c55, %c0_274], %192 {strides = array<i32>} : memref<128x384xf32, #tpu.memory_space<vmem>>, vector<1x384xf32>,
    %c2_275 = arith.constant 2 : index
    %c25_276 = arith.constant 25 : index
    %194 = vector.load %arg4[%c2_275, %c25_276] : memref<4x504xf32, #tpu.memory_space<vmem>>, vector<1x384xf32>
    %c56 = arith.constant 56 : index
    %c0_277 = arith.constant 0 : index
    %195 = vector.load %arg5[%c56, %c0_277] : memref<128x384xf32, #tpu.memory_space<vmem>>, vector<1x384xf32>
    tpu.vector_store %arg5[%c56, %c0_277], %194 {strides = array<i32>} : memref<128x384xf32, #tpu.memory_space<vmem>>, vector<1x384xf32>,
    %c2_278 = arith.constant 2 : index
    %c26_279 = arith.constant 26 : index
    %196 = vector.load %arg4[%c2_278, %c26_279] : memref<4x504xf32, #tpu.memory_space<vmem>>, vector<1x384xf32>
    %c57 = arith.constant 57 : index
    %c0_280 = arith.constant 0 : index
    %197 = vector.load %arg5[%c57, %c0_280] : memref<128x384xf32, #tpu.memory_space<vmem>>, vector<1x384xf32>
    tpu.vector_store %arg5[%c57, %c0_280], %196 {strides = array<i32>} : memref<128x384xf32, #tpu.memory_space<vmem>>, vector<1x384xf32>,
    %c2_281 = arith.constant 2 : index
    %c27_282 = arith.constant 27 : index
    %198 = vector.load %arg4[%c2_281, %c27_282] : memref<4x504xf32, #tpu.memory_space<vmem>>, vector<1x384xf32>
    %c58 = arith.constant 58 : index
    %c0_283 = arith.constant 0 : index
    %199 = vector.load %arg5[%c58, %c0_283] : memref<128x384xf32, #tpu.memory_space<vmem>>, vector<1x384xf32>
    tpu.vector_store %arg5[%c58, %c0_283], %198 {strides = array<i32>} : memref<128x384xf32, #tpu.memory_space<vmem>>, vector<1x384xf32>,
    %c2_284 = arith.constant 2 : index
    %c28_285 = arith.constant 28 : index
    %200 = vector.load %arg4[%c2_284, %c28_285] : memref<4x504xf32, #tpu.memory_space<vmem>>, vector<1x384xf32>
    %c59 = arith.constant 59 : index
    %c0_286 = arith.constant 0 : index
    %201 = vector.load %arg5[%c59, %c0_286] : memref<128x384xf32, #tpu.memory_space<vmem>>, vector<1x384xf32>
    tpu.vector_store %arg5[%c59, %c0_286], %200 {strides = array<i32>} : memref<128x384xf32, #tpu.memory_space<vmem>>, vector<1x384xf32>,
    %c2_287 = arith.constant 2 : index
    %c48_288 = arith.constant 48 : index
    %202 = vector.load %arg4[%c2_287, %c48_288] : memref<4x504xf32, #tpu.memory_space<vmem>>, vector<1x384xf32>
    %c60 = arith.constant 60 : index
    %c0_289 = arith.constant 0 : index
    %203 = vector.load %arg5[%c60, %c0_289] : memref<128x384xf32, #tpu.memory_space<vmem>>, vector<1x384xf32>
    tpu.vector_store %arg5[%c60, %c0_289], %202 {strides = array<i32>} : memref<128x384xf32, #tpu.memory_space<vmem>>, vector<1x384xf32>,
    %c2_290 = arith.constant 2 : index
    %c49_291 = arith.constant 49 : index
    %204 = vector.load %arg4[%c2_290, %c49_291] : memref<4x504xf32, #tpu.memory_space<vmem>>, vector<1x384xf32>
    %c61 = arith.constant 61 : index
    %c0_292 = arith.constant 0 : index
    %205 = vector.load %arg5[%c61, %c0_292] : memref<128x384xf32, #tpu.memory_space<vmem>>, vector<1x384xf32>
    tpu.vector_store %arg5[%c61, %c0_292], %204 {strides = array<i32>} : memref<128x384xf32, #tpu.memory_space<vmem>>, vector<1x384xf32>,
    %c2_293 = arith.constant 2 : index
    %c50_294 = arith.constant 50 : index
    %206 = vector.load %arg4[%c2_293, %c50_294] : memref<4x504xf32, #tpu.memory_space<vmem>>, vector<1x384xf32>
    %c62 = arith.constant 62 : index
    %c0_295 = arith.constant 0 : index
    %207 = vector.load %arg5[%c62, %c0_295] : memref<128x384xf32, #tpu.memory_space<vmem>>, vector<1x384xf32>
    tpu.vector_store %arg5[%c62, %c0_295], %206 {strides = array<i32>} : memref<128x384xf32, #tpu.memory_space<vmem>>, vector<1x384xf32>,
    %c2_296 = arith.constant 2 : index
    %c51_297 = arith.constant 51 : index
    %208 = vector.load %arg4[%c2_296, %c51_297] : memref<4x504xf32, #tpu.memory_space<vmem>>, vector<1x384xf32>
    %c63 = arith.constant 63 : index
    %c0_298 = arith.constant 0 : index
    %209 = vector.load %arg5[%c63, %c0_298] : memref<128x384xf32, #tpu.memory_space<vmem>>, vector<1x384xf32>
    tpu.vector_store %arg5[%c63, %c0_298], %208 {strides = array<i32>} : memref<128x384xf32, #tpu.memory_space<vmem>>, vector<1x384xf32>,
    %c2_299 = arith.constant 2 : index
    %c52_300 = arith.constant 52 : index
    %210 = vector.load %arg4[%c2_299, %c52_300] : memref<4x504xf32, #tpu.memory_space<vmem>>, vector<1x384xf32>
    %c64 = arith.constant 64 : index
    %c0_301 = arith.constant 0 : index
    %211 = vector.load %arg5[%c64, %c0_301] : memref<128x384xf32, #tpu.memory_space<vmem>>, vector<1x384xf32>
    tpu.vector_store %arg5[%c64, %c0_301], %210 {strides = array<i32>} : memref<128x384xf32, #tpu.memory_space<vmem>>, vector<1x384xf32>,
    %c2_302 = arith.constant 2 : index
    %c72_303 = arith.constant 72 : index
    %212 = vector.load %arg4[%c2_302, %c72_303] : memref<4x504xf32, #tpu.memory_space<vmem>>, vector<1x384xf32>
    %c65 = arith.constant 65 : index
    %c0_304 = arith.constant 0 : index
    %213 = vector.load %arg5[%c65, %c0_304] : memref<128x384xf32, #tpu.memory_space<vmem>>, vector<1x384xf32>
    tpu.vector_store %arg5[%c65, %c0_304], %212 {strides = array<i32>} : memref<128x384xf32, #tpu.memory_space<vmem>>, vector<1x384xf32>,
    %c2_305 = arith.constant 2 : index
    %c73_306 = arith.constant 73 : index
    %214 = vector.load %arg4[%c2_305, %c73_306] : memref<4x504xf32, #tpu.memory_space<vmem>>, vector<1x384xf32>
    %c66_307 = arith.constant 66 : index
    %c0_308 = arith.constant 0 : index
    %215 = vector.load %arg5[%c66_307, %c0_308] : memref<128x384xf32, #tpu.memory_space<vmem>>, vector<1x384xf32>
    tpu.vector_store %arg5[%c66_307, %c0_308], %214 {strides = array<i32>} : memref<128x384xf32, #tpu.memory_space<vmem>>, vector<1x384xf32>,
    %c2_309 = arith.constant 2 : index
    %c74_310 = arith.constant 74 : index
    %216 = vector.load %arg4[%c2_309, %c74_310] : memref<4x504xf32, #tpu.memory_space<vmem>>, vector<1x384xf32>
    %c67 = arith.constant 67 : index
    %c0_311 = arith.constant 0 : index
    %217 = vector.load %arg5[%c67, %c0_311] : memref<128x384xf32, #tpu.memory_space<vmem>>, vector<1x384xf32>
    tpu.vector_store %arg5[%c67, %c0_311], %216 {strides = array<i32>} : memref<128x384xf32, #tpu.memory_space<vmem>>, vector<1x384xf32>,
    %c2_312 = arith.constant 2 : index
    %c75_313 = arith.constant 75 : index
    %218 = vector.load %arg4[%c2_312, %c75_313] : memref<4x504xf32, #tpu.memory_space<vmem>>, vector<1x384xf32>
    %c68 = arith.constant 68 : index
    %c0_314 = arith.constant 0 : index
    %219 = vector.load %arg5[%c68, %c0_314] : memref<128x384xf32, #tpu.memory_space<vmem>>, vector<1x384xf32>
    tpu.vector_store %arg5[%c68, %c0_314], %218 {strides = array<i32>} : memref<128x384xf32, #tpu.memory_space<vmem>>, vector<1x384xf32>,
    %c2_315 = arith.constant 2 : index
    %c76_316 = arith.constant 76 : index
    %220 = vector.load %arg4[%c2_315, %c76_316] : memref<4x504xf32, #tpu.memory_space<vmem>>, vector<1x384xf32>
    %c69 = arith.constant 69 : index
    %c0_317 = arith.constant 0 : index
    %221 = vector.load %arg5[%c69, %c0_317] : memref<128x384xf32, #tpu.memory_space<vmem>>, vector<1x384xf32>
    tpu.vector_store %arg5[%c69, %c0_317], %220 {strides = array<i32>} : memref<128x384xf32, #tpu.memory_space<vmem>>, vector<1x384xf32>,
    %c2_318 = arith.constant 2 : index
    %c96_319 = arith.constant 96 : index
    %222 = vector.load %arg4[%c2_318, %c96_319] : memref<4x504xf32, #tpu.memory_space<vmem>>, vector<1x384xf32>
    %c70 = arith.constant 70 : index
    %c0_320 = arith.constant 0 : index
    %223 = vector.load %arg5[%c70, %c0_320] : memref<128x384xf32, #tpu.memory_space<vmem>>, vector<1x384xf32>
    tpu.vector_store %arg5[%c70, %c0_320], %222 {strides = array<i32>} : memref<128x384xf32, #tpu.memory_space<vmem>>, vector<1x384xf32>,
    %c2_321 = arith.constant 2 : index
    %c97_322 = arith.constant 97 : index
    %224 = vector.load %arg4[%c2_321, %c97_322] : memref<4x504xf32, #tpu.memory_space<vmem>>, vector<1x384xf32>
    %c71 = arith.constant 71 : index
    %c0_323 = arith.constant 0 : index
    %225 = vector.load %arg5[%c71, %c0_323] : memref<128x384xf32, #tpu.memory_space<vmem>>, vector<1x384xf32>
    tpu.vector_store %arg5[%c71, %c0_323], %224 {strides = array<i32>} : memref<128x384xf32, #tpu.memory_space<vmem>>, vector<1x384xf32>,
    %c2_324 = arith.constant 2 : index
    %c98_325 = arith.constant 98 : index
    %226 = vector.load %arg4[%c2_324, %c98_325] : memref<4x504xf32, #tpu.memory_space<vmem>>, vector<1x384xf32>
    %c72_326 = arith.constant 72 : index
    %c0_327 = arith.constant 0 : index
    %227 = vector.load %arg5[%c72_326, %c0_327] : memref<128x384xf32, #tpu.memory_space<vmem>>, vector<1x384xf32>
    tpu.vector_store %arg5[%c72_326, %c0_327], %226 {strides = array<i32>} : memref<128x384xf32, #tpu.memory_space<vmem>>, vector<1x384xf32>,
    %c2_328 = arith.constant 2 : index
    %c99_329 = arith.constant 99 : index
    %228 = vector.load %arg4[%c2_328, %c99_329] : memref<4x504xf32, #tpu.memory_space<vmem>>, vector<1x384xf32>
    %c73_330 = arith.constant 73 : index
    %c0_331 = arith.constant 0 : index
    %229 = vector.load %arg5[%c73_330, %c0_331] : memref<128x384xf32, #tpu.memory_space<vmem>>, vector<1x384xf32>
    tpu.vector_store %arg5[%c73_330, %c0_331], %228 {strides = array<i32>} : memref<128x384xf32, #tpu.memory_space<vmem>>, vector<1x384xf32>,
    %c2_332 = arith.constant 2 : index
    %c100_333 = arith.constant 100 : index
    %230 = vector.load %arg4[%c2_332, %c100_333] : memref<4x504xf32, #tpu.memory_space<vmem>>, vector<1x384xf32>
    %c74_334 = arith.constant 74 : index
    %c0_335 = arith.constant 0 : index
    %231 = vector.load %arg5[%c74_334, %c0_335] : memref<128x384xf32, #tpu.memory_space<vmem>>, vector<1x384xf32>
    tpu.vector_store %arg5[%c74_334, %c0_335], %230 {strides = array<i32>} : memref<128x384xf32, #tpu.memory_space<vmem>>, vector<1x384xf32>,
    %c3_336 = arith.constant 3 : index
    %c0_337 = arith.constant 0 : index
    %232 = vector.load %arg4[%c3_336, %c0_337] : memref<4x504xf32, #tpu.memory_space<vmem>>, vector<1x384xf32>
    %c75_338 = arith.constant 75 : index
    %c0_339 = arith.constant 0 : index
    %233 = vector.load %arg5[%c75_338, %c0_339] : memref<128x384xf32, #tpu.memory_space<vmem>>, vector<1x384xf32>
    tpu.vector_store %arg5[%c75_338, %c0_339], %232 {strides = array<i32>} : memref<128x384xf32, #tpu.memory_space<vmem>>, vector<1x384xf32>,
    %c3_340 = arith.constant 3 : index
    %c1_341 = arith.constant 1 : index
    %234 = vector.load %arg4[%c3_340, %c1_341] : memref<4x504xf32, #tpu.memory_space<vmem>>, vector<1x384xf32>
    %c76_342 = arith.constant 76 : index
    %c0_343 = arith.constant 0 : index
    %235 = vector.load %arg5[%c76_342, %c0_343] : memref<128x384xf32, #tpu.memory_space<vmem>>, vector<1x384xf32>
    tpu.vector_store %arg5[%c76_342, %c0_343], %234 {strides = array<i32>} : memref<128x384xf32, #tpu.memory_space<vmem>>, vector<1x384xf32>,
    %c3_344 = arith.constant 3 : index
    %c2_345 = arith.constant 2 : index
    %236 = vector.load %arg4[%c3_344, %c2_345] : memref<4x504xf32, #tpu.memory_space<vmem>>, vector<1x384xf32>
    %c77 = arith.constant 77 : index
    %c0_346 = arith.constant 0 : index
    %237 = vector.load %arg5[%c77, %c0_346] : memref<128x384xf32, #tpu.memory_space<vmem>>, vector<1x384xf32>
    tpu.vector_store %arg5[%c77, %c0_346], %236 {strides = array<i32>} : memref<128x384xf32, #tpu.memory_space<vmem>>, vector<1x384xf32>,
    %c3_347 = arith.constant 3 : index
    %c3_348 = arith.constant 3 : index
    %238 = vector.load %arg4[%c3_347, %c3_348] : memref<4x504xf32, #tpu.memory_space<vmem>>, vector<1x384xf32>
    %c78 = arith.constant 78 : index
    %c0_349 = arith.constant 0 : index
    %239 = vector.load %arg5[%c78, %c0_349] : memref<128x384xf32, #tpu.memory_space<vmem>>, vector<1x384xf32>
    tpu.vector_store %arg5[%c78, %c0_349], %238 {strides = array<i32>} : memref<128x384xf32, #tpu.memory_space<vmem>>, vector<1x384xf32>,
    %c3_350 = arith.constant 3 : index
    %c4_351 = arith.constant 4 : index
    %240 = vector.load %arg4[%c3_350, %c4_351] : memref<4x504xf32, #tpu.memory_space<vmem>>, vector<1x384xf32>
    %c79 = arith.constant 79 : index
    %c0_352 = arith.constant 0 : index
    %241 = vector.load %arg5[%c79, %c0_352] : memref<128x384xf32, #tpu.memory_space<vmem>>, vector<1x384xf32>
    tpu.vector_store %arg5[%c79, %c0_352], %240 {strides = array<i32>} : memref<128x384xf32, #tpu.memory_space<vmem>>, vector<1x384xf32>,
    %c3_353 = arith.constant 3 : index
    %c24_354 = arith.constant 24 : index
    %242 = vector.load %arg4[%c3_353, %c24_354] : memref<4x504xf32, #tpu.memory_space<vmem>>, vector<1x384xf32>
    %c80 = arith.constant 80 : index
    %c0_355 = arith.constant 0 : index
    %243 = vector.load %arg5[%c80, %c0_355] : memref<128x384xf32, #tpu.memory_space<vmem>>, vector<1x384xf32>
    tpu.vector_store %arg5[%c80, %c0_355], %242 {strides = array<i32>} : memref<128x384xf32, #tpu.memory_space<vmem>>, vector<1x384xf32>,
    %c3_356 = arith.constant 3 : index
    %c25_357 = arith.constant 25 : index
    %244 = vector.load %arg4[%c3_356, %c25_357] : memref<4x504xf32, #tpu.memory_space<vmem>>, vector<1x384xf32>
    %c81 = arith.constant 81 : index
    %c0_358 = arith.constant 0 : index
    %245 = vector.load %arg5[%c81, %c0_358] : memref<128x384xf32, #tpu.memory_space<vmem>>, vector<1x384xf32>
    tpu.vector_store %arg5[%c81, %c0_358], %244 {strides = array<i32>} : memref<128x384xf32, #tpu.memory_space<vmem>>, vector<1x384xf32>,
    %c3_359 = arith.constant 3 : index
    %c26_360 = arith.constant 26 : index
    %246 = vector.load %arg4[%c3_359, %c26_360] : memref<4x504xf32, #tpu.memory_space<vmem>>, vector<1x384xf32>
    %c82 = arith.constant 82 : index
    %c0_361 = arith.constant 0 : index
    %247 = vector.load %arg5[%c82, %c0_361] : memref<128x384xf32, #tpu.memory_space<vmem>>, vector<1x384xf32>
    tpu.vector_store %arg5[%c82, %c0_361], %246 {strides = array<i32>} : memref<128x384xf32, #tpu.memory_space<vmem>>, vector<1x384xf32>,
    %c3_362 = arith.constant 3 : index
    %c27_363 = arith.constant 27 : index
    %248 = vector.load %arg4[%c3_362, %c27_363] : memref<4x504xf32, #tpu.memory_space<vmem>>, vector<1x384xf32>
    %c83 = arith.constant 83 : index
    %c0_364 = arith.constant 0 : index
    %249 = vector.load %arg5[%c83, %c0_364] : memref<128x384xf32, #tpu.memory_space<vmem>>, vector<1x384xf32>
    tpu.vector_store %arg5[%c83, %c0_364], %248 {strides = array<i32>} : memref<128x384xf32, #tpu.memory_space<vmem>>, vector<1x384xf32>,
    %c3_365 = arith.constant 3 : index
    %c28_366 = arith.constant 28 : index
    %250 = vector.load %arg4[%c3_365, %c28_366] : memref<4x504xf32, #tpu.memory_space<vmem>>, vector<1x384xf32>
    %c84 = arith.constant 84 : index
    %c0_367 = arith.constant 0 : index
    %251 = vector.load %arg5[%c84, %c0_367] : memref<128x384xf32, #tpu.memory_space<vmem>>, vector<1x384xf32>
    tpu.vector_store %arg5[%c84, %c0_367], %250 {strides = array<i32>} : memref<128x384xf32, #tpu.memory_space<vmem>>, vector<1x384xf32>,
    %c3_368 = arith.constant 3 : index
    %c48_369 = arith.constant 48 : index
    %252 = vector.load %arg4[%c3_368, %c48_369] : memref<4x504xf32, #tpu.memory_space<vmem>>, vector<1x384xf32>
    %c85 = arith.constant 85 : index
    %c0_370 = arith.constant 0 : index
    %253 = vector.load %arg5[%c85, %c0_370] : memref<128x384xf32, #tpu.memory_space<vmem>>, vector<1x384xf32>
    tpu.vector_store %arg5[%c85, %c0_370], %252 {strides = array<i32>} : memref<128x384xf32, #tpu.memory_space<vmem>>, vector<1x384xf32>,
    %c3_371 = arith.constant 3 : index
    %c49_372 = arith.constant 49 : index
    %254 = vector.load %arg4[%c3_371, %c49_372] : memref<4x504xf32, #tpu.memory_space<vmem>>, vector<1x384xf32>
    %c86 = arith.constant 86 : index
    %c0_373 = arith.constant 0 : index
    %255 = vector.load %arg5[%c86, %c0_373] : memref<128x384xf32, #tpu.memory_space<vmem>>, vector<1x384xf32>
    tpu.vector_store %arg5[%c86, %c0_373], %254 {strides = array<i32>} : memref<128x384xf32, #tpu.memory_space<vmem>>, vector<1x384xf32>,
    %c3_374 = arith.constant 3 : index
    %c50_375 = arith.constant 50 : index
    %256 = vector.load %arg4[%c3_374, %c50_375] : memref<4x504xf32, #tpu.memory_space<vmem>>, vector<1x384xf32>
    %c87 = arith.constant 87 : index
    %c0_376 = arith.constant 0 : index
    %257 = vector.load %arg5[%c87, %c0_376] : memref<128x384xf32, #tpu.memory_space<vmem>>, vector<1x384xf32>
    tpu.vector_store %arg5[%c87, %c0_376], %256 {strides = array<i32>} : memref<128x384xf32, #tpu.memory_space<vmem>>, vector<1x384xf32>,
    %c3_377 = arith.constant 3 : index
    %c51_378 = arith.constant 51 : index
    %258 = vector.load %arg4[%c3_377, %c51_378] : memref<4x504xf32, #tpu.memory_space<vmem>>, vector<1x384xf32>
    %c88 = arith.constant 88 : index
    %c0_379 = arith.constant 0 : index
    %259 = vector.load %arg5[%c88, %c0_379] : memref<128x384xf32, #tpu.memory_space<vmem>>, vector<1x384xf32>
    tpu.vector_store %arg5[%c88, %c0_379], %258 {strides = array<i32>} : memref<128x384xf32, #tpu.memory_space<vmem>>, vector<1x384xf32>,
    %c3_380 = arith.constant 3 : index
    %c52_381 = arith.constant 52 : index
    %260 = vector.load %arg4[%c3_380, %c52_381] : memref<4x504xf32, #tpu.memory_space<vmem>>, vector<1x384xf32>
    %c89 = arith.constant 89 : index
    %c0_382 = arith.constant 0 : index
    %261 = vector.load %arg5[%c89, %c0_382] : memref<128x384xf32, #tpu.memory_space<vmem>>, vector<1x384xf32>
    tpu.vector_store %arg5[%c89, %c0_382], %260 {strides = array<i32>} : memref<128x384xf32, #tpu.memory_space<vmem>>, vector<1x384xf32>,
    %c3_383 = arith.constant 3 : index
    %c72_384 = arith.constant 72 : index
    %262 = vector.load %arg4[%c3_383, %c72_384] : memref<4x504xf32, #tpu.memory_space<vmem>>, vector<1x384xf32>
    %c90_385 = arith.constant 90 : index
    %c0_386 = arith.constant 0 : index
    %263 = vector.load %arg5[%c90_385, %c0_386] : memref<128x384xf32, #tpu.memory_space<vmem>>, vector<1x384xf32>
    tpu.vector_store %arg5[%c90_385, %c0_386], %262 {strides = array<i32>} : memref<128x384xf32, #tpu.memory_space<vmem>>, vector<1x384xf32>,
    %c3_387 = arith.constant 3 : index
    %c73_388 = arith.constant 73 : index
    %264 = vector.load %arg4[%c3_387, %c73_388] : memref<4x504xf32, #tpu.memory_space<vmem>>, vector<1x384xf32>
    %c91 = arith.constant 91 : index
    %c0_389 = arith.constant 0 : index
    %265 = vector.load %arg5[%c91, %c0_389] : memref<128x384xf32, #tpu.memory_space<vmem>>, vector<1x384xf32>
    tpu.vector_store %arg5[%c91, %c0_389], %264 {strides = array<i32>} : memref<128x384xf32, #tpu.memory_space<vmem>>, vector<1x384xf32>,
    %c3_390 = arith.constant 3 : index
    %c74_391 = arith.constant 74 : index
    %266 = vector.load %arg4[%c3_390, %c74_391] : memref<4x504xf32, #tpu.memory_space<vmem>>, vector<1x384xf32>
    %c92 = arith.constant 92 : index
    %c0_392 = arith.constant 0 : index
    %267 = vector.load %arg5[%c92, %c0_392] : memref<128x384xf32, #tpu.memory_space<vmem>>, vector<1x384xf32>
    tpu.vector_store %arg5[%c92, %c0_392], %266 {strides = array<i32>} : memref<128x384xf32, #tpu.memory_space<vmem>>, vector<1x384xf32>,
    %c3_393 = arith.constant 3 : index
    %c75_394 = arith.constant 75 : index
    %268 = vector.load %arg4[%c3_393, %c75_394] : memref<4x504xf32, #tpu.memory_space<vmem>>, vector<1x384xf32>
    %c93 = arith.constant 93 : index
    %c0_395 = arith.constant 0 : index
    %269 = vector.load %arg5[%c93, %c0_395] : memref<128x384xf32, #tpu.memory_space<vmem>>, vector<1x384xf32>
    tpu.vector_store %arg5[%c93, %c0_395], %268 {strides = array<i32>} : memref<128x384xf32, #tpu.memory_space<vmem>>, vector<1x384xf32>,
    %c3_396 = arith.constant 3 : index
    %c76_397 = arith.constant 76 : index
    %270 = vector.load %arg4[%c3_396, %c76_397] : memref<4x504xf32, #tpu.memory_space<vmem>>, vector<1x384xf32>
    %c94 = arith.constant 94 : index
    %c0_398 = arith.constant 0 : index
    %271 = vector.load %arg5[%c94, %c0_398] : memref<128x384xf32, #tpu.memory_space<vmem>>, vector<1x384xf32>
    tpu.vector_store %arg5[%c94, %c0_398], %270 {strides = array<i32>} : memref<128x384xf32, #tpu.memory_space<vmem>>, vector<1x384xf32>,
    %c3_399 = arith.constant 3 : index
    %c96_400 = arith.constant 96 : index
    %272 = vector.load %arg4[%c3_399, %c96_400] : memref<4x504xf32, #tpu.memory_space<vmem>>, vector<1x384xf32>
    %c95 = arith.constant 95 : index
    %c0_401 = arith.constant 0 : index
    %273 = vector.load %arg5[%c95, %c0_401] : memref<128x384xf32, #tpu.memory_space<vmem>>, vector<1x384xf32>
    tpu.vector_store %arg5[%c95, %c0_401], %272 {strides = array<i32>} : memref<128x384xf32, #tpu.memory_space<vmem>>, vector<1x384xf32>,
    %c3_402 = arith.constant 3 : index
    %c97_403 = arith.constant 97 : index
    %274 = vector.load %arg4[%c3_402, %c97_403] : memref<4x504xf32, #tpu.memory_space<vmem>>, vector<1x384xf32>
    %c96_404 = arith.constant 96 : index
    %c0_405 = arith.constant 0 : index
    %275 = vector.load %arg5[%c96_404, %c0_405] : memref<128x384xf32, #tpu.memory_space<vmem>>, vector<1x384xf32>
    tpu.vector_store %arg5[%c96_404, %c0_405], %274 {strides = array<i32>} : memref<128x384xf32, #tpu.memory_space<vmem>>, vector<1x384xf32>,
    %c3_406 = arith.constant 3 : index
    %c98_407 = arith.constant 98 : index
    %276 = vector.load %arg4[%c3_406, %c98_407] : memref<4x504xf32, #tpu.memory_space<vmem>>, vector<1x384xf32>
    %c97_408 = arith.constant 97 : index
    %c0_409 = arith.constant 0 : index
    %277 = vector.load %arg5[%c97_408, %c0_409] : memref<128x384xf32, #tpu.memory_space<vmem>>, vector<1x384xf32>
    tpu.vector_store %arg5[%c97_408, %c0_409], %276 {strides = array<i32>} : memref<128x384xf32, #tpu.memory_space<vmem>>, vector<1x384xf32>,
    %c3_410 = arith.constant 3 : index
    %c99_411 = arith.constant 99 : index
    %278 = vector.load %arg4[%c3_410, %c99_411] : memref<4x504xf32, #tpu.memory_space<vmem>>, vector<1x384xf32>
    %c98_412 = arith.constant 98 : index
    %c0_413 = arith.constant 0 : index
    %279 = vector.load %arg5[%c98_412, %c0_413] : memref<128x384xf32, #tpu.memory_space<vmem>>, vector<1x384xf32>
    tpu.vector_store %arg5[%c98_412, %c0_413], %278 {strides = array<i32>} : memref<128x384xf32, #tpu.memory_space<vmem>>, vector<1x384xf32>,
    %c3_414 = arith.constant 3 : index
    %c100_415 = arith.constant 100 : index
    %280 = vector.load %arg4[%c3_414, %c100_415] : memref<4x504xf32, #tpu.memory_space<vmem>>, vector<1x384xf32>
    %c99_416 = arith.constant 99 : index
    %c0_417 = arith.constant 0 : index
    %281 = vector.load %arg5[%c99_416, %c0_417] : memref<128x384xf32, #tpu.memory_space<vmem>>, vector<1x384xf32>
    tpu.vector_store %arg5[%c99_416, %c0_417], %280 {strides = array<i32>} : memref<128x384xf32, #tpu.memory_space<vmem>>, vector<1x384xf32>,
    %cst_418 = arith.constant 0.000000e+00 : f32
    %282 = vector.broadcast %cst_418 : f32 to vector<28x384xf32>
    %c100_419 = arith.constant 100 : index
    %c0_420 = arith.constant 0 : index
    %283 = vector.load %arg5[%c100_419, %c0_420] : memref<128x384xf32, #tpu.memory_space<vmem>>, vector<28x384xf32>
    tpu.vector_store %arg5[%c100_419, %c0_420], %282 {strides = array<i32>} : memref<128x384xf32, #tpu.memory_space<vmem>>, vector<28x384xf32>,
    %c0_421 = arith.constant 0 : index
    %c0_422 = arith.constant 0 : index
    %284 = vector.load %arg1[%c0_421, %c0_422] : memref<8x128xf32, #tpu.memory_space<vmem>>, vector<8x128xf32>
    %c0_423 = arith.constant 0 : index
    %c0_424 = arith.constant 0 : index
    %285 = vector.load %arg5[%c0_423, %c0_424] : memref<128x384xf32, #tpu.memory_space<vmem>>, vector<128x384xf32>
    %cst_425 = arith.constant dense<0.000000e+00> : vector<8x384xf32>
    %286 = tpu.matmul %284, %285, %cst_425 {dimension_numbers = #tpu.dot_dimension_numbers<[1], [0], [0], [1], [0, 0, 1, 1], [], []>} : vector<8x128xf32>, vector<128x384xf32>, vector<8x384xf32> -> vector<8x384xf32>
    %c0_426 = arith.constant 0 : index
    %c0_427 = arith.constant 0 : index
    %c0_428 = arith.constant 0 : index
    %287 = vector.load %arg3[%c0_426, %c0_427, %c0_428] : memref<1x8x384xf32, #tpu.memory_space<vmem>>, vector<1x8x384xf32>
    %288 = vector.shape_cast %287 : vector<1x8x384xf32> to vector<8x384xf32>
    %289 = vector.shape_cast %286 : vector<8x384xf32> to vector<1x8x384xf32>
    tpu.vector_store %arg3[%c0_426, %c0_427, %c0_428], %289 {strides = array<i32>} : memref<1x8x384xf32, #tpu.memory_space<vmem>>, vector<1x8x384xf32>,
    return
  }
  func.func @transform_0(%arg0: i32) -> (i32, i32) {
    %c0_i32 = arith.constant 0 : i32
    %c0_i32_0 = arith.constant 0 : i32
    %c0_i32_1 = arith.constant 0 : i32
    return %c0_i32, %c0_i32_0 : i32, i32
  }
  func.func @transform_1(%arg0: i32) -> (i32, i32, i32, i32) {
    %c0_i32 = arith.constant 0 : i32
    %c0_i32_0 = arith.constant 0 : i32
    %c0_i32_1 = arith.constant 0 : i32
    %c0_i32_2 = arith.constant 0 : i32
    return %arg0, %c0_i32, %c0_i32_0, %c0_i32_1 : i32, i32, i32, i32
  }
  func.func @transform_2(%arg0: i32) -> (i32, i32, i32) {
    %c0_i32 = arith.constant 0 : i32
    %c0_i32_0 = arith.constant 0 : i32
    %c0_i32_1 = arith.constant 0 : i32
    return %arg0, %c0_i32, %c0_i32_0 : i32, i32, i32
  }
}

</mosaic_0001>

<bundles_post_ra>
// kernel: tpu_custom_call.1
= control target key start
LH: loop header
LB: loop body
LE: loop exit
PB: predicated region body
PF: predicated region fallthrough
CT: control target
= control target key end

     0   :  { %7 = vsyncpa [#allocation5], 0  ;;  %s3102_s0 = inlined_call_operand.hbm [shape: f32[8,128], index: 0, kind: input, shape index: {}]   ;;  %s3103_s1 = inlined_call_operand.hbm [shape: f32[2,4,16,16], index: 1, kind: input, shape index: {}]   ;;  %s3104_s2 = inlined_call_operand.hbm [shape: f32[2,8,384], index: 2, kind: output, shape index: {}]  }
   0x1   :  { %8 = vsyncpa [#allocation8], 0 }
   0x2   :  { %10 = vsyncpa [#allocation8 + $0x1], 0 }
   0x3   :  { %11 = vsyncpa [#allocation6], 0 }
   0x4   :  { %13 = vsyncpa [#allocation6 + $0x1], 0  ;;  %s2305_s9 = smov 0   ;;  %s2307_s10 = smov 0  }
   0x5   :  { %s2309_s11 = smov 0   ;;  %s2311_s12 = smov 0  }
   0x6 LB: > { %s2326_s13 = sadd.s32 4294967295, %s2240_s12   ;;  %s1885_s14 = sadd.s32 4294967294, %s2240_s12   ;;  %s2240_s12 = sphi %s2311_s12, %s3242_s12   ;;  %s2236_s11 = sphi %s2309_s11, %s3241_s11   ;;  %s2232_s10 = sphi %s2307_s10, %s3240_s10   ;;  %s2228_s9 = sphi %s2305_s9, %s3239_s9  }
   0x7   : > { %s2330_s15 = sadd.s32 1, %s2240_s12   ;;  %s47_s16 = sadd.s32 1, %s2236_s11 }
   0x8   : > { %s44_s17 = ssub.s32 %s2240_s12, %s2330_s15  ;;  %p54_p0 = scmp.ne.s32.totalorder %s2236_s11, %s2232_s10 }
   0x9   : > { %p45_p1 = scmp.eq.s32.totalorder %s44_s17, 0  ;;  %p55_p2 = scmp.eq.s32.totalorder %s2240_s12, 0 }
   0xa   : > { %p60_p3 = scmp.ne.s32.totalorder %s2232_s10, %s2228_s9  ;;  %p3105_p4 = scmp.eq.s32.totalorder %s2326_s13, 0 }
   0xb   : > { %s2342_s18 = scalar_select %p45_p1, %s2236_s11, %s47_s16  }
   0xc   : > { %p2344_p5 = por %p55_p2, %p54_p0  ;;  %p2350_p6 = por %p3105_p4, %p60_p3 }
   0xd   : > { %p84_p7 = scmp.eq.s32.totalorder %s2326_s13, 1  ;;  %p90_p8 = scmp.eq.s32.totalorder %s1885_s14, 1 }
   0xe   : > { %s3163_s20 = scalar_select %p2350_p6, 1, 0 }
   0xf   : > { %p1886_p9 = scmp.ge.s32.totalorder %s2240_s12, 1  ;;  %p97_p10 = scmp.lt.s32.totalorder %s2240_s12, 3 }
  0x10   : > { %p2357_p11 = por %p84_p7, %p54_p0  ;;  %p2361_p12 = por %p90_p8, %p60_p3 }
  0x11   : > { %p2365_p13 = pnand %p1886_p9, %p97_p10  ;;  %s2242_s24 = smov [#allocation4]  }
  0x12   : > { %s3164_s21 = scalar_select %p2357_p11, 1, 0 }
  0x13   : > { %s3165_s22 = scalar_select %p2361_p12, 1, 0 }
  0x14   : > { %s3166_s23 = scalar_select %p2365_p13, 1, 0 }
  0x15   : > { %p2017_p2 = pneg %p2365_p13  ;;  %s110_s25 = sshll.u32 %s2242_s24, 4  ;;  %s111_s25 = int_to_ptr.vmem [resolvable:$true] %s110_s25 }
  0x16   : > { %p2030_p4 = scmp.lt.s32.totalorder %s2240_s12, 2  ;;  %p3167_p0 = scmp.eq.s32.totalorder %s2326_s13, 0 }
  0x17   : > { %s121_s27 = sand.u32 1, %s2236_s11   ;;  %s2112_s4 = scalar_lea.hbm %s3102_s0, 128 }
  0x18   : > { %p2375_p7 = pnand %p2017_p2, %p3167_p0  ;;  %p2382_p3 = pnand %p2030_p4, %p2344_p5 }
  0x19   : > { %s1889_s29 = sshll.u32 %s121_s27, 6  ;;  %p2113_p8 = scmp.ne.s32.totalorder %s3102_s0, %s2112_s4 }
  0x1a   : > { %s3169_s28 = scalar_select %p2382_p3, 1, 0 }
  0x1b   : > { %p2114_p9 = pneg %p2375_p7  ;;  %p2119_p4 = scmp.lt.u32.totalorder %s2112_s4, %s3102_s0 }
  0x1d   : > { %p2115_p10 = pnand %p2114_p9, %p2113_p8 }
  0x1f   : > { %p2116_p2 = pneg %p2115_p10 }
  0x21   : > { %p2121_p5 = pnand %p2119_p4, %p2116_p2 }
  0x23   : > { %2124 = shalt.err (!%p2121_p5)
}
  0x24   : > { %s2125_s14 = scalar_lea.vmem %s111_s25, 128  ;;  %p2133_p11 = scmp.lt.s32.totalorder %s111_s25, %s111_s25 }
  0x25   : > { %p2126_p0 = scmp.ne.s32.totalorder %s111_s25, %s2125_s14  ;;  %p2134_p6 = scmp.lt.s32.totalorder %s2125_s14, %s2125_s14 }
  0x27   : > { %p2128_p1 = pnand %p2126_p0, %p2114_p9  ;;  %p2135_p13 = por %p2134_p6, %p2133_p11 }
  0x29   : > { %p2129_p12 = pneg %p2128_p1 }
  0x2b   : > { %p2136_p3 = pnand %p2135_p13, %p2129_p12 }
  0x2d   : > { %2139 = shalt.err (!%p2136_p3)
}
  0x2e   : > { %2020 = dma.hbm_to_vmem [thread:$0]  (!%p2375_p7), %s3102_s0, 128, %s111_s25, [#allocation5]  }
  0x2f   : > { %s1898_s19 = sshll.u32 %s2240_s12, 10  ;;  %s125_s24 = scalar_lea.vmem [#allocation7], %s1889_s29 }
  0x30   : > { %s132_s30 = sshll.u32 %s125_s24, 4  ;;  %s2406_s5 = scalar_lea.hbm %s3103_s1, %s1898_s19  ;;  %s2408_s30 = int_to_ptr.vmem [resolvable:$true] %s132_s30 }
  0x31   : > { %s2410_s26 = scalar_lea.sflag [#allocation8], %s121_s27  ;;  %s2140_s6 = scalar_lea.hbm %s2406_s5, 1024 }
  0x32   : > { %p2141_p6 = scmp.ne.s32.totalorder %s2406_s5, %s2140_s6  ;;  %p3170_p11 = scmp.ne.s32.totalorder %s3169_s28, 0 }
  0x33   : > { %s2145_s7 = scalar_lea.hbm %s3103_s1, 2048  ;;  %p2146_p7 = scmp.lt.u32.totalorder %s2406_s5, %s3103_s1 }
  0x34   : > { %p2142_p12 = pneg %p3170_p11  ;;  %p2147_p3 = scmp.lt.u32.totalorder %s2145_s7, %s2140_s6 }
  0x35   : > { %p2149_p9 = scmp.lt.u32.totalorder %s2140_s6, %s2406_s5 }
  0x36   : > { %p2143_p13 = pnand %p2142_p12, %p2141_p6  ;;  %p2148_p8 = por %p2147_p3, %p2146_p7 }
  0x38   : > { %p2144_p1 = pneg %p2143_p13  ;;  %p2150_p10 = por %p2149_p9, %p2148_p8 }
  0x3a   : > { %p2151_p2 = pnand %p2150_p10, %p2144_p1 }
  0x3c   : > { %2154 = shalt.err (!%p2151_p2)
}
  0x3d   : > { %s2155_s27 = scalar_lea.vmem %s2408_s30, 1024  ;;  %s2243_s16 = smov [#allocation7]  }
  0x3e   : > { %p2156_p4 = scmp.ne.s32.totalorder %s2408_s30, %s2155_s27  ;;  %s2160_s17 = sshll.u32 %s2243_s16, 4  ;;  %s2161_s17 = int_to_ptr.vmem [resolvable:$false] %s2160_s17 }
  0x3f   : > { %s2162_s19 = scalar_lea.vmem %s2161_s17, 2048  ;;  %p2163_p6 = scmp.lt.s32.totalorder %s2408_s30, %s2161_s17 }
  0x40   : > { %p2158_p5 = pnand %p2156_p4, %p2142_p12  ;;  %p2164_p13 = scmp.lt.s32.totalorder %s2162_s19, %s2155_s27 }
  0x42   : > { %p2159_p0 = pneg %p2158_p5  ;;  %p2165_p7 = por %p2164_p13, %p2163_p6 }
  0x44   : > { %p2166_p3 = pnand %p2165_p7, %p2159_p0 }
  0x46   : > { %2169 = shalt.err (!%p2166_p3)
}
  0x47   : > { %s2244_s24 = smov 128   ;;  %s2245_s3 = smov 8  }
  0x48   : > { %2024 = dma.hbm_to_vmem [thread:$0]  (!%p3170_p11), %s2406_s5, 1024, %s2408_s30, %s2410_s26, %s2244_s24, %s2244_s24, %s2245_s3  }
  0x49   : > { %p3171_p12 = scmp.ne.s32.totalorder %s3166_s23, 0 }
  0x4a   : > { %p3172_p1 = scmp.eq.s32.totalorder (!%p3171_p12), %s2326_s13, 0 }
  0x4b   : > { %144 = sbr.rel (%p3171_p12) target bundleno = 808 (0x328), region = 28 }
  0x52   : > { %2215 = dma.done.wait (%p3172_p1), [#allocation5], 128   ;;  %p3173_p8 = pmov %p3172_p1 }
  0x53   : > { %s2445_s4 = sand.u32 1, %s2232_s10   ;;  %p3174_p11 = scmp.ne.s32.totalorder %s3163_s20, 0 }
  0x54   : > { %2217 = vsyncadd (%p3173_p8), [#allocation5], 4294967168  ;;  %s1894_s6 = sshll.u32 %s2445_s4, 6  ;;  %s151_s25 = scalar_lea.sflag [#allocation8], %s2445_s4 }
  0x55   : > { %s2449_s29 = scalar_lea.vmem [#allocation7], %s1894_s6 }
  0x56   : > { %2219 = dma.done.wait (%p3174_p11), %s151_s25, 1024  }
  0x57   : > { %2221 = vsyncadd (%p3174_p11), %s151_s25, 4294966272  ;;  %vm175_vm0 = vcmask 404480   ;;  %vm177_vm1 = vcmask 601616   ;;  %vm179_vm2 = vcmask 798416   ;;  %vm181_vm3 = vcmask 995216   ;;  %s2247_s20 = smov 74  }
  0x58   : > { %v2246_v0 = vmov 0.0   ;;  %vm220_vm4 = vcmask 1041409   ;;  %vm222_vm5 = vcmask 1045509   ;;  %vm225_vm6 = vcmask 1042434   ;;  %v239_v1 = vld [vmem:[%s2449_s29 + $0x1] sm:$0x1] }
  0x59   : > { %176 = vst.msk [vmem:[#allocation2] sm:$0xf] %vm175_vm0, %v2246_v0  ;;  %1583 = vst [vmem:[#allocation3 + $0x120] sm:$0xf0] %v2246_v0  ;;  %1708 = vmatprep.mubr.f32.mxu0 %v2246_v0  ;;  %vm227_vm7 = vcmask 1046534   ;;  %vm230_vm8 = vcmask 1043459  }
  0x5a   : > { %1584 = vst [vmem:[#allocation3 + $0x128] sm:$0xf0] %v2246_v0  ;;  %1585 = vst [vmem:[#allocation3 + $0x130] sm:$0xf0] %v2246_v0  ;;  %v240_v2 = vld [vmem:[%s2449_s29 + $0x11] sm:$0x1] }
  0x5b   : > { %1586 = vst [vmem:[#allocation3 + $0x138] sm:$0xff] %v2246_v0  ;;  %178 = vst.msk [vmem:[#allocation2] sm:$0xf] %vm177_vm1, %v2246_v0  ;;  %v241_v3 = vld [vmem:[%s2449_s29 + $0x21] sm:$0x1]  ;;  %v247_v5 = vrot.slane %v240_v2, 7 }
  0x5c   : > { %180 = vst.msk [vmem:[#allocation2] sm:$0xf] %vm179_vm2, %v2246_v0  ;;  %v242_v4 = vld [vmem:[%s2449_s29 + $0x31] sm:$0x1]  ;;  %v250_v6 = vrot.slane %v241_v3, 6  ;;  %vm232_vm9 = vcmask 1047559  }
  0x5d   : > { %182 = vst.msk [vmem:[#allocation2] sm:$0xf] %vm181_vm3, %v2246_v0  ;;  %v211_v7 = vld [vmem:[%s2449_s29] sm:$0x1]  ;;  %v253_v8 = vrot.slane %v242_v4, 5  ;;  %v248_v11 = vsel %vm220_vm4, %v247_v5, %v239_v1  ;;  %s2248_s23 = smov 50  }
  0x5e   : > { %v212_v9 = vld [vmem:[%s2449_s29 + $0x10] sm:$0x1]  ;;  %v213_v10 = vld [vmem:[%s2449_s29 + $0x20] sm:$0x1]  ;;  %v261_v15 = vld [vmem:[%s2449_s29 + $0x2] sm:$0x1]  ;;  %v249_v16 = vsel %vm222_vm5, %v247_v5, %v248_v11 }
  0x5f   : > { %v214_v12 = vld [vmem:[%s2449_s29 + $0x30] sm:$0x1]  ;;  %v219_v13 = vrot.slane %v212_v9, 7  ;;  %v224_v14 = vrot.slane %v213_v10, 6  ;;  %v262_v18 = vld [vmem:[%s2449_s29 + $0x12] sm:$0x1]  ;;  %v251_v20 = vsel %vm225_vm6, %v250_v6, %v249_v16 }
  0x60   : > { %v229_v17 = vrot.slane %v214_v12, 5  ;;  %v263_v19 = vld [vmem:[%s2449_s29 + $0x22] sm:$0x1]  ;;  %v264_v22 = vld [vmem:[%s2449_s29 + $0x32] sm:$0x1]  ;;  %v269_v23 = vrot.slane %v262_v18, 7  ;;  %v252_v26 = vsel %vm227_vm7, %v250_v6, %v251_v20 }
  0x61   : > { %v221_v21 = vsel %vm220_vm4, %v219_v13, %v211_v7  ;;  %v272_v24 = vrot.slane %v263_v19, 6  ;;  %v283_v25 = vld [vmem:[%s2449_s29 + $0x3] sm:$0x1]  ;;  %v275_v28 = vrot.slane %v264_v22, 5  ;;  %v284_v29 = vld [vmem:[%s2449_s29 + $0x13] sm:$0x1]  ;;  %v254_v31 = vsel %vm230_vm8, %v253_v8, %v252_v26 }
  0x62   : > { %v223_v27 = vsel %vm222_vm5, %v219_v13, %v221_v21  ;;  %v285_v30 = vld [vmem:[%s2449_s29 + $0x23] sm:$0x1]  ;;  %v270_v33 = vsel %vm220_vm4, %v269_v23, %v261_v15  ;;  %v286_v34 = vld [vmem:[%s2449_s29 + $0x33] sm:$0x1]  ;;  %v291_v35 = vrot.slane %v284_v29, 7  ;;  %v255_v36 = vsel %vm232_vm9, %v253_v8, %v254_v31  ;;  %s2249_s28 = smov 98  }
  0x63   : > { %v226_v32 = vsel %vm225_vm6, %v224_v14, %v223_v27  ;;  %v271_v38 = vsel %vm222_vm5, %v269_v23, %v270_v33  ;;  %v294_v39 = vrot.slane %v285_v30, 6  ;;  %v332_v40 = vld [vmem:[%s2449_s29 + $0x15] sm:$0x1]  ;;  %v333_v41 = vld [vmem:[%s2449_s29 + $0x25] sm:$0x1]  ;;  %256 = vrot.lane.b32.xlu1 %v255_v36, %s2247_s20  ;;  %v297_v45 = vrot.slane %v286_v34, 5 }
  0x64   : > { %v228_v37 = vsel %vm227_vm7, %v224_v14, %v226_v32  ;;  %v273_v43 = vsel %vm225_vm6, %v272_v24, %v271_v38  ;;  %v292_v44 = vsel %vm220_vm4, %v291_v35, %v283_v25  ;;  %v331_v46 = vld [vmem:[%s2449_s29 + $0x5] sm:$0x1]  ;;  %v334_v47 = vld [vmem:[%s2449_s29 + $0x35] sm:$0x1]  ;;  %v339_v51 = vrot.slane %v332_v40, 7  ;;  %s2250_s30 = smov 122  }
  0x65   : > { %v231_v42 = vsel %vm230_vm8, %v229_v17, %v228_v37  ;;  %v274_v49 = vsel %vm227_vm7, %v272_v24, %v273_v43  ;;  %v293_v50 = vsel %vm222_vm5, %v291_v35, %v292_v44  ;;  %v310_v52 = vld [vmem:[%s2449_s29 + $0x14] sm:$0x1]  ;;  %v311_v53 = vld [vmem:[%s2449_s29 + $0x24] sm:$0x1]  ;;  %v342_v56 = vrot.slane %v333_v41, 6  ;;  %s2251_s5 = smov 42  }
  0x66   : > { %v233_v48 = vsel %vm232_vm9, %v229_v17, %v231_v42  ;;  %v276_v54 = vsel %vm230_vm8, %v275_v28, %v274_v49  ;;  %v295_v55 = vsel %vm225_vm6, %v294_v39, %v293_v50  ;;  %v345_v57 = vrot.slane %v334_v47, 5  ;;  %v309_v58 = vld [vmem:[%s2449_s29 + $0x4] sm:$0x1]  ;;  %v312_v59 = vld [vmem:[%s2449_s29 + $0x34] sm:$0x1]  ;;  %s2252_s26 = smov 18  }
  0x67   : > { %234 = vrot.lane.b32.xlu0 %v233_v48, %s2248_s23  ;;  %v277_v60 = vsel %vm232_vm9, %v275_v28, %v276_v54  ;;  %v296_v61 = vsel %vm227_vm7, %v294_v39, %v295_v55  ;;  %v340_v62 = vsel %vm220_vm4, %v339_v51, %v331_v46  ;;  %v317_v63 = vrot.slane %v310_v52, 7  ;;  %v354_v1 = vld [vmem:[%s2449_s29 + $0x16] sm:$0x1]  ;;  %v355_v2 = vld [vmem:[%s2449_s29 + $0x26] sm:$0x1]  ;;  %s2253_s7 = smov 66  }
  0x68   : > { %278 = vrot.lane.b32.xlu1 %v277_v60, %s2249_s28  ;;  %v298_v3 = vsel %vm230_vm8, %v297_v45, %v296_v61  ;;  %v341_v4 = vsel %vm222_vm5, %v339_v51, %v340_v62  ;;  %v320_v5 = vrot.slane %v311_v53, 6  ;;  %v323_v6 = vrot.slane %v312_v59, 5  ;;  %v353_v7 = vld [vmem:[%s2449_s29 + $0x6] sm:$0x1]  ;;  %v356_v8 = vld [vmem:[%s2449_s29 + $0x36] sm:$0x1] }
  0x69   : > { %v299_v9 = vsel %vm232_vm9, %v297_v45, %v298_v3  ;;  %v343_v10 = vsel %vm225_vm6, %v342_v56, %v341_v4  ;;  %v318_v11 = vsel %vm220_vm4, %v317_v63, %v309_v58  ;;  %v361_v12 = vrot.slane %v354_v1, 7  ;;  %v398_v13 = vld [vmem:[%s2449_s29 + $0x18] sm:$0x1]  ;;  %v399_v14 = vld [vmem:[%s2449_s29 + $0x28] sm:$0x1]  ;;  %s2254_s8 = smov 114  }
  0x6a   : > { %v344_v15 = vsel %vm227_vm7, %v342_v56, %v343_v10  ;;  %v319_v16 = vsel %vm222_vm5, %v317_v63, %v318_v11  ;;  %v364_v17 = vrot.slane %v355_v2, 6  ;;  %v367_v18 = vrot.slane %v356_v8, 5  ;;  %v397_v19 = vld [vmem:[%s2449_s29 + $0x8] sm:$0x1]  ;;  %v400_v20 = vld [vmem:[%s2449_s29 + $0x38] sm:$0x1] }
  0x6b   : > { %300 = vrot.lane.b32.xlu0 %v299_v9, %s2250_s30  ;;  %v346_v21 = vsel %vm230_vm8, %v345_v57, %v344_v15  ;;  %v321_v22 = vsel %vm225_vm6, %v320_v5, %v319_v16  ;;  %v362_v23 = vsel %vm220_vm4, %v361_v12, %v353_v7  ;;  %v405_v24 = vrot.slane %v398_v13, 7  ;;  %v424_v25 = vld [vmem:[%s2449_s29 + $0x19] sm:$0x1]  ;;  %v425_v30 = vld [vmem:[%s2449_s29 + $0x29] sm:$0x1]  ;;  %s2255_s14 = smov 10  }
  0x6c   : > { %v347_v26 = vsel %vm232_vm9, %v345_v57, %v346_v21  ;;  %v322_v27 = vsel %vm227_vm7, %v320_v5, %v321_v22  ;;  %v363_v28 = vsel %vm222_vm5, %v361_v12, %v362_v23  ;;  %v408_v29 = vrot.slane %v399_v14, 6  ;;  %v426_v31 = vld [vmem:[%s2449_s29 + $0x39] sm:$0x1]  ;;  %v423_v36 = vld [vmem:[%s2449_s29 + $0x9] sm:$0x1]  ;;  %s2256_s27 = smov 90  }
  0x6d   : > { %348 = vrot.lane.b32.xlu1 %v347_v26, %s2251_s5  ;;  %v324_v32 = vsel %vm230_vm8, %v323_v6, %v322_v27  ;;  %v365_v33 = vsel %vm225_vm6, %v364_v17, %v363_v28  ;;  %v406_v34 = vsel %vm220_vm4, %v405_v24, %v397_v19  ;;  %v411_v35 = vrot.slane %v400_v20, 5  ;;  %v376_v37 = vld [vmem:[%s2449_s29 + $0x17] sm:$0x1]  ;;  %v377_v42 = vld [vmem:[%s2449_s29 + $0x27] sm:$0x1]  ;;  %s2257_s16 = smov 58  }
  0x6e   : > { %v325_v38 = vsel %vm232_vm9, %v323_v6, %v324_v32  ;;  %v366_v39 = vsel %vm227_vm7, %v364_v17, %v365_v33  ;;  %v407_v40 = vsel %vm222_vm5, %v405_v24, %v406_v34  ;;  %v431_v41 = vrot.slane %v424_v25, 7  ;;  %v378_v43 = vld [vmem:[%s2449_s29 + $0x37] sm:$0x1]  ;;  %v375_v48 = vld [vmem:[%s2449_s29 + $0x7] sm:$0x1]  ;;  %s2258_s17 = smov 34  }
  0x6f   : > { %326 = vrot.lane.b32.xlu0 %v325_v38, %s2252_s26  ;;  %v368_v44 = vsel %vm230_vm8, %v367_v18, %v366_v39  ;;  %v409_v45 = vsel %vm225_vm6, %v408_v29, %v407_v40  ;;  %v434_v46 = vrot.slane %v425_v30, 6  ;;  %v437_v47 = vrot.slane %v426_v31, 5  ;;  %v468_v49 = vld [vmem:[%s2449_s29 + $0x1b] sm:$0x1]  ;;  %v469_v54 = vld [vmem:[%s2449_s29 + $0x2b] sm:$0x1] }
  0x70   : > { %v369_v50 = vsel %vm232_vm9, %v367_v18, %v368_v44  ;;  %v410_v51 = vsel %vm227_vm7, %v408_v29, %v409_v45  ;;  %v432_v52 = vsel %vm220_vm4, %v431_v41, %v423_v36  ;;  %v383_v53 = vrot.slane %v376_v37, 7  ;;  %v470_v55 = vld [vmem:[%s2449_s29 + $0x3b] sm:$0x1]  ;;  %v467_v60 = vld [vmem:[%s2449_s29 + $0xb] sm:$0x1]  ;;  %s2259_s19 = smov 2  }
  0x71   : > { %370 = vrot.lane.b32.xlu1 %v369_v50, %s2253_s7  ;;  %v412_v56 = vsel %vm230_vm8, %v411_v35, %v410_v51  ;;  %v433_v57 = vsel %vm222_vm5, %v431_v41, %v432_v52  ;;  %v386_v58 = vrot.slane %v377_v42, 6  ;;  %v389_v59 = vrot.slane %v378_v43, 5  ;;  %v446_v61 = vld [vmem:[%s2449_s29 + $0x1a] sm:$0x1]  ;;  %v447_v3 = vld [vmem:[%s2449_s29 + $0x2a] sm:$0x1] }
  0x72   : > { %v413_v62 = vsel %vm232_vm9, %v411_v35, %v412_v56  ;;  %v435_v63 = vsel %vm225_vm6, %v434_v46, %v433_v57  ;;  %v384_v1 = vsel %vm220_vm4, %v383_v53, %v375_v48  ;;  %v475_v2 = vrot.slane %v468_v49, 7  ;;  %v445_v8 = vld [vmem:[%s2449_s29 + $0xa] sm:$0x1]  ;;  %v448_v9 = vld [vmem:[%s2449_s29 + $0x3a] sm:$0x1]  ;;  %s2260_s24 = smov 82  }
  0x73   : > { %414 = vrot.lane.b32.xlu0 %v413_v62, %s2254_s8  ;;  %v436_v4 = vsel %vm227_vm7, %v434_v46, %v435_v63  ;;  %v385_v5 = vsel %vm222_vm5, %v383_v53, %v384_v1  ;;  %v478_v6 = vrot.slane %v469_v54, 6  ;;  %v481_v7 = vrot.slane %v470_v55, 5  ;;  %v534_v14 = vld [vmem:[%s2449_s29 + $0x1e] sm:$0x1]  ;;  %v535_v19 = vld [vmem:[%s2449_s29 + $0x2e] sm:$0x1] }
  0x74   : > { %v438_v10 = vsel %vm230_vm8, %v437_v47, %v436_v4  ;;  %v387_v11 = vsel %vm225_vm6, %v386_v58, %v385_v5  ;;  %v476_v12 = vsel %vm220_vm4, %v475_v2, %v467_v60  ;;  %v453_v13 = vrot.slane %v446_v61, 7  ;;  %v536_v20 = vld [vmem:[%s2449_s29 + $0x3e] sm:$0x1]  ;;  %v533_v25 = vld [vmem:[%s2449_s29 + $0xe] sm:$0x1]  ;;  %s2261_s3 = smov 26  }
  0x75   : > { %v439_v15 = vsel %vm232_vm9, %v437_v47, %v438_v10  ;;  %v388_v16 = vsel %vm227_vm7, %v386_v58, %v387_v11  ;;  %v477_v17 = vsel %vm222_vm5, %v475_v2, %v476_v12  ;;  %v456_v18 = vrot.slane %v447_v3, 6  ;;  %v490_v26 = vld [vmem:[%s2449_s29 + $0x1c] sm:$0x1]  ;;  %v491_v31 = vld [vmem:[%s2449_s29 + $0x2c] sm:$0x1]  ;;  %s2262_s6 = smov 106  }
  0x76   : > { %440 = vrot.lane.b32.xlu1 %v439_v15, %s2255_s14  ;;  %v390_v21 = vsel %vm230_vm8, %v389_v59, %v388_v16  ;;  %v479_v22 = vsel %vm225_vm6, %v478_v6, %v477_v17  ;;  %v454_v23 = vsel %vm220_vm4, %v453_v13, %v445_v8  ;;  %v459_v24 = vrot.slane %v448_v9, 5  ;;  %v492_v32 = vld [vmem:[%s2449_s29 + $0x3c] sm:$0x1]  ;;  %v489_v37 = vld [vmem:[%s2449_s29 + $0xc] sm:$0x1]  ;;  %s2263_s25 = smov 126  }
  0x77   : > { %v391_v27 = vsel %vm232_vm9, %v389_v59, %v390_v21  ;;  %v480_v28 = vsel %vm227_vm7, %v478_v6, %v479_v22  ;;  %v455_v29 = vsel %vm222_vm5, %v453_v13, %v454_v23  ;;  %v541_v30 = vrot.slane %v534_v14, 7  ;;  %v556_v38 = vld [vmem:[%s2449_s29 + $0x1f] sm:$0x1]  ;;  %v557_v43 = vld [vmem:[%s2449_s29 + $0x2f] sm:$0x1]  ;;  %s3143_s20 = smov 124  }
  0x78   : > { %392 = vrot.lane.b32.xlu0 %v391_v27, %s2256_s27  ;;  %v482_v33 = vsel %vm230_vm8, %v481_v7, %v480_v28  ;;  %v457_v34 = vsel %vm225_vm6, %v456_v18, %v455_v29  ;;  %v544_v35 = vrot.slane %v535_v19, 6  ;;  %v547_v36 = vrot.slane %v536_v20, 5  ;;  %v558_v44 = vld [vmem:[%s2449_s29 + $0x3f] sm:$0x1]  ;;  %v555_v49 = vld [vmem:[%s2449_s29 + $0xf] sm:$0x1] }
  0x79   : > { %v483_v39 = vsel %vm232_vm9, %v481_v7, %v482_v33  ;;  %v458_v40 = vsel %vm227_vm7, %v456_v18, %v457_v34  ;;  %v542_v41 = vsel %vm220_vm4, %v541_v30, %v533_v25  ;;  %v497_v42 = vrot.slane %v490_v26, 7  ;;  %v512_v50 = vld [vmem:[%s2449_s29 + $0x1d] sm:$0x1]  ;;  %v513_v55 = vld [vmem:[%s2449_s29 + $0x2d] sm:$0x1]  ;;  %s3142_s23 = smov 125  }
  0x7a   : > { %484 = vrot.lane.b32.xlu1 %v483_v39, %s2257_s16  ;;  %v460_v45 = vsel %vm230_vm8, %v459_v24, %v458_v40  ;;  %v543_v46 = vsel %vm222_vm5, %v541_v30, %v542_v41  ;;  %v500_v47 = vrot.slane %v491_v31, 6  ;;  %v503_v48 = vrot.slane %v492_v32, 5  ;;  %v511_v60 = vld [vmem:[%s2449_s29 + $0xd] sm:$0x1]  ;;  %v514_v61 = vld [vmem:[%s2449_s29 + $0x3d] sm:$0x1] }
  0x7b   : > { %v461_v51 = vsel %vm232_vm9, %v459_v24, %v460_v45  ;;  %v545_v52 = vsel %vm225_vm6, %v544_v35, %v543_v46  ;;  %v498_v53 = vsel %vm220_vm4, %v497_v42, %v489_v37  ;;  %v563_v54 = vrot.slane %v556_v38, 7  ;;  %s2264_s29 = smov 127   ;;  %s3124_s28 = smov 103  }
  0x7c   : > { %462 = vrot.lane.b32.xlu0 %v461_v51, %s2258_s17  ;;  %v546_v56 = vsel %vm227_vm7, %v544_v35, %v545_v52  ;;  %v499_v57 = vsel %vm222_vm5, %v497_v42, %v498_v53  ;;  %v566_v58 = vrot.slane %v557_v43, 6  ;;  %v569_v59 = vrot.slane %v558_v44, 5  ;;  %s3122_s30 = smov 104   ;;  %s3128_s5 = smov 101  }
  0x7d   : > { %v548_v62 = vsel %vm230_vm8, %v547_v36, %v546_v56  ;;  %v501_v63 = vsel %vm225_vm6, %v500_v47, %v499_v57  ;;  %v564_v1 = vsel %vm220_vm4, %v563_v54, %v555_v49  ;;  %v519_v2 = vrot.slane %v512_v50, 7  ;;  %s3126_s26 = smov 102   ;;  %s3147_s7 = smov 80  }
  0x7e   : > { %v549_v3 = vsel %vm232_vm9, %v547_v36, %v548_v62  ;;  %v502_v4 = vsel %vm227_vm7, %v500_v47, %v501_v63  ;;  %v565_v5 = vsel %vm222_vm5, %v563_v54, %v564_v1  ;;  %v522_v6 = vrot.slane %v513_v55, 6  ;;  %s3146_s8 = smov 100   ;;  %s3132_s14 = smov 78  }
  0x7f   : > { %550 = vrot.lane.b32.xlu1 %v549_v3, %s2259_s19  ;;  %v504_v7 = vsel %vm230_vm8, %v503_v48, %v502_v4  ;;  %v567_v8 = vsel %vm225_vm6, %v566_v58, %v565_v5  ;;  %v520_v9 = vsel %vm220_vm4, %v519_v2, %v511_v60  ;;  %v525_v10 = vrot.slane %v514_v61, 5  ;;  %s3130_s27 = smov 79   ;;  %s3110_s16 = smov 76  }
  0x80   : > { %v505_v11 = vsel %vm232_vm9, %v503_v48, %v504_v7  ;;  %v568_v12 = vsel %vm227_vm7, %v566_v58, %v567_v8  ;;  %v521_v13 = vsel %vm222_vm5, %v519_v2, %v520_v9  ;;  %vm183_vm10 = vcmask 142416   ;;  %s3112_s17 = smov 77   ;;  %s3116_s19 = smov 55  }
  0x81   : > { %506 = vrot.lane.b32.xlu0 %v505_v11, %s2260_s24  ;;  %v570_v14 = vsel %vm230_vm8, %v569_v59, %v568_v12  ;;  %v523_v15 = vsel %vm225_vm6, %v522_v6, %v521_v13  ;;  %vm185_vm11 = vcmask 339216   ;;  %vm187_vm12 = vcmask 536016   ;;  %184 = vst.msk [vmem:[#allocation2 + $0x4] sm:$0xf] %vm183_vm10, %v2246_v0  ;;  %s3114_s24 = smov 56   ;;  %p3236_p10 = scmp.ne.s32.totalorder %s3164_s21, 0 }
  0x82   : > { %v571_v16 = vsel %vm232_vm9, %v569_v59, %v570_v14  ;;  %v524_v17 = vsel %vm227_vm7, %v522_v6, %v523_v15  ;;  %vm189_vm13 = vcmask 732816   ;;  %vm191_vm14 = vcmask 929616   ;;  %186 = vst.msk [vmem:[#allocation2 + $0x4] sm:$0xf] %vm185_vm11, %v2246_v0 }
  0x83   : > { %572 = vrot.lane.b32.xlu1 %v571_v16, %s2261_s3  ;;  %v526_v18 = vsel %vm230_vm8, %v525_v10, %v524_v17  ;;  %188 = vst.msk [vmem:[#allocation2 + $0x4] sm:$0xf] %vm187_vm12, %v2246_v0  ;;  %vm193_vm15 = vcmask 76816   ;;  %vm195_vm0 = vcmask 273616   ;;  %vm197_vm1 = vcmask 470416   ;;  %s3144_s3 = smov 53  }
  0x84   : > { %v527_v19 = vsel %vm232_vm9, %v525_v10, %v526_v18  ;;  %190 = vst.msk [vmem:[#allocation2 + $0x4] sm:$0xf] %vm189_vm13, %v2246_v0  ;;  %vm199_vm2 = vcmask 667216   ;;  %vm204_vm3 = vcmask 15364   ;;  %vm203_vm4 = vcmask 1044432  }
  0x85   : > { %528 = vrot.lane.b32.xlu0 %v527_v19, %s2262_s6  ;;  %192 = vst.msk [vmem:[#allocation2 + $0x4] sm:$0xf] %vm191_vm14, %v2246_v0  ;;  %vm201_vm5 = vcmask 864016   ;;  %vm205_vm6 = vmor %vm204_vm3, %vm203_vm4  ;;  %vm207_vm7 = vcmask 208016   ;;  %vm209_vm8 = vcmask 978256   ;;  %vm237_vm9 = vcmask 535952  }
  0x86   : > { %194 = vst.msk [vmem:[#allocation2 + $0x8] sm:$0xf] %vm193_vm15, %v2246_v0  ;;  %vm259_vm10 = vcmask 732752   ;;  %vm281_vm11 = vcmask 929552   ;;  %vm306_vm12 = vcmask 80900   ;;  %vm303_vm13 = vcmask 998400  }
  0x87   : > { %196 = vst.msk [vmem:[#allocation2 + $0x8] sm:$0xf] %vm195_vm0, %v2246_v0  ;;  %vm307_vm14 = vmor %vm306_vm12, %vm203_vm4  ;;  %vm329_vm15 = vcmask 273552   ;;  %vm351_vm0 = vcmask 470352   ;;  %vm575_vm12 = vcmask 339152   ;;  %s3145_s6 = smov 54   ;;  %v578_v59 = vlaneseq }
  0x88   : > { %198 = vst.msk [vmem:[#allocation2 + $0x8] sm:$0xf] %vm197_vm1, %v2246_v0  ;;  %vm373_vm1 = vcmask 667152   ;;  %v2285_v63 = vmov 0.0|0.0  }
  0x89   : > { %200 = vst.msk [vmem:[#allocation2 + $0x8] sm:$0xf] %vm199_vm2, %v2246_v0  ;;  %vm420_vm2 = vcmask 1044368   ;;  %1983 = vmatprep.subr.bf16.mxu1 %v2285_v63 }
  0x8a   : > { %202 = vst.msk [vmem:[#allocation2 + $0x8] sm:$0xf] %vm201_vm5, %v2246_v0  ;;  %vm417_vm5 = vcmask 932864   ;;  %vm421_vm4 = vmor %vm204_vm3, %vm420_vm2  ;;  %vm531_vm3 = vcmask 995152   ;;  %vm644_vm2 = vcmask 842752  }
  0x8b   : > { %206 = vst.msk [vmem:[#allocation2 + $0x8] sm:$0xff] %vm205_vm6, %v2246_v0  ;;  %vm395_vm6 = vcmask 863952  }
  0x8c   : > { %208 = vst.msk [vmem:[#allocation2 + $0xc] sm:$0xf] %vm207_vm7, %v2246_v0  ;;  %vm443_vm7 = vcmask 207952  }
  0x8d   : > { %210 = vst.msk [vmem:[#allocation2 + $0xc] sm:$0xf] %vm209_vm8, %v2246_v0  ;;  %vm465_vm8 = vcmask 404752  }
  0xd5   : > { %v257_v20 = vpop.permute.xlu1 %256 }
  0xd9   : > { %v235_v21 = vpop.permute.xlu0 %234 }
  0xda   : > { %238 = vst.msk [vmem:[#allocation2] sm:$0xf] %vm237_vm9, %v235_v21  ;;  %v279_v22 = vpop.permute.xlu1 %278  ;;  %vm487_vm9 = vcmask 601552  }
  0xdb   : > { %260 = vst.msk [vmem:[#allocation2] sm:$0xf] %vm259_vm10, %v257_v20  ;;  %vm553_vm10 = vcmask 142352  }
  0xdc   : > { %282 = vst.msk [vmem:[#allocation2] sm:$0xf] %vm281_vm11, %v279_v22  ;;  %vm509_vm11 = vcmask 798352  }
  0xdd   : > { %v301_v23 = vpop.permute.xlu0 %300 }
  0xde   : > { %v302_v24 = vrot.slane %v301_v23, 4 }
  0xdf   : > { %v349_v26 = vpop.permute.xlu1 %348 }
  0xe0   : > { %v304_v25 = vsel %vm303_vm13, %v302_v24, %v301_v23  ;;  %vm2663_vm13 = vcmp.lt.s32.totalorder %v578_v59, 384 }
  0xe1   : > { %308 = vst.msk [vmem:[#allocation2] sm:$0xff] %vm307_vm14, %v304_v25  ;;  %v327_v0 = vpop.permute.xlu0 %326  ;;  %vm600_vm14 = vcmask 1031168  }
  0xe2   : > { %330 = vst.msk [vmem:[#allocation2 + $0x4] sm:$0xf] %vm329_vm15, %v327_v0  ;;  %vm589_vm15 = vcmask 1039360  }
  0xe3   : > { %v371_v27 = vpop.permute.xlu1 %370  ;;  %352 = vst.msk [vmem:[#allocation2 + $0x4] sm:$0xf] %vm351_vm0, %v349_v26  ;;  %vm622_vm0 = vcmask 1014784  }
  0xe4   : > { %374 = vst.msk [vmem:[#allocation2 + $0x4] sm:$0xf] %vm373_vm1, %v371_v27  ;;  %vm611_vm1 = vcmask 1022976  }
  0xe5   : > { %v415_v28 = vpop.permute.xlu0 %414 }
  0xe6   : > { %v416_v29 = vrot.slane %v415_v28, 4 }
  0xe8   : > { %v441_v30 = vpop.permute.xlu1 %440  ;;  %v418_v32 = vsel %vm417_vm5, %v416_v29, %v415_v28  ;;  %vm633_vm5 = vcmask 850944  }
  0xea   : > { %v393_v31 = vpop.permute.xlu0 %392 }
  0xeb   : > { %396 = vst.msk [vmem:[#allocation2 + $0x4] sm:$0xf] %vm395_vm6, %v393_v31  ;;  %vm3161_vm6 = vcmask 826368  }
  0xec   : > { %422 = vst.msk [vmem:[#allocation2 + $0x4] sm:$0xff] %vm421_vm4, %v418_v32  ;;  %v485_v33 = vpop.permute.xlu1 %484  ;;  %vm3160_vm4 = vcmask 834560  }
  0xed   : > { %444 = vst.msk [vmem:[#allocation2 + $0x8] sm:$0xf] %vm443_vm7, %v441_v30  ;;  %vm3159_vm7 = vcmask 654336  }
  0xee   : > { %v463_v34 = vpop.permute.xlu0 %462 }
  0xef   : > { %466 = vst.msk [vmem:[#allocation2 + $0x8] sm:$0xf] %vm465_vm8, %v463_v34  ;;  %vm3157_vm8 = vcmask 818176  }
  0xf0   : > { %488 = vst.msk [vmem:[#allocation2 + $0x8] sm:$0xf] %vm487_vm9, %v485_v33  ;;  %vm3158_vm9 = vcmask 637952  }
  0xf1   : > { %v551_v35 = vpop.permute.xlu1 %550 }
  0xf2   : > { %554 = vst.msk [vmem:[#allocation2 + $0xc] sm:$0xf] %vm553_vm10, %v551_v35  ;;  %vm3148_vm10 = vcmask 646144  }
  0xf3   : > { %v507_v36 = vpop.permute.xlu0 %506 }
  0xf4   : > { %510 = vst.msk [vmem:[#allocation2 + $0x8] sm:$0xf] %vm509_vm11, %v507_v36  ;;  %vm3150_vm11 = vcmask 621568  }
  0xf5   : > { %v573_v37 = vpop.permute.xlu1 %572 }
  0xf6   : > { %576 = vst.msk [vmem:[#allocation2 + $0xc] sm:$0xf] %vm575_vm12, %v573_v37  ;;  %vm3149_vm12 = vcmask 629760  }
  0xf7   : > { %v529_v38 = vpop.permute.xlu0 %528 }
  0xf8   : > { %532 = vst.msk [vmem:[#allocation2 + $0x8] sm:$0xf] %vm531_vm3, %v529_v38  ;;  %vm3152_vm3 = vcmask 449536  }
  0xff   : > { %v595_v39 = vld [vmem:[#allocation2] ss:$4 sm:$0xf]  ;;  %v863_v4 = vld [vmem:[#allocation2 + $0x1] ss:$4 sm:$0xf] }
 0x100   : > { %v584_v40 = vld [vmem:[#allocation2] ss:$4 sm:$0xf]  ;;  %597 = vrot.lane.b32.xlu1 %v595_v39, %s2263_s25  ;;  %v853_v5 = vld [vmem:[#allocation2 + $0x1] ss:$4 sm:$0xf] }
 0x101   : > { %586 = vrot.lane.b32.xlu0 %v584_v40, %s2264_s29  ;;  %v617_v41 = vld [vmem:[#allocation2] ss:$4 sm:$0xf]  ;;  %v849_v6 = vld [vmem:[#allocation2 + $0x1] ss:$4 sm:$0x7] }
 0x102   : > { %v606_v42 = vld [vmem:[#allocation2] ss:$4 sm:$0xf]  ;;  %v883_v7 = vld [vmem:[#allocation2 + $0x1] ss:$4 sm:$0xf] }
 0x103   : > { %v639_v43 = vld [vmem:[#allocation2] ss:$4 sm:$0xf]  ;;  %v873_v8 = vld [vmem:[#allocation2 + $0x1] ss:$4 sm:$0xf] }
 0x104   : > { %619 = vrot.lane.b32.xlu1 %v617_v41, %s3143_s20  ;;  %v628_v44 = vld [vmem:[#allocation2] ss:$4 sm:$0xf]  ;;  %851 = vst.msk [vmem:[#allocation3 + $0x49] ss:$8 sm:$0x7] %vm2663_vm13, %v849_v6 }
 0x105   : > { %608 = vrot.lane.b32.xlu0 %v606_v42, %s3142_s23  ;;  %v661_v45 = vld [vmem:[#allocation2] ss:$4 sm:$0xf]  ;;  %v1094_v9 = vld [vmem:[#allocation2 + $0x2] ss:$4 sm:$0x7] }
 0x106   : > { %v650_v46 = vld [vmem:[#allocation2] ss:$4 sm:$0xf]  ;;  %v1339_v10 = vld [vmem:[#allocation2 + $0x3] ss:$4 sm:$0x7] }
 0x107   : > { %v683_v47 = vld [vmem:[#allocation2] ss:$4 sm:$0xf]  ;;  %1096 = vst.msk [vmem:[#allocation3 + $0x92] ss:$8 sm:$0x7] %vm2663_vm13, %v1094_v9 }
 0x108   : > { %641 = vrot.lane.b32.xlu1 %v639_v43, %s3124_s28  ;;  %v672_v48 = vld [vmem:[#allocation2] ss:$4 sm:$0xf]  ;;  %1341 = vst.msk [vmem:[#allocation3 + $0xdb] ss:$8 sm:$0x7] %vm2663_vm13, %v1339_v10 }
 0x109   : > { %630 = vrot.lane.b32.xlu0 %v628_v44, %s3122_s30  ;;  %v705_v49 = vld [vmem:[#allocation2] ss:$4 sm:$0xf]  ;;  %v903_v11 = vld [vmem:[#allocation2 + $0x1] ss:$4 sm:$0xf] }
 0x10a   : > { %v694_v50 = vld [vmem:[#allocation2] ss:$4 sm:$0xf]  ;;  %v893_v12 = vld [vmem:[#allocation2 + $0x1] ss:$4 sm:$0xf] }
 0x10b   : > { %v727_v51 = vld [vmem:[#allocation2] ss:$4 sm:$0xf]  ;;  %v923_v13 = vld [vmem:[#allocation2 + $0x1] ss:$4 sm:$0xf] }
 0x10c   : > { %663 = vrot.lane.b32.xlu1 %v661_v45, %s3128_s5  ;;  %v716_v52 = vld [vmem:[#allocation2] ss:$4 sm:$0xf]  ;;  %v913_v14 = vld [vmem:[#allocation2 + $0x1] ss:$4 sm:$0xf] }
 0x10d   : > { %652 = vrot.lane.b32.xlu0 %v650_v46, %s3126_s26  ;;  %v749_v53 = vld [vmem:[#allocation2] ss:$4 sm:$0xf]  ;;  %v943_v15 = vld [vmem:[#allocation2 + $0x1] ss:$4 sm:$0xf] }
 0x10e   : > { %v738_v54 = vld [vmem:[#allocation2] ss:$4 sm:$0xf]  ;;  %v933_v16 = vld [vmem:[#allocation2 + $0x1] ss:$4 sm:$0xf] }
 0x10f   : > { %v771_v55 = vld [vmem:[#allocation2] ss:$4 sm:$0xf]  ;;  %v963_v17 = vld [vmem:[#allocation2 + $0x1] ss:$4 sm:$0xf] }
 0x110   : > { %685 = vrot.lane.b32.xlu1 %v683_v47, %s3147_s7  ;;  %v760_v56 = vld [vmem:[#allocation2] ss:$4 sm:$0xf]  ;;  %v953_v18 = vld [vmem:[#allocation2 + $0x1] ss:$4 sm:$0xf] }
 0x111   : > { %674 = vrot.lane.b32.xlu0 %v672_v48, %s3146_s8  ;;  %v793_v57 = vld [vmem:[#allocation2] ss:$4 sm:$0xf]  ;;  %v983_v19 = vld [vmem:[#allocation2 + $0x1] ss:$4 sm:$0xf] }
 0x112   : > { %v782_v58 = vld [vmem:[#allocation2] ss:$4 sm:$0xf]  ;;  %v973_v20 = vld [vmem:[#allocation2 + $0x1] ss:$4 sm:$0xf] }
 0x113   : > { %v815_v60 = vld [vmem:[#allocation2] ss:$4 sm:$0xf]  ;;  %v1003_v21 = vld [vmem:[#allocation2 + $0x1] ss:$4 sm:$0xf] }
 0x114   : > { %707 = vrot.lane.b32.xlu1 %v705_v49, %s3132_s14  ;;  %v804_v61 = vld [vmem:[#allocation2] ss:$4 sm:$0xf]  ;;  %v993_v22 = vld [vmem:[#allocation2 + $0x1] ss:$4 sm:$0xf] }
 0x115   : > { %696 = vrot.lane.b32.xlu0 %v694_v50, %s3130_s27  ;;  %v577_v1 = vld [vmem:[#allocation2] ss:$4 sm:$0x7]  ;;  %v1023_v23 = vld [vmem:[#allocation2 + $0x1] ss:$4 sm:$0xf] }
 0x116   : > { %v837_v2 = vld [vmem:[#allocation2] ss:$4 sm:$0xf]  ;;  %582 = vst.msk [vmem:[#allocation3] ss:$8 sm:$0x7] %vm2663_vm13, %v577_v1 }
 0x117   : > { %v826_v3 = vld [vmem:[#allocation2] ss:$4 sm:$0xf]  ;;  %v1013_v24 = vld [vmem:[#allocation2 + $0x1] ss:$4 sm:$0xf] }
 0x118   : > { %729 = vrot.lane.b32.xlu1 %v727_v51, %s3110_s16  ;;  %s3136_s16 = smov 32   ;;  %v1043_v25 = vld [vmem:[#allocation2 + $0x1] ss:$4 sm:$0xf] }
 0x119   : > { %718 = vrot.lane.b32.xlu0 %v716_v52, %s3112_s17  ;;  %s3118_s17 = smov 52   ;;  %v1033_v26 = vld [vmem:[#allocation2 + $0x1] ss:$4 sm:$0xf] }
 0x11a   : > { %v1063_v0 = vld [vmem:[#allocation2 + $0x1] ss:$4 sm:$0xf]  ;;  %v1108_v30 = vld [vmem:[#allocation2 + $0x2] ss:$4 sm:$0xf] }
 0x11b   : > { %v1053_v27 = vld [vmem:[#allocation2 + $0x1] ss:$4 sm:$0xf]  ;;  %v1098_v31 = vld [vmem:[#allocation2 + $0x2] ss:$4 sm:$0xf] }
 0x11c   : > { %751 = vrot.lane.b32.xlu1 %v749_v53, %s3116_s19  ;;  %s3134_s19 = smov 31   ;;  %v1083_v28 = vld [vmem:[#allocation2 + $0x1] ss:$4 sm:$0xf] }
 0x11d   : > { %740 = vrot.lane.b32.xlu0 %v738_v54, %s3114_s24  ;;  %s3120_s24 = smov 30   ;;  %v1073_v29 = vld [vmem:[#allocation2 + $0x1] ss:$4 sm:$0xf] }
 0x11e   : > { %v1128_v32 = vld [vmem:[#allocation2 + $0x2] ss:$4 sm:$0xf] }
 0x11f   : > { %v1118_v33 = vld [vmem:[#allocation2 + $0x2] ss:$4 sm:$0xf] }
 0x120   : > { %773 = vrot.lane.b32.xlu1 %v771_v55, %s3144_s3  ;;  %v1148_v34 = vld [vmem:[#allocation2 + $0x2] ss:$4 sm:$0xf] }
 0x121   : > { %762 = vrot.lane.b32.xlu0 %v760_v56, %s3145_s6  ;;  %v1138_v35 = vld [vmem:[#allocation2 + $0x2] ss:$4 sm:$0xf] }
 0x122   : > { %v1168_v36 = vld [vmem:[#allocation2 + $0x2] ss:$4 sm:$0xf] }
 0x123   : > { %v1158_v37 = vld [vmem:[#allocation2 + $0x2] ss:$4 sm:$0xf] }
 0x124   : > { %795 = vrot.lane.b32.xlu1 %v793_v57, %s3136_s16  ;;  %v1188_v38 = vld [vmem:[#allocation2 + $0x2] ss:$4 sm:$0xf] }
 0x125   : > { %784 = vrot.lane.b32.xlu0 %v782_v58, %s3118_s17  ;;  %s3140_s17 = smov 28   ;;  %v1178_v39 = vld [vmem:[#allocation2 + $0x2] ss:$4 sm:$0xf] }
 0x126   : > { %v1208_v42 = vld [vmem:[#allocation2 + $0x2] ss:$4 sm:$0xf] }
 0x127   : > { %v1198_v45 = vld [vmem:[#allocation2 + $0x2] ss:$4 sm:$0xf] }
 0x128   : > { %817 = vrot.lane.b32.xlu1 %v815_v60, %s3120_s24  ;;  %s3138_s24 = smov 29   ;;  %v1228_v50 = vld [vmem:[#allocation2 + $0x2] ss:$4 sm:$0xf] }
 0x129   : > { %806 = vrot.lane.b32.xlu0 %v804_v61, %s3134_s19  ;;  %v1218_v53 = vld [vmem:[#allocation2 + $0x2] ss:$4 sm:$0xf] }
 0x12a   : > { %v1248_v58 = vld [vmem:[#allocation2 + $0x2] ss:$4 sm:$0xf] }
 0x12b   : > { %v1238_v61 = vld [vmem:[#allocation2 + $0x2] ss:$4 sm:$0xf] }
 0x12c   : > { %839 = vrot.lane.b32.xlu1 %v837_v2, %s3140_s17 }
 0x12d   : > { %828 = vrot.lane.b32.xlu0 %v826_v3, %s3138_s24 }
 0x130   : > { %865 = vrot.lane.b32.xlu1 %v863_v4, %s2263_s25 }
 0x131   : > { %855 = vrot.lane.b32.xlu0 %v853_v5, %s2264_s29  ;;  %v1268_v5 = vld [vmem:[#allocation2 + $0x2] ss:$4 sm:$0xf] }
 0x134   : > { %885 = vrot.lane.b32.xlu1 %v883_v7, %s3143_s20 }
 0x135   : > { %875 = vrot.lane.b32.xlu0 %v873_v8, %s3142_s23  ;;  %v1258_v8 = vld [vmem:[#allocation2 + $0x2] ss:$4 sm:$0xf] }
 0x138   : > { %905 = vrot.lane.b32.xlu1 %v903_v11, %s3124_s28  ;;  %s3178_s28 = smov 77  }
 0x139   : > { %895 = vrot.lane.b32.xlu0 %v893_v12, %s3122_s30  ;;  %s3177_s30 = smov 76  }
 0x13c   : > { %925 = vrot.lane.b32.xlu1 %v923_v13, %s3128_s5  ;;  %s3180_s5 = smov 56   ;;  %v1288_v13 = vld [vmem:[#allocation2 + $0x2] ss:$4 sm:$0xf] }
 0x13d   : > { %915 = vrot.lane.b32.xlu0 %v913_v14, %s3126_s26  ;;  %s3179_s26 = smov 55  }
 0x140   : > { %945 = vrot.lane.b32.xlu1 %v943_v15, %s3147_s7 }
 0x141   : > { %935 = vrot.lane.b32.xlu0 %v933_v16, %s3146_s8  ;;  %v1278_v16 = vld [vmem:[#allocation2 + $0x2] ss:$4 sm:$0xf] }
 0x144   : > { %965 = vrot.lane.b32.xlu1 %v963_v17, %s3132_s14  ;;  %s3182_s14 = smov 30  }
 0x145   : > { %955 = vrot.lane.b32.xlu0 %v953_v18, %s3130_s27  ;;  %s3181_s27 = smov 52  }
 0x148   : > { %985 = vrot.lane.b32.xlu1 %v983_v19, %s3177_s30 }
 0x149   : > { %975 = vrot.lane.b32.xlu0 %v973_v20, %s3178_s28 }
 0x14c   : > { %1005 = vrot.lane.b32.xlu1 %v1003_v21, %s3179_s26  ;;  %v1308_v21 = vld [vmem:[#allocation2 + $0x2] ss:$4 sm:$0xf] }
 0x14d   : > { %995 = vrot.lane.b32.xlu0 %v993_v22, %s3180_s5 }
 0x150   : > { %1025 = vrot.lane.b32.xlu1 %v1023_v23, %s3144_s3 }
 0x151   : > { %1015 = vrot.lane.b32.xlu0 %v1013_v24, %s3145_s6  ;;  %v1298_v24 = vld [vmem:[#allocation2 + $0x2] ss:$4 sm:$0xf] }
 0x154   : > { %1045 = vrot.lane.b32.xlu1 %v1043_v25, %s3136_s16  ;;  %s3184_s16 = smov 104  }
 0x155   : > { %1035 = vrot.lane.b32.xlu0 %v1033_v26, %s3181_s27 }
 0x158   : > { %1065 = vrot.lane.b32.xlu1 %v1063_v0, %s3182_s14 }
 0x159   : > { %1055 = vrot.lane.b32.xlu0 %v1053_v27, %s3134_s19  ;;  %s3183_s19 = smov 103  }
 0x15c   : > { %1085 = vrot.lane.b32.xlu1 %v1083_v28, %s3140_s17  ;;  %s3186_s17 = smov 102   ;;  %v1328_v28 = vld [vmem:[#allocation2 + $0x2] ss:$4 sm:$0xf] }
 0x15d   : > { %1075 = vrot.lane.b32.xlu0 %v1073_v29, %s3138_s24  ;;  %s3185_s24 = smov 101  }
 0x160   : > { %1110 = vrot.lane.b32.xlu1 %v1108_v30, %s2263_s25 }
 0x161   : > { %1100 = vrot.lane.b32.xlu0 %v1098_v31, %s2264_s29  ;;  %v1318_v31 = vld [vmem:[#allocation2 + $0x2] ss:$4 sm:$0xf] }
 0x164   : > { %1130 = vrot.lane.b32.xlu1 %v1128_v32, %s3143_s20  ;;  %s3188_s20 = smov 79  }
 0x165   : > { %1120 = vrot.lane.b32.xlu0 %v1118_v33, %s3142_s23  ;;  %s3187_s23 = smov 78  }
 0x168   : > { %1150 = vrot.lane.b32.xlu1 %v1148_v34, %s3183_s19 }
 0x169   : > { %1140 = vrot.lane.b32.xlu0 %v1138_v35, %s3184_s16 }
 0x16c   : > { %1170 = vrot.lane.b32.xlu1 %v1168_v36, %s3185_s24  ;;  %v1353_v36 = vld [vmem:[#allocation2 + $0x3] ss:$4 sm:$0xf] }
 0x16d   : > { %1160 = vrot.lane.b32.xlu0 %v1158_v37, %s3186_s17 }
 0x170   : > { %1190 = vrot.lane.b32.xlu1 %v1188_v38, %s3147_s7  ;;  %s3192_s7 = smov 29  }
 0x171   : > { %1180 = vrot.lane.b32.xlu0 %v1178_v39, %s3146_s8  ;;  %s3191_s8 = smov 28   ;;  %v1343_v39 = vld [vmem:[#allocation2 + $0x3] ss:$4 sm:$0xf] }
 0x172   : > { %v598_v40 = vpop.permute.xlu1 %597 }
 0x173   : > { %v587_v41 = vpop.permute.xlu0 %586  ;;  %v599_v43 = vrot.slane %v598_v40, 1 }
 0x174   : > { %v588_v44 = vrot.slane %v587_v41, 1  ;;  %1210 = vrot.lane.b32.xlu1 %v1208_v42, %s3187_s23 }
 0x175   : > { %1200 = vrot.lane.b32.xlu0 %v1198_v45, %s3188_s20  ;;  %v601_v46 = vsel %vm600_vm14, %v598_v40, %v599_v43 }
 0x176   : > { %v590_v47 = vsel %vm589_vm15, %v587_v41, %v588_v44  ;;  %604 = vst.msk [vmem:[#allocation3 + $0x2] ss:$8 sm:$0x7] %vm2663_vm13, %v601_v46  ;;  %v620_v48 = vpop.permute.xlu1 %619  ;;  %v1373_v44 = vld [vmem:[#allocation2 + $0x3] ss:$4 sm:$0xf] }
 0x177   : > { %593 = vst.msk [vmem:[#allocation3 + $0x1] ss:$8 sm:$0x7] %vm2663_vm13, %v590_v47  ;;  %v609_v49 = vpop.permute.xlu0 %608  ;;  %v621_v51 = vrot.slane %v620_v48, 1 }
 0x178   : > { %v610_v52 = vrot.slane %v609_v49, 1  ;;  %1230 = vrot.lane.b32.xlu1 %v1228_v50, %s3177_s30  ;;  %v1363_v47 = vld [vmem:[#allocation2 + $0x3] ss:$4 sm:$0xf] }
 0x179   : > { %1220 = vrot.lane.b32.xlu0 %v1218_v53, %s3178_s28  ;;  %v623_v54 = vsel %vm622_vm0, %v620_v48, %v621_v51 }
 0x17a   : > { %v612_v55 = vsel %vm611_vm1, %v609_v49, %v610_v52  ;;  %626 = vst.msk [vmem:[#allocation3 + $0x4] ss:$8 sm:$0x7] %vm2663_vm13, %v623_v54  ;;  %v642_v56 = vpop.permute.xlu1 %641  ;;  %v1393_v52 = vld [vmem:[#allocation2 + $0x3] ss:$4 sm:$0xf] }
 0x17b   : > { %615 = vst.msk [vmem:[#allocation3 + $0x3] ss:$8 sm:$0x7] %vm2663_vm13, %v612_v55  ;;  %v631_v57 = vpop.permute.xlu0 %630  ;;  %v643_v59 = vrot.slane %v642_v56, 1 }
 0x17c   : > { %v632_v60 = vrot.slane %v631_v57, 1  ;;  %1250 = vrot.lane.b32.xlu1 %v1248_v58, %s3179_s26  ;;  %v1383_v55 = vld [vmem:[#allocation2 + $0x3] ss:$4 sm:$0xf] }
 0x17d   : > { %1240 = vrot.lane.b32.xlu0 %v1238_v61, %s3180_s5  ;;  %v645_v1 = vsel %vm644_vm2, %v642_v56, %v643_v59 }
 0x17e   : > { %v634_v2 = vsel %vm633_vm5, %v631_v57, %v632_v60  ;;  %648 = vst.msk [vmem:[#allocation3 + $0x6] ss:$8 sm:$0x7] %vm2663_vm13, %v645_v1  ;;  %v664_v3 = vpop.permute.xlu1 %663 }
 0x17f   : > { %637 = vst.msk [vmem:[#allocation3 + $0x5] ss:$8 sm:$0x7] %vm2663_vm13, %v634_v2  ;;  %v653_v4 = vpop.permute.xlu0 %652  ;;  %v665_v6 = vrot.slane %v664_v3, 1 }
 0x180   : > { %v654_v7 = vrot.slane %v653_v4, 1  ;;  %1270 = vrot.lane.b32.xlu1 %v1268_v5, %s3144_s3  ;;  %s3189_s3 = smov 32   ;;  %v1413_v5 = vld [vmem:[#allocation2 + $0x3] ss:$4 sm:$0xf] }
 0x181   : > { %1260 = vrot.lane.b32.xlu0 %v1258_v8, %s3145_s6  ;;  %v667_v9 = vsel %vm3161_vm6, %v664_v3, %v665_v6  ;;  %s3190_s6 = smov 31  }
 0x182   : > { %v656_v10 = vsel %vm3160_vm4, %v653_v4, %v654_v7  ;;  %670 = vst.msk [vmem:[#allocation3 + $0x18] ss:$8 sm:$0x7] %vm2663_vm13, %v667_v9  ;;  %v686_v11 = vpop.permute.xlu1 %685 }
 0x183   : > { %659 = vst.msk [vmem:[#allocation3 + $0x7] ss:$8 sm:$0x7] %vm2663_vm13, %v656_v10  ;;  %v675_v12 = vpop.permute.xlu0 %674  ;;  %v687_v14 = vrot.slane %v686_v11, 1 }
 0x184   : > { %v676_v15 = vrot.slane %v675_v12, 1  ;;  %1290 = vrot.lane.b32.xlu1 %v1288_v13, %s3189_s3 }
 0x185   : > { %1280 = vrot.lane.b32.xlu0 %v1278_v16, %s3181_s27  ;;  %v689_v17 = vsel %vm3159_vm7, %v686_v11, %v687_v14  ;;  %v1403_v11 = vld [vmem:[#allocation2 + $0x3] ss:$4 sm:$0xf] }
 0x186   : > { %v678_v18 = vsel %vm3157_vm8, %v675_v12, %v676_v15  ;;  %692 = vst.msk [vmem:[#allocation3 + $0x1a] ss:$8 sm:$0x7] %vm2663_vm13, %v689_v17  ;;  %v708_v19 = vpop.permute.xlu1 %707  ;;  %v1433_v16 = vld [vmem:[#allocation2 + $0x3] ss:$4 sm:$0xf] }
 0x187   : > { %681 = vst.msk [vmem:[#allocation3 + $0x19] ss:$8 sm:$0x7] %vm2663_vm13, %v678_v18  ;;  %v697_v20 = vpop.permute.xlu0 %696  ;;  %v709_v22 = vrot.slane %v708_v19, 1 }
 0x188   : > { %v698_v23 = vrot.slane %v697_v20, 1  ;;  %1310 = vrot.lane.b32.xlu1 %v1308_v21, %s3182_s14 }
 0x189   : > { %1300 = vrot.lane.b32.xlu0 %v1298_v24, %s3190_s6  ;;  %v711_v25 = vsel %vm3158_vm9, %v708_v19, %v709_v22  ;;  %v1423_v19 = vld [vmem:[#allocation2 + $0x3] ss:$4 sm:$0xf] }
 0x18a   : > { %v700_v26 = vsel %vm3148_vm10, %v697_v20, %v698_v23  ;;  %714 = vst.msk [vmem:[#allocation3 + $0x1c] ss:$8 sm:$0x7] %vm2663_vm13, %v711_v25  ;;  %v730_v0 = vpop.permute.xlu1 %729  ;;  %vm3151_vm10 = vcmask 457728   ;;  %v1597_v56 = vld [vmem:[#allocation3 + $0x8] sm:$0xff]  ;;  %v1598_v57 = vld [vmem:[#allocation3 + $0x10] sm:$0xff] }
 0x18b   : > { %703 = vst.msk [vmem:[#allocation3 + $0x1b] ss:$8 sm:$0x7] %vm2663_vm13, %v700_v26  ;;  %v719_v27 = vpop.permute.xlu0 %718  ;;  %v731_v29 = vrot.slane %v730_v0, 1  ;;  %v1596_v58 = vld [vmem:[#allocation3] sm:$0xff] }
 0x18c   : > { %v720_v30 = vrot.slane %v719_v27, 1  ;;  %1330 = vrot.lane.b32.xlu1 %v1328_v28, %s3191_s8  ;;  %v1453_v24 = vld [vmem:[#allocation2 + $0x3] ss:$4 sm:$0xf] }
 0x18d   : > { %1320 = vrot.lane.b32.xlu0 %v1318_v31, %s3192_s7  ;;  %v733_v32 = vsel %vm3150_vm11, %v730_v0, %v731_v29  ;;  %vm3153_vm11 = vcmask 441344   ;;  %v1443_v0 = vld [vmem:[#allocation2 + $0x3] ss:$4 sm:$0xf] }
 0x18e   : > { %v722_v33 = vsel %vm3149_vm12, %v719_v27, %v720_v30  ;;  %736 = vst.msk [vmem:[#allocation3 + $0x1e] ss:$8 sm:$0x7] %vm2663_vm13, %v733_v32  ;;  %v752_v34 = vpop.permute.xlu1 %751  ;;  %vm3154_vm12 = vcmask 433152  }
 0x18f   : > { %725 = vst.msk [vmem:[#allocation3 + $0x1d] ss:$8 sm:$0x7] %vm2663_vm13, %v722_v33  ;;  %v741_v35 = vpop.permute.xlu0 %740  ;;  %v753_v37 = vrot.slane %v752_v34, 1 }
 0x190   : > { %v742_v38 = vrot.slane %v741_v35, 1  ;;  %1355 = vrot.lane.b32.xlu1 %v1353_v36, %s2263_s25  ;;  %s3193_s25 = smov 124   ;;  %v1473_v31 = vld [vmem:[#allocation2 + $0x3] ss:$4 sm:$0xf] }
 0x191   : > { %1345 = vrot.lane.b32.xlu0 %v1343_v39, %s2264_s29  ;;  %v755_v40 = vsel %vm3152_vm3, %v752_v34, %v753_v37  ;;  %s3194_s29 = smov 125   ;;  %vm3155_vm3 = vcmask 424960   ;;  %v1463_v34 = vld [vmem:[#allocation2 + $0x3] ss:$4 sm:$0xf] }
 0x192   : > { %v744_v41 = vsel %vm3151_vm10, %v741_v35, %v742_v38  ;;  %758 = vst.msk [vmem:[#allocation3 + $0x30] ss:$8 sm:$0x7] %vm2663_vm13, %v755_v40  ;;  %v774_v42 = vpop.permute.xlu1 %773  ;;  %vm3156_vm10 = vcmask 261120  }
 0x193   : > { %747 = vst.msk [vmem:[#allocation3 + $0x1f] ss:$8 sm:$0x7] %vm2663_vm13, %v744_v41  ;;  %v763_v43 = vpop.permute.xlu0 %762  ;;  %v775_v45 = vrot.slane %v774_v42, 1 }
 0x194   : > { %v764_v46 = vrot.slane %v763_v43, 1  ;;  %1375 = vrot.lane.b32.xlu1 %v1373_v44, %s3193_s25  ;;  %v1493_v39 = vld [vmem:[#allocation2 + $0x3] ss:$4 sm:$0xf] }
 0x195   : > { %1365 = vrot.lane.b32.xlu0 %v1363_v47, %s3194_s29  ;;  %v777_v48 = vsel %vm3154_vm12, %v774_v42, %v775_v45  ;;  %vm809_vm12 = vcmask 252928   ;;  %v1483_v42 = vld [vmem:[#allocation2 + $0x3] ss:$4 sm:$0xf] }
 0x196   : > { %v766_v49 = vsel %vm3153_vm11, %v763_v43, %v764_v46  ;;  %780 = vst.msk [vmem:[#allocation3 + $0x32] ss:$8 sm:$0x7] %vm2663_vm13, %v777_v48  ;;  %v796_v50 = vpop.permute.xlu1 %795  ;;  %vm820_vm11 = vcmask 244736  }
 0x197   : > { %769 = vst.msk [vmem:[#allocation3 + $0x31] ss:$8 sm:$0x7] %vm2663_vm13, %v766_v49  ;;  %v785_v51 = vpop.permute.xlu0 %784  ;;  %v797_v53 = vrot.slane %v796_v50, 1 }
 0x198   : > { %v786_v54 = vrot.slane %v785_v51, 1  ;;  %1395 = vrot.lane.b32.xlu1 %v1393_v52, %s3183_s19  ;;  %v1513_v47 = vld [vmem:[#allocation2 + $0x3] ss:$4 sm:$0xf] }
 0x199   : > { %1385 = vrot.lane.b32.xlu0 %v1383_v55, %s3184_s16  ;;  %v799_v59 = vsel %vm3156_vm10, %v796_v50, %v797_v53  ;;  %vm831_vm10 = vcmask 236544   ;;  %s3195_s16 = smov 80   ;;  %v1503_v50 = vld [vmem:[#allocation2 + $0x3] ss:$4 sm:$0xf] }
 0x19a   : > { %v788_v60 = vsel %vm3155_vm3, %v785_v51, %v786_v54  ;;  %v1600_v61 = vld [vmem:[#allocation3 + $0x20] sm:$0xff]  ;;  %v1601_v1 = vld [vmem:[#allocation3 + $0x28] sm:$0xff]  ;;  %v1599_v2 = vld [vmem:[#allocation3 + $0x18] sm:$0xff]  ;;  %802 = vst.msk [vmem:[#allocation3 + $0x34] ss:$8 sm:$0x7] %vm2663_vm13, %v799_v59  ;;  %v818_v3 = vpop.permute.xlu1 %817 }
 0x19b   : > { %791 = vst.msk [vmem:[#allocation3 + $0x33] ss:$8 sm:$0x7] %vm2663_vm13, %v788_v60  ;;  %v807_v4 = vpop.permute.xlu0 %806  ;;  %v1951_v6 = vpack.c.bf16 %v1600_v61, %v1597_v56  ;;  %v1984_v7 = vpack.c.bf16 %v1601_v1, %v1598_v57  ;;  %v1953_v8 = vpack.c.bf16 %v1599_v2, %v1596_v58  ;;  %v819_v9 = vrot.slane %v818_v3, 1 }
 0x19c   : > { %v808_v10 = vrot.slane %v807_v4, 1  ;;  %1415 = vrot.lane.b32.xlu1 %v1413_v5, %s3185_s24  ;;  %vm842_vm3 = vcmask 228352   ;;  %v1533_v55 = vld [vmem:[#allocation2 + $0x3] ss:$4 sm:$0xf] }
 0x19d   : > { %1405 = vrot.lane.b32.xlu0 %v1403_v11, %s3186_s17  ;;  %v821_v12 = vsel %vm820_vm11, %v818_v3, %v819_v9  ;;  %1952 = vmatprep.subr.bf16.mxu0 %v1951_v6  ;;  %s3196_s17 = smov 100   ;;  %v1523_v58 = vld [vmem:[#allocation2 + $0x3] ss:$4 sm:$0xf] }
 0x19e   : > { %v810_v13 = vsel %vm809_vm12, %v807_v4, %v808_v10  ;;  %1985 = vmatpush3.bf16.msra.mxu1 %v1984_v7  ;;  %824 = vst.msk [vmem:[#allocation3 + $0x36] ss:$8 sm:$0x7] %vm2663_vm13, %v821_v12  ;;  %1954 = vmatpush1.bf16.msra.mxu0 %v1953_v8  ;;  %v840_v14 = vpop.permute.xlu1 %839  ;;  %v1553_v8 = vld [vmem:[#allocation2 + $0x3] ss:$4 sm:$0xf] }
 0x19f   : > { %813 = vst.msk [vmem:[#allocation3 + $0x35] ss:$8 sm:$0x7] %vm2663_vm13, %v810_v13  ;;  %v829_v15 = vpop.permute.xlu0 %828  ;;  %1986 = vmatprep.subr.bf16.mxu1 %v2285_v63  ;;  %v841_v17 = vrot.slane %v840_v14, 1 }
 0x1a0   : > { %v830_v18 = vrot.slane %v829_v15, 1  ;;  %1435 = vrot.lane.b32.xlu1 %v1433_v16, %s3195_s16 }
 0x1a1   : > { %1425 = vrot.lane.b32.xlu0 %v1423_v19, %s3196_s17  ;;  %v843_v20 = vsel %vm842_vm3, %v840_v14, %v841_v17  ;;  %v1543_v14 = vld [vmem:[#allocation2 + $0x3] ss:$4 sm:$0xf] }
 0x1a2   : > { %v832_v21 = vsel %vm831_vm10, %v829_v15, %v830_v18  ;;  %846 = vst.msk [vmem:[#allocation3 + $0x48] ss:$8 sm:$0x7] %vm2663_vm13, %v843_v20  ;;  %v866_v22 = vpop.permute.xlu1 %865  ;;  %v1573_v19 = vld [vmem:[#allocation2 + $0x3] ss:$4 sm:$0xf] }
 0x1a3   : > { %835 = vst.msk [vmem:[#allocation3 + $0x37] ss:$8 sm:$0x7] %vm2663_vm13, %v832_v21  ;;  %v856_v23 = vpop.permute.xlu0 %855  ;;  %v867_v25 = vrot.slane %v866_v22, 1 }
 0x1a4   : > { %v857_v26 = vrot.slane %v856_v23, 1  ;;  %1455 = vrot.lane.b32.xlu1 %v1453_v24, %s3187_s23  ;;  %s3198_s23 = smov 54  }
 0x1a5   : > { %1445 = vrot.lane.b32.xlu0 %v1443_v0, %s3188_s20  ;;  %v868_v27 = vsel %vm600_vm14, %v866_v22, %v867_v25  ;;  %s3197_s20 = smov 53   ;;  %v1563_v22 = vld [vmem:[#allocation2 + $0x3] ss:$4 sm:$0xf] }
 0x1a6   : > { %v858_v28 = vsel %vm589_vm15, %v856_v23, %v857_v26  ;;  %871 = vst.msk [vmem:[#allocation3 + $0x4b] ss:$8 sm:$0x7] %vm2663_vm13, %v868_v27  ;;  %v886_v29 = vpop.permute.xlu1 %885 }
 0x1a7   : > { %861 = vst.msk [vmem:[#allocation3 + $0x4a] ss:$8 sm:$0x7] %vm2663_vm13, %v858_v28  ;;  %v876_v30 = vpop.permute.xlu0 %875  ;;  %v887_v32 = vrot.slane %v886_v29, 1 }
 0x1a8   : > { %v877_v33 = vrot.slane %v876_v30, 1  ;;  %1475 = vrot.lane.b32.xlu1 %v1473_v31, %s3177_s30 }
 0x1a9   : > { %1465 = vrot.lane.b32.xlu0 %v1463_v34, %s3178_s28  ;;  %v888_v35 = vsel %vm622_vm0, %v886_v29, %v887_v32  ;;  %v2872_v32 = vld [vmem:[#allocation3 + $0x138] sm:$0xff]  ;;  %s2007_s28 = smul.u32 24, %s2445_s4 }
 0x1aa   : > { %v878_v36 = vsel %vm611_vm1, %v876_v30, %v877_v33  ;;  %891 = vst.msk [vmem:[#allocation3 + $0x4d] ss:$8 sm:$0x7] %vm2663_vm13, %v888_v35  ;;  %v906_v37 = vpop.permute.xlu1 %905  ;;  %v1603_v59 = vld [vmem:[#allocation3 + $0x38] sm:$0xff]  ;;  %v1604_v60 = vld [vmem:[#allocation3 + $0x40] sm:$0xff]  ;;  %v1602_v61 = vld [vmem:[#allocation3 + $0x30] sm:$0xff] }
 0x1ab   : > { %881 = vst.msk [vmem:[#allocation3 + $0x4c] ss:$8 sm:$0x7] %vm2663_vm13, %v878_v36  ;;  %v896_v38 = vpop.permute.xlu0 %895  ;;  %v907_v40 = vrot.slane %v906_v37, 1  ;;  %s174_s30 = scalar_lea.vmem [#allocation9], %s2007_s28 }
 0x1ac   : > { %v897_v41 = vrot.slane %v896_v38, 1  ;;  %1495 = vrot.lane.b32.xlu1 %v1493_v39, %s3179_s26  ;;  %s2008_s26 = smul.u32 384, %s2326_s13  ;;  %s2289_s13 = smov [#allocation9]  }
 0x1ad   : > { %1485 = vrot.lane.b32.xlu0 %v1483_v42, %s3180_s5  ;;  %v908_v43 = vsel %vm644_vm2, %v906_v37, %v907_v40  ;;  %s1803_s5 = sshll.u32 %s174_s30, 4  ;;  %s2174_s24 = sshll.u32 %s2289_s13, 4  ;;  %s3055_s5 = int_to_ptr.vmem [resolvable:$true] %s1803_s5  ;;  %s2175_s24 = int_to_ptr.vmem [resolvable:$false] %s2174_s24 }
 0x1ae   : > { %v898_v44 = vsel %vm633_vm5, %v896_v38, %v897_v41  ;;  %911 = vst.msk [vmem:[#allocation3 + $0x4f] ss:$8 sm:$0x7] %vm2663_vm13, %v908_v43  ;;  %v926_v45 = vpop.permute.xlu1 %925  ;;  %s2170_s19 = scalar_lea.vmem %s3055_s5, 384  ;;  %p2177_p5 = scmp.lt.s32.totalorder %s3055_s5, %s2175_s24 }
 0x1af   : > { %901 = vst.msk [vmem:[#allocation3 + $0x4e] ss:$8 sm:$0x7] %vm2663_vm13, %v898_v44  ;;  %v916_v46 = vpop.permute.xlu0 %915  ;;  %v927_v48 = vrot.slane %v926_v45, 1  ;;  %p2171_p9 = scmp.ne.s32.totalorder %s3055_s5, %s2170_s19 }
 0x1b0   : > { %v917_v49 = vrot.slane %v916_v46, 1  ;;  %1515 = vrot.lane.b32.xlu1 %v1513_v47, %s3197_s20 }
 0x1b1   : > { %1505 = vrot.lane.b32.xlu0 %v1503_v50, %s3198_s23  ;;  %v928_v51 = vsel %vm3161_vm6, %v926_v45, %v927_v48  ;;  %vm3207_vm6 = vcmask 424960   ;;  %p2172_p2 = pnand %p2171_p9, %p3236_p10 }
 0x1b2   : > { %v918_v52 = vsel %vm3160_vm4, %v916_v46, %v917_v49  ;;  %931 = vst.msk [vmem:[#allocation3 + $0x61] ss:$8 sm:$0x7] %vm2663_vm13, %v928_v51  ;;  %v946_v53 = vpop.permute.xlu1 %945  ;;  %vm3203_vm4 = vcmask 457728  }
 0x1b3   : > { %921 = vst.msk [vmem:[#allocation3 + $0x60] ss:$8 sm:$0x7] %vm2663_vm13, %v918_v52  ;;  %v936_v54 = vpop.permute.xlu0 %935  ;;  %v947_v56 = vrot.slane %v946_v53, 1  ;;  %p2173_p4 = pneg %p2172_p2 }
 0x1b4   : > { %v937_v57 = vrot.slane %v936_v54, 1  ;;  %1535 = vrot.lane.b32.xlu1 %v1533_v55, %s3189_s3  ;;  %s2176_s3 = scalar_lea.vmem %s2175_s24, 768 }
 0x1b5   : > { %1525 = vrot.lane.b32.xlu0 %v1523_v58, %s3181_s27  ;;  %v948_v1 = vsel %vm3159_vm7, %v946_v53, %v947_v56  ;;  %vm3202_vm7 = vcmask 449536   ;;  %s1789_s27 = scalar_lea.sflag [#allocation6], %s2445_s4  ;;  %p2178_p0 = scmp.lt.s32.totalorder %s2176_s3, %s2170_s19 }
 0x1b6   : > { %v938_v2 = vsel %vm3157_vm8, %v936_v54, %v937_v57  ;;  %v1606_v3 = vld [vmem:[#allocation3 + $0x50] sm:$0xff]  ;;  %v1607_v4 = vld [vmem:[#allocation3 + $0x58] sm:$0xff]  ;;  %v1605_v5 = vld [vmem:[#allocation3 + $0x48] sm:$0xff]  ;;  %951 = vst.msk [vmem:[#allocation3 + $0x63] ss:$8 sm:$0x7] %vm2663_vm13, %v948_v1  ;;  %v966_v6 = vpop.permute.xlu1 %965 }
 0x1b7   : > { %941 = vst.msk [vmem:[#allocation3 + $0x62] ss:$8 sm:$0x7] %vm2663_vm13, %v938_v2  ;;  %v956_v7 = vpop.permute.xlu0 %955  ;;  %v1955_v9 = vpack.c.bf16 %v1606_v3, %v1603_v59  ;;  %v1987_v10 = vpack.c.bf16 %v1607_v4, %v1604_v60  ;;  %v1957_v11 = vpack.c.bf16 %v1605_v5, %v1602_v61  ;;  %v967_v12 = vrot.slane %v966_v6, 1  ;;  %p2179_p6 = por %p2178_p0, %p2177_p5 }
 0x1b8   : > { %v957_v13 = vrot.slane %v956_v7, 1  ;;  %1555 = vrot.lane.b32.xlu1 %v1553_v8, %s3182_s14  ;;  %vm3199_vm8 = vcmask 646144   ;;  %s3060_s14 = scalar_lea.hbm %s3104_s2, %s2008_s26 }
 0x1b9   : > { %1545 = vrot.lane.b32.xlu0 %v1543_v14, %s3190_s6  ;;  %v968_v15 = vsel %vm3158_vm9, %v966_v6, %v967_v12  ;;  %1956 = vmatprep.subr.bf16.mxu0 %v1955_v9  ;;  %vm3201_vm9 = vcmask 629760   ;;  %p2180_p13 = pnand %p2179_p6, %p2173_p4 }
 0x1ba   : > { %v958_v16 = vsel %vm3199_vm8, %v956_v7, %v957_v13  ;;  %1988 = vmatpush3.bf16.msra.mxu1 %v1987_v10  ;;  %971 = vst.msk [vmem:[#allocation3 + $0x65] ss:$8 sm:$0x7] %vm2663_vm13, %v968_v15  ;;  %1958 = vmatpush1.bf16.msra.mxu0 %v1957_v11  ;;  %v986_v17 = vpop.permute.xlu1 %985  ;;  %vm3200_vm8 = vcmask 621568  }
 0x1bb   : > { %961 = vst.msk [vmem:[#allocation3 + $0x64] ss:$8 sm:$0x7] %vm2663_vm13, %v958_v16  ;;  %v976_v18 = vpop.permute.xlu0 %975  ;;  %1989 = vmatprep.subr.bf16.mxu1 %v2285_v63  ;;  %v987_v20 = vrot.slane %v986_v17, 1 }
 0x1bc   : > { %v977_v21 = vrot.slane %v976_v18, 1  ;;  %1575 = vrot.lane.b32.xlu1 %v1573_v19, %s3191_s8 }
 0x1bd   : > { %1565 = vrot.lane.b32.xlu0 %v1563_v22, %s3192_s7  ;;  %v988_v23 = vsel %vm3200_vm8, %v986_v17, %v987_v20  ;;  %vm3204_vm8 = vcmask 433152  }
 0x1be   : > { %v978_v24 = vsel %vm3201_vm9, %v976_v18, %v977_v21  ;;  %991 = vst.msk [vmem:[#allocation3 + $0x67] ss:$8 sm:$0x7] %vm2663_vm13, %v988_v23  ;;  %v1006_v25 = vpop.permute.xlu1 %1005  ;;  %vm2288_vm9 = vmmov 0  }
 0x1bf   : > { %981 = vst.msk [vmem:[#allocation3 + $0x66] ss:$8 sm:$0x7] %vm2663_vm13, %v978_v24  ;;  %v996_v26 = vpop.permute.xlu0 %995  ;;  %v1007_v0 = vrot.slane %v1006_v25, 1  ;;  %1948 = vmatprep.mubr.msk.f32.mxu1 %vm2288_vm9, %v2872_v32  ;;  %vm3209_vm9 = vcmask 834560  }
 0x1c0   : > { %v997_v27 = vrot.slane %v996_v26, 1 }
 0x1c1   : > { %v1008_v28 = vsel %vm3202_vm7, %v1006_v25, %v1007_v0  ;;  %vm3205_vm7 = vcmask 441344  }
 0x1c2   : > { %v998_v29 = vsel %vm3203_vm4, %v996_v26, %v997_v27  ;;  %1011 = vst.msk [vmem:[#allocation3 + $0x79] ss:$8 sm:$0x7] %vm2663_vm13, %v1008_v28  ;;  %v1026_v30 = vpop.permute.xlu1 %1025  ;;  %vm3206_vm4 = vcmask 261120  }
 0x1c3   : > { %1001 = vst.msk [vmem:[#allocation3 + $0x78] ss:$8 sm:$0x7] %vm2663_vm13, %v998_v29  ;;  %v1016_v31 = vpop.permute.xlu0 %1015  ;;  %v1027_v33 = vrot.slane %v1026_v30, 1 }
 0x1c4   : > { %v1017_v34 = vrot.slane %v1016_v31, 1 }
 0x1c5   : > { %v1028_v35 = vsel %vm3204_vm8, %v1026_v30, %v1027_v33  ;;  %vm3210_vm8 = vcmask 654336  }
 0x1c6   : > { %v1018_v36 = vsel %vm3205_vm7, %v1016_v31, %v1017_v34  ;;  %1031 = vst.msk [vmem:[#allocation3 + $0x7b] ss:$8 sm:$0x7] %vm2663_vm13, %v1028_v35  ;;  %v1046_v37 = vpop.permute.xlu1 %1045  ;;  %v1609_v59 = vld [vmem:[#allocation3 + $0x68] sm:$0xff]  ;;  %v1610_v60 = vld [vmem:[#allocation3 + $0x70] sm:$0xff]  ;;  %v1608_v61 = vld [vmem:[#allocation3 + $0x60] sm:$0xff] }
 0x1c7   : > { %1021 = vst.msk [vmem:[#allocation3 + $0x7a] ss:$8 sm:$0x7] %vm2663_vm13, %v1018_v36  ;;  %v1036_v38 = vpop.permute.xlu0 %1035  ;;  %v1047_v39 = vrot.slane %v1046_v37, 1  ;;  %vm3211_vm7 = vcmask 818176  }
 0x1c8   : > { %v1037_v40 = vrot.slane %v1036_v38, 1 }
 0x1c9   : > { %v1048_v41 = vsel %vm3206_vm4, %v1046_v37, %v1047_v39  ;;  %vm3212_vm4 = vcmask 637952  }
 0x1ca   : > { %v1038_v42 = vsel %vm3207_vm6, %v1036_v38, %v1037_v40  ;;  %1051 = vst.msk [vmem:[#allocation3 + $0x7d] ss:$8 sm:$0x7] %vm2663_vm13, %v1048_v41  ;;  %v1066_v43 = vpop.permute.xlu1 %1065  ;;  %vm3208_vm6 = vcmask 826368  }
 0x1cb   : > { %1041 = vst.msk [vmem:[#allocation3 + $0x7c] ss:$8 sm:$0x7] %vm2663_vm13, %v1038_v42  ;;  %v1056_v44 = vpop.permute.xlu0 %1055  ;;  %v1067_v45 = vrot.slane %v1066_v43, 1 }
 0x1cc   : > { %v1057_v46 = vrot.slane %v1056_v44, 1 }
 0x1cd   : > { %v1068_v47 = vsel %vm820_vm11, %v1066_v43, %v1067_v45 }
 0x1ce   : > { %v1058_v48 = vsel %vm809_vm12, %v1056_v44, %v1057_v46  ;;  %1071 = vst.msk [vmem:[#allocation3 + $0x7f] ss:$8 sm:$0x7] %vm2663_vm13, %v1068_v47  ;;  %v1086_v49 = vpop.permute.xlu1 %1085 }
 0x1cf   : > { %1061 = vst.msk [vmem:[#allocation3 + $0x7e] ss:$8 sm:$0x7] %vm2663_vm13, %v1058_v48  ;;  %v1076_v50 = vpop.permute.xlu0 %1075  ;;  %v1087_v51 = vrot.slane %v1086_v49, 1 }
 0x1d0   : > { %v1077_v52 = vrot.slane %v1076_v50, 1 }
 0x1d1   : > { %v1088_v53 = vsel %vm842_vm3, %v1086_v49, %v1087_v51 }
 0x1d2   : > { %v1078_v54 = vsel %vm831_vm10, %v1076_v50, %v1077_v52  ;;  %1091 = vst.msk [vmem:[#allocation3 + $0x91] ss:$8 sm:$0x7] %vm2663_vm13, %v1088_v53  ;;  %v1111_v55 = vpop.permute.xlu1 %1110 }
 0x1d3   : > { %1081 = vst.msk [vmem:[#allocation3 + $0x90] ss:$8 sm:$0x7] %vm2663_vm13, %v1078_v54  ;;  %v1101_v56 = vpop.permute.xlu0 %1100  ;;  %v1112_v57 = vrot.slane %v1111_v55, 1 }
 0x1d4   : > { %v1102_v58 = vrot.slane %v1101_v56, 1 }
 0x1d5   : > { %v1113_v1 = vsel %vm600_vm14, %v1111_v55, %v1112_v57 }
 0x1d6   : > { %v1103_v2 = vsel %vm589_vm15, %v1101_v56, %v1102_v58  ;;  %v1612_v3 = vld [vmem:[#allocation3 + $0x80] sm:$0xff]  ;;  %v1613_v4 = vld [vmem:[#allocation3 + $0x88] sm:$0xff]  ;;  %v1611_v5 = vld [vmem:[#allocation3 + $0x78] sm:$0xff]  ;;  %1116 = vst.msk [vmem:[#allocation3 + $0x94] ss:$8 sm:$0x7] %vm2663_vm13, %v1113_v1  ;;  %v1131_v6 = vpop.permute.xlu1 %1130 }
 0x1d7   : > { %1106 = vst.msk [vmem:[#allocation3 + $0x93] ss:$8 sm:$0x7] %vm2663_vm13, %v1103_v2  ;;  %v1121_v7 = vpop.permute.xlu0 %1120  ;;  %v1959_v8 = vpack.c.bf16 %v1612_v3, %v1609_v59  ;;  %v1990_v9 = vpack.c.bf16 %v1613_v4, %v1610_v60  ;;  %v1961_v10 = vpack.c.bf16 %v1611_v5, %v1608_v61  ;;  %v1132_v11 = vrot.slane %v1131_v6, 1 }
 0x1d8   : > { %v1122_v12 = vrot.slane %v1121_v7, 1 }
 0x1d9   : > { %1960 = vmatprep.subr.bf16.mxu0 %v1959_v8  ;;  %1991 = vmatpush3.bf16.msra.mxu1 %v1990_v9  ;;  %v1133_v13 = vsel %vm622_vm0, %v1131_v6, %v1132_v11 }
 0x1da   : > { %v1123_v14 = vsel %vm611_vm1, %v1121_v7, %v1122_v12  ;;  %1962 = vmatpush1.bf16.msra.mxu0 %v1961_v10  ;;  %1992 = vmatprep.subr.bf16.mxu1 %v2285_v63  ;;  %1136 = vst.msk [vmem:[#allocation3 + $0x96] ss:$8 sm:$0x7] %vm2663_vm13, %v1133_v13  ;;  %v1151_v15 = vpop.permute.xlu1 %1150 }
 0x1db   : > { %1126 = vst.msk [vmem:[#allocation3 + $0x95] ss:$8 sm:$0x7] %vm2663_vm13, %v1123_v14  ;;  %v1141_v16 = vpop.permute.xlu0 %1140  ;;  %v1152_v17 = vrot.slane %v1151_v15, 1 }
 0x1dc   : > { %v1142_v18 = vrot.slane %v1141_v16, 1 }
 0x1dd   : > { %v1153_v19 = vsel %vm644_vm2, %v1151_v15, %v1152_v17 }
 0x1de   : > { %v1143_v20 = vsel %vm633_vm5, %v1141_v16, %v1142_v18  ;;  %1156 = vst.msk [vmem:[#allocation3 + $0xa8] ss:$8 sm:$0x7] %vm2663_vm13, %v1153_v19  ;;  %v1171_v21 = vpop.permute.xlu1 %1170 }
 0x1df   : > { %1146 = vst.msk [vmem:[#allocation3 + $0x97] ss:$8 sm:$0x7] %vm2663_vm13, %v1143_v20  ;;  %v1161_v22 = vpop.permute.xlu0 %1160  ;;  %v1172_v23 = vrot.slane %v1171_v21, 1 }
 0x1e0   : > { %v1162_v24 = vrot.slane %v1161_v22, 1 }
 0x1e1   : > { %v1173_v25 = vsel %vm3208_vm6, %v1171_v21, %v1172_v23  ;;  %vm3213_vm6 = vcmask 646144  }
 0x1e2   : > { %v1163_v26 = vsel %vm3209_vm9, %v1161_v22, %v1162_v24  ;;  %1176 = vst.msk [vmem:[#allocation3 + $0xaa] ss:$8 sm:$0x7] %vm2663_vm13, %v1173_v25  ;;  %v1191_v0 = vpop.permute.xlu1 %1190  ;;  %vm3214_vm9 = vcmask 621568  }
 0x1e3   : > { %1166 = vst.msk [vmem:[#allocation3 + $0xa9] ss:$8 sm:$0x7] %vm2663_vm13, %v1163_v26  ;;  %v1181_v27 = vpop.permute.xlu0 %1180  ;;  %v1192_v28 = vrot.slane %v1191_v0, 1 }
 0x1e4   : > { %v1182_v29 = vrot.slane %v1181_v27, 1 }
 0x1e5   : > { %v1193_v30 = vsel %vm3210_vm8, %v1191_v0, %v1192_v28  ;;  %vm3215_vm8 = vcmask 629760  }
 0x1e6   : > { %v1183_v31 = vsel %vm3211_vm7, %v1181_v27, %v1182_v29  ;;  %1196 = vst.msk [vmem:[#allocation3 + $0xac] ss:$8 sm:$0x7] %vm2663_vm13, %v1193_v30  ;;  %v1211_v33 = vpop.permute.xlu1 %1210  ;;  %vm3216_vm7 = vcmask 449536   ;;  %v1615_v55 = vld [vmem:[#allocation3 + $0x98] sm:$0xff]  ;;  %v1616_v56 = vld [vmem:[#allocation3 + $0xa0] sm:$0xff] }
 0x1e7   : > { %1186 = vst.msk [vmem:[#allocation3 + $0xab] ss:$8 sm:$0x7] %vm2663_vm13, %v1183_v31  ;;  %v1201_v34 = vpop.permute.xlu0 %1200  ;;  %v1212_v35 = vrot.slane %v1211_v33, 1  ;;  %v1614_v57 = vld [vmem:[#allocation3 + $0x90] sm:$0xff] }
 0x1e8   : > { %v1202_v36 = vrot.slane %v1201_v34, 1 }
 0x1e9   : > { %v1213_v37 = vsel %vm3212_vm4, %v1211_v33, %v1212_v35  ;;  %vm3217_vm4 = vcmask 457728  }
 0x1ea   : > { %v1203_v38 = vsel %vm3213_vm6, %v1201_v34, %v1202_v36  ;;  %1216 = vst.msk [vmem:[#allocation3 + $0xae] ss:$8 sm:$0x7] %vm2663_vm13, %v1213_v37  ;;  %v1231_v39 = vpop.permute.xlu1 %1230  ;;  %vm3218_vm6 = vcmask 433152  }
 0x1eb   : > { %1206 = vst.msk [vmem:[#allocation3 + $0xad] ss:$8 sm:$0x7] %vm2663_vm13, %v1203_v38  ;;  %v1221_v40 = vpop.permute.xlu0 %1220  ;;  %v1232_v41 = vrot.slane %v1231_v39, 1 }
 0x1ec   : > { %v1222_v42 = vrot.slane %v1221_v40, 1 }
 0x1ed   : > { %v1233_v43 = vsel %vm3214_vm9, %v1231_v39, %v1232_v41  ;;  %vm3219_vm9 = vcmask 441344  }
 0x1ee   : > { %v1223_v44 = vsel %vm3215_vm8, %v1221_v40, %v1222_v42  ;;  %1236 = vst.msk [vmem:[#allocation3 + $0xc0] ss:$8 sm:$0x7] %vm2663_vm13, %v1233_v43  ;;  %v1251_v45 = vpop.permute.xlu1 %1250  ;;  %vm3220_vm8 = vcmask 261120  }
 0x1ef   : > { %1226 = vst.msk [vmem:[#allocation3 + $0xaf] ss:$8 sm:$0x7] %vm2663_vm13, %v1223_v44  ;;  %v1241_v46 = vpop.permute.xlu0 %1240  ;;  %v1252_v47 = vrot.slane %v1251_v45, 1 }
 0x1f0   : > { %v1242_v48 = vrot.slane %v1241_v46, 1 }
 0x1f1   : > { %v1253_v49 = vsel %vm3216_vm7, %v1251_v45, %v1252_v47  ;;  %vm3221_vm7 = vcmask 424960  }
 0x1f2   : > { %v1243_v50 = vsel %vm3217_vm4, %v1241_v46, %v1242_v48  ;;  %1256 = vst.msk [vmem:[#allocation3 + $0xc2] ss:$8 sm:$0x7] %vm2663_vm13, %v1253_v49  ;;  %v1271_v51 = vpop.permute.xlu1 %1270  ;;  %vm3228_vm4 = vcmask 621568  }
 0x1f3   : > { %1246 = vst.msk [vmem:[#allocation3 + $0xc1] ss:$8 sm:$0x7] %vm2663_vm13, %v1243_v50  ;;  %v1261_v52 = vpop.permute.xlu0 %1260  ;;  %v1272_v53 = vrot.slane %v1271_v51, 1 }
 0x1f4   : > { %v1262_v54 = vrot.slane %v1261_v52, 1 }
 0x1f5   : > { %v1273_v58 = vsel %vm3218_vm6, %v1271_v51, %v1272_v53  ;;  %vm3229_vm6 = vcmask 629760  }
 0x1f6   : > { %v1263_v59 = vsel %vm3219_vm9, %v1261_v52, %v1262_v54  ;;  %v1618_v60 = vld [vmem:[#allocation3 + $0xb0] sm:$0xff]  ;;  %v1619_v61 = vld [vmem:[#allocation3 + $0xb8] sm:$0xff]  ;;  %v1617_v1 = vld [vmem:[#allocation3 + $0xa8] sm:$0xff]  ;;  %1276 = vst.msk [vmem:[#allocation3 + $0xc4] ss:$8 sm:$0x7] %vm2663_vm13, %v1273_v58  ;;  %v1291_v2 = vpop.permute.xlu1 %1290 }
 0x1f7   : > { %1266 = vst.msk [vmem:[#allocation3 + $0xc3] ss:$8 sm:$0x7] %vm2663_vm13, %v1263_v59  ;;  %v1281_v3 = vpop.permute.xlu0 %1280  ;;  %v1963_v4 = vpack.c.bf16 %v1618_v60, %v1615_v55  ;;  %v1993_v5 = vpack.c.bf16 %v1619_v61, %v1616_v56  ;;  %v1965_v6 = vpack.c.bf16 %v1617_v1, %v1614_v57  ;;  %v1292_v7 = vrot.slane %v1291_v2, 1 }
 0x1f8   : > { %v1282_v8 = vrot.slane %v1281_v3, 1  ;;  %vm3230_vm9 = vcmask 449536  }
 0x1f9   : > { %1964 = vmatprep.subr.bf16.mxu0 %v1963_v4  ;;  %1994 = vmatpush3.bf16.msra.mxu1 %v1993_v5  ;;  %v1293_v9 = vsel %vm3220_vm8, %v1291_v2, %v1292_v7  ;;  %vm3231_vm8 = vcmask 457728  }
 0x1fa   : > { %v1283_v10 = vsel %vm3221_vm7, %v1281_v3, %v1282_v8  ;;  %1966 = vmatpush1.bf16.msra.mxu0 %v1965_v6  ;;  %1995 = vmatprep.subr.bf16.mxu1 %v2285_v63  ;;  %1296 = vst.msk [vmem:[#allocation3 + $0xc6] ss:$8 sm:$0x7] %vm2663_vm13, %v1293_v9  ;;  %v1311_v11 = vpop.permute.xlu1 %1310  ;;  %vm3232_vm7 = vcmask 433152  }
 0x1fb   : > { %1286 = vst.msk [vmem:[#allocation3 + $0xc5] ss:$8 sm:$0x7] %vm2663_vm13, %v1283_v10  ;;  %v1301_v12 = vpop.permute.xlu0 %1300  ;;  %v1312_v13 = vrot.slane %v1311_v11, 1 }
 0x1fc   : > { %v1302_v14 = vrot.slane %v1301_v12, 1 }
 0x1fd   : > { %v1313_v15 = vsel %vm820_vm11, %v1311_v11, %v1312_v13 }
 0x1fe   : > { %v1303_v16 = vsel %vm809_vm12, %v1301_v12, %v1302_v14  ;;  %1316 = vst.msk [vmem:[#allocation3 + $0xd8] ss:$8 sm:$0x7] %vm2663_vm13, %v1313_v15  ;;  %v1331_v17 = vpop.permute.xlu1 %1330 }
 0x1ff   : > { %1306 = vst.msk [vmem:[#allocation3 + $0xc7] ss:$8 sm:$0x7] %vm2663_vm13, %v1303_v16  ;;  %v1321_v18 = vpop.permute.xlu0 %1320  ;;  %v1332_v19 = vrot.slane %v1331_v17, 1 }
 0x200   : > { %v1322_v20 = vrot.slane %v1321_v18, 1 }
 0x201   : > { %v1333_v21 = vsel %vm842_vm3, %v1331_v17, %v1332_v19 }
 0x202   : > { %v1323_v22 = vsel %vm831_vm10, %v1321_v18, %v1322_v20  ;;  %1336 = vst.msk [vmem:[#allocation3 + $0xda] ss:$8 sm:$0x7] %vm2663_vm13, %v1333_v21  ;;  %v1356_v23 = vpop.permute.xlu1 %1355 }
 0x203   : > { %1326 = vst.msk [vmem:[#allocation3 + $0xd9] ss:$8 sm:$0x7] %vm2663_vm13, %v1323_v22  ;;  %v1346_v24 = vpop.permute.xlu0 %1345  ;;  %v1357_v25 = vrot.slane %v1356_v23, 1 }
 0x204   : > { %v1347_v26 = vrot.slane %v1346_v24, 1 }
 0x205   : > { %v1358_v0 = vsel %vm600_vm14, %v1356_v23, %v1357_v25  ;;  %vm3222_vm14 = vcmask 826368  }
 0x206   : > { %v1348_v27 = vsel %vm589_vm15, %v1346_v24, %v1347_v26  ;;  %1361 = vst.msk [vmem:[#allocation3 + $0xdd] ss:$8 sm:$0x7] %vm2663_vm13, %v1358_v0  ;;  %v1376_v28 = vpop.permute.xlu1 %1375  ;;  %v1621_v45 = vld [vmem:[#allocation3 + $0xc8] sm:$0xff]  ;;  %v1622_v46 = vld [vmem:[#allocation3 + $0xd0] sm:$0xff]  ;;  %v1620_v47 = vld [vmem:[#allocation3 + $0xc0] sm:$0xff] }
 0x207   : > { %1351 = vst.msk [vmem:[#allocation3 + $0xdc] ss:$8 sm:$0x7] %vm2663_vm13, %v1348_v27  ;;  %v1366_v29 = vpop.permute.xlu0 %1365  ;;  %v1377_v30 = vrot.slane %v1376_v28, 1  ;;  %vm3223_vm15 = vcmask 834560  }
 0x208   : > { %v1367_v31 = vrot.slane %v1366_v29, 1 }
 0x209   : > { %v1378_v33 = vsel %vm622_vm0, %v1376_v28, %v1377_v30  ;;  %vm3224_vm0 = vcmask 654336  }
 0x20a   : > { %v1368_v34 = vsel %vm611_vm1, %v1366_v29, %v1367_v31  ;;  %1381 = vst.msk [vmem:[#allocation3 + $0xdf] ss:$8 sm:$0x7] %vm2663_vm13, %v1378_v33  ;;  %v1396_v35 = vpop.permute.xlu1 %1395  ;;  %vm3225_vm1 = vcmask 818176  }
 0x20b   : > { %1371 = vst.msk [vmem:[#allocation3 + $0xde] ss:$8 sm:$0x7] %vm2663_vm13, %v1368_v34  ;;  %v1386_v36 = vpop.permute.xlu0 %1385  ;;  %v1397_v37 = vrot.slane %v1396_v35, 1 }
 0x20c   : > { %v1387_v38 = vrot.slane %v1386_v36, 1 }
 0x20d   : > { %v1398_v39 = vsel %vm644_vm2, %v1396_v35, %v1397_v37  ;;  %vm3226_vm2 = vcmask 637952  }
 0x20e   : > { %v1388_v40 = vsel %vm633_vm5, %v1386_v36, %v1387_v38  ;;  %1401 = vst.msk [vmem:[#allocation3 + $0xf1] ss:$8 sm:$0x7] %vm2663_vm13, %v1398_v39  ;;  %v1416_v41 = vpop.permute.xlu1 %1415  ;;  %vm3227_vm5 = vcmask 646144  }
 0x20f   : > { %1391 = vst.msk [vmem:[#allocation3 + $0xf0] ss:$8 sm:$0x7] %vm2663_vm13, %v1388_v40  ;;  %v1406_v42 = vpop.permute.xlu0 %1405  ;;  %v1417_v43 = vrot.slane %v1416_v41, 1 }
 0x210   : > { %v1407_v44 = vrot.slane %v1406_v42, 1 }
 0x211   : > { %v1418_v48 = vsel %vm3222_vm14, %v1416_v41, %v1417_v43  ;;  %vm3233_vm14 = vcmask 441344  }
 0x212   : > { %v1408_v49 = vsel %vm3223_vm15, %v1406_v42, %v1407_v44  ;;  %v1624_v50 = vld [vmem:[#allocation3 + $0xe0] sm:$0xff]  ;;  %v1625_v51 = vld [vmem:[#allocation3 + $0xe8] sm:$0xff]  ;;  %v1623_v52 = vld [vmem:[#allocation3 + $0xd8] sm:$0xff]  ;;  %1421 = vst.msk [vmem:[#allocation3 + $0xf3] ss:$8 sm:$0x7] %vm2663_vm13, %v1418_v48  ;;  %v1436_v53 = vpop.permute.xlu1 %1435 }
 0x213   : > { %1411 = vst.msk [vmem:[#allocation3 + $0xf2] ss:$8 sm:$0x7] %vm2663_vm13, %v1408_v49  ;;  %v1426_v54 = vpop.permute.xlu0 %1425  ;;  %v1967_v55 = vpack.c.bf16 %v1624_v50, %v1621_v45  ;;  %v1996_v56 = vpack.c.bf16 %v1625_v51, %v1622_v46  ;;  %v1969_v57 = vpack.c.bf16 %v1623_v52, %v1620_v47  ;;  %v1437_v58 = vrot.slane %v1436_v53, 1 }
 0x214   : > { %v1427_v59 = vrot.slane %v1426_v54, 1  ;;  %vm3234_vm15 = vcmask 261120  }
 0x215   : > { %1968 = vmatprep.subr.bf16.mxu0 %v1967_v55  ;;  %1997 = vmatpush3.bf16.msra.mxu1 %v1996_v56  ;;  %v1438_v60 = vsel %vm3224_vm0, %v1436_v53, %v1437_v58  ;;  %vm3235_vm0 = vcmask 424960   ;;  %v1595_v58 = vld [vmem:[#allocation4] sm:$0xff] }
 0x216   : > { %v1428_v61 = vsel %vm3225_vm1, %v1426_v54, %v1427_v59  ;;  %1970 = vmatpush1.bf16.msra.mxu0 %v1969_v57  ;;  %1998 = vmatprep.subr.bf16.mxu1 %v2285_v63  ;;  %1441 = vst.msk [vmem:[#allocation3 + $0xf5] ss:$8 sm:$0x7] %vm2663_vm13, %v1438_v60  ;;  %v1456_v1 = vpop.permute.xlu1 %1455  ;;  %v1979_v57 = vpack.c.bf16 %v2872_v32, %v2872_v32 }
 0x217   : > { %1431 = vst.msk [vmem:[#allocation3 + $0xf4] ss:$8 sm:$0x7] %vm2663_vm13, %v1428_v61  ;;  %v1446_v2 = vpop.permute.xlu0 %1445  ;;  %v1457_v3 = vrot.slane %v1456_v1, 1 }
 0x218   : > { %v1447_v4 = vrot.slane %v1446_v2, 1 }
 0x219   : > { %v1458_v5 = vsel %vm3226_vm2, %v1456_v1, %v1457_v3 }
 0x21a   : > { %v1448_v6 = vsel %vm3227_vm5, %v1446_v2, %v1447_v4  ;;  %1461 = vst.msk [vmem:[#allocation3 + $0xf7] ss:$8 sm:$0x7] %vm2663_vm13, %v1458_v5  ;;  %v1476_v7 = vpop.permute.xlu1 %1475 }
 0x21b   : > { %1451 = vst.msk [vmem:[#allocation3 + $0xf6] ss:$8 sm:$0x7] %vm2663_vm13, %v1448_v6  ;;  %v1466_v8 = vpop.permute.xlu0 %1465  ;;  %v1477_v9 = vrot.slane %v1476_v7, 1 }
 0x21c   : > { %v1467_v10 = vrot.slane %v1466_v8, 1 }
 0x21d   : > { %v1478_v11 = vsel %vm3228_vm4, %v1476_v7, %v1477_v9 }
 0x21e   : > { %v1468_v12 = vsel %vm3229_vm6, %v1466_v8, %v1467_v10  ;;  %1481 = vst.msk [vmem:[#allocation3 + $0x109] ss:$8 sm:$0x7] %vm2663_vm13, %v1478_v11  ;;  %v1496_v13 = vpop.permute.xlu1 %1495 }
 0x21f   : > { %1471 = vst.msk [vmem:[#allocation3 + $0x108] ss:$8 sm:$0x7] %vm2663_vm13, %v1468_v12  ;;  %v1486_v14 = vpop.permute.xlu0 %1485  ;;  %v1497_v15 = vrot.slane %v1496_v13, 1 }
 0x220   : > { %v1487_v16 = vrot.slane %v1486_v14, 1 }
 0x221   : > { %v1498_v17 = vsel %vm3230_vm9, %v1496_v13, %v1497_v15 }
 0x222   : > { %v1488_v18 = vsel %vm3231_vm8, %v1486_v14, %v1487_v16  ;;  %1501 = vst.msk [vmem:[#allocation3 + $0x10b] ss:$8 sm:$0x7] %vm2663_vm13, %v1498_v17  ;;  %v1516_v19 = vpop.permute.xlu1 %1515  ;;  %v1627_v41 = vld [vmem:[#allocation3 + $0xf8] sm:$0xff]  ;;  %v1628_v42 = vld [vmem:[#allocation3 + $0x100] sm:$0xff]  ;;  %v1626_v43 = vld [vmem:[#allocation3 + $0xf0] sm:$0xff] }
 0x223   : > { %1491 = vst.msk [vmem:[#allocation3 + $0x10a] ss:$8 sm:$0x7] %vm2663_vm13, %v1488_v18  ;;  %v1506_v20 = vpop.permute.xlu0 %1505  ;;  %v1517_v21 = vrot.slane %v1516_v19, 1 }
 0x224   : > { %v1507_v22 = vrot.slane %v1506_v20, 1 }
 0x225   : > { %v1518_v23 = vsel %vm3232_vm7, %v1516_v19, %v1517_v21 }
 0x226   : > { %v1508_v24 = vsel %vm3233_vm14, %v1506_v20, %v1507_v22  ;;  %1521 = vst.msk [vmem:[#allocation3 + $0x10d] ss:$8 sm:$0x7] %vm2663_vm13, %v1518_v23  ;;  %v1536_v25 = vpop.permute.xlu1 %1535 }
 0x227   : > { %1511 = vst.msk [vmem:[#allocation3 + $0x10c] ss:$8 sm:$0x7] %vm2663_vm13, %v1508_v24  ;;  %v1526_v26 = vpop.permute.xlu0 %1525  ;;  %v1537_v0 = vrot.slane %v1536_v25, 1 }
 0x228   : > { %v1527_v27 = vrot.slane %v1526_v26, 1 }
 0x229   : > { %v1538_v28 = vsel %vm3234_vm15, %v1536_v25, %v1537_v0 }
 0x22a   : > { %v1528_v29 = vsel %vm3235_vm0, %v1526_v26, %v1527_v27  ;;  %1541 = vst.msk [vmem:[#allocation3 + $0x10f] ss:$8 sm:$0x7] %vm2663_vm13, %v1538_v28  ;;  %v1556_v30 = vpop.permute.xlu1 %1555 }
 0x22b   : > { %1531 = vst.msk [vmem:[#allocation3 + $0x10e] ss:$8 sm:$0x7] %vm2663_vm13, %v1528_v29  ;;  %v1546_v31 = vpop.permute.xlu0 %1545  ;;  %v1557_v33 = vrot.slane %v1556_v30, 1 }
 0x22c   : > { %v1547_v34 = vrot.slane %v1546_v31, 1 }
 0x22d   : > { %v1558_v35 = vsel %vm820_vm11, %v1556_v30, %v1557_v33 }
 0x22e   : > { %v1548_v36 = vsel %vm809_vm12, %v1546_v31, %v1547_v34  ;;  %1561 = vst.msk [vmem:[#allocation3 + $0x121] ss:$8 sm:$0x7] %vm2663_vm13, %v1558_v35  ;;  %v1576_v37 = vpop.permute.xlu1 %1575 }
 0x22f   : > { %1551 = vst.msk [vmem:[#allocation3 + $0x120] ss:$8 sm:$0x7] %vm2663_vm13, %v1548_v36  ;;  %v1566_v38 = vpop.permute.xlu0 %1565  ;;  %v1577_v39 = vrot.slane %v1576_v37, 1 }
 0x230   : > { %v1567_v40 = vrot.slane %v1566_v38, 1 }
 0x231   : > { %v1578_v44 = vsel %vm842_vm3, %v1576_v37, %v1577_v39 }
 0x232   : > { %v1568_v45 = vsel %vm831_vm10, %v1566_v38, %v1567_v40  ;;  %v1630_v46 = vld [vmem:[#allocation3 + $0x110] sm:$0xff]  ;;  %v1631_v47 = vld [vmem:[#allocation3 + $0x118] sm:$0xff]  ;;  %v1629_v48 = vld [vmem:[#allocation3 + $0x108] sm:$0xff]  ;;  %1581 = vst.msk [vmem:[#allocation3 + $0x123] ss:$8 sm:$0x7] %vm2663_vm13, %v1578_v44 }
 0x233   : > { %1571 = vst.msk [vmem:[#allocation3 + $0x122] ss:$8 sm:$0x7] %vm2663_vm13, %v1568_v45  ;;  %v1971_v49 = vpack.c.bf16 %v1630_v46, %v1627_v41  ;;  %v1999_v50 = vpack.c.bf16 %v1631_v47, %v1628_v42  ;;  %v1973_v51 = vpack.c.bf16 %v1629_v48, %v1626_v43 }
 0x235   : > { %1972 = vmatprep.subr.bf16.mxu0 %v1971_v49  ;;  %2000 = vmatpush3.bf16.msra.mxu1 %v1999_v50 }
 0x236   : > { %1974 = vmatpush1.bf16.msra.mxu0 %v1973_v51  ;;  %2001 = vmatprep.subr.bf16.mxu1 %v2285_v63 }
 0x23a   : > { %v1633_v52 = vld [vmem:[#allocation3 + $0x128] sm:$0xff]  ;;  %v1634_v53 = vld [vmem:[#allocation3 + $0x130] sm:$0xff]  ;;  %v1632_v54 = vld [vmem:[#allocation3 + $0x120] sm:$0xff] }
 0x23b   : > { %v1975_v55 = vpack.c.bf16 %v2872_v32, %v1633_v52  ;;  %v2002_v56 = vpack.c.bf16 %v2872_v32, %v1634_v53  ;;  %v1977_v62 = vpack.c.bf16 %v2872_v32, %v1632_v54 }
 0x23d   : > { %1976 = vmatprep.subr.bf16.mxu0 %v1975_v55  ;;  %2003 = vmatpush3.bf16.msra.mxu1 %v2002_v56 }
 0x23e   : > { %1978 = vmatpush1.bf16.msra.mxu0 %v1977_v62  ;;  %2004 = vmatprep.subr.bf16.mxu1 %v2285_v63 }
 0x23f   : > { %1980 = vmatprep.subr.bf16.mxu0 %v1979_v57 }
 0x241   : > { %2006 = vmatpush3.bf16.msra.mxu1 %v1979_v57 }
 0x242   : > { %1982 = vmatpush1.bf16.msra.mxu0 %v1979_v57 }
 0x244   : > { %1949 = vmatmul.mubr.f32.vlgmr.msra.gmra.mrb[0].mxu1 %v1595_v58 }
 0x245   : > { %1709 = vmatmul.mubr.f32.vlgmr.msra.gmra.mrb[0].mxu0 %v1595_v58 }
 0x317   : > { %v1781_v32 = vpop.f32.mrb[0].mxu1 }
 0x318   : > { %v1710_v59 = vpop.f32.mrb[0].mxu0  ;;  %1787 = vst [vmem:[%s174_s30 + $0x10] sm:$0xff] %v1781_v32  ;;  %v1950_v63 = vpop.f32.mrb[1].mxu1 }
 0x319   : > { %1785 = vst [vmem:[%s174_s30] sm:$0xff] %v1710_v59  ;;  %v1712_v60 = vpop.f32.mrb[1].mxu0 }
 0x31a   : > { %1786 = vst [vmem:[%s174_s30 + $0x8] sm:$0xff] %v1712_v60 }
 0x31b   : > { %2183 = shalt.err (!%p2180_p13)
}
 0x31c   : > { %s2184_s4 = scalar_lea.hbm %s3060_s14, 384  ;;  %s2188_s29 = scalar_lea.hbm %s3104_s2, 768 }
 0x31d   : > { %p2185_p7 = scmp.ne.s32.totalorder %s3060_s14, %s2184_s4  ;;  %p2189_p1 = scmp.lt.u32.totalorder %s3060_s14, %s3104_s2 }
 0x31e   : > { %p2190_p8 = scmp.lt.u32.totalorder %s2188_s29, %s2184_s4  ;;  %p2192_p9 = scmp.lt.u32.totalorder %s2184_s4, %s3060_s14 }
 0x31f   : > { %p2186_p3 = pnand %p2185_p7, %p3236_p10 }
 0x320   : > { %p2191_p11 = por %p2190_p8, %p2189_p1 }
 0x321   : > { %p2187_p12 = pneg %p2186_p3 }
 0x322   : > { %p2193_p2 = por %p2192_p9, %p2191_p11 }
 0x324   : > { %p2194_p4 = pnand %p2193_p2, %p2187_p12 }
 0x326   : > { %2197 = shalt.err (!%p2194_p4)
}
 0x327   : > { %2015 = dma.vmem_to_hbm [thread:$0]  (%p3236_p10), %s3055_s5, 384, %s3060_s14, %s1789_s27  }
 0x328 PF: > { %s1815_s20 = sand.u32 1, %s2228_s9   ;;  %p3237_p5 = scmp.ne.s32.totalorder %s3165_s22, 0 }
 0x329   : > { %p3238_p0 = scmp.ge.s32.totalorder %s2240_s12, 2  ;;  %s1816_s23 = scalar_lea.sflag [#allocation6], %s1815_s20 }
 0x32b   : > { %p2026_p6 = pnand %p3238_p0, %p3237_p5 }
 0x32d   : > { %2223 = dma.done.wait (!%p2026_p6), %s1816_s23, 384  }
 0x32e   : > { %2225 = vsyncadd (!%p2026_p6), %s1816_s23, 4294966912  ;;  %p16_p13 = scmp.ge.s32.totalorder %s2330_s15, 4   ;;  %s3239_s9 = smov %s2232_s10 }
 0x32f   : > { %s3240_s10 = smov %s2236_s11  ;;  %s3241_s11 = smov %s2342_s18 }
 0x330   : > { %s3242_s12 = smov %s2330_s15  ;;  %18 = sbr.rel (!%p16_p13) target bundleno = 6 (0x6), region = 180 }
 0x337   :  { %1821 = vsyncpa [#allocation5], 1 }
 0x338   :  { %1823 = vsyncpa [#allocation5 + $0x1], 1 }
 0x339   :  { %1824 = vsyncpa [#allocation8], 1 }
 0x33a   :  { %1826 = vsyncpa [#allocation8 + $0x1], 1 }
 0x33b   :  { %1827 = vsyncpa [#allocation6], 1 }
 0x33c   :  { %1829 = vsyncpa [#allocation6 + $0x1], 1 }

</bundles_post_ra>
